<compile_context>
chip_gen: v7x
topology: tpu7x:2x2x1
jax: 0.10.0
libtpu: 0.0.40
codegen_flags: <defaults>
</compile_context>

<pallas_src>
import functools

import jax
import jax.numpy as jnp
from jax.experimental import pallas as pl
from jax.experimental.pallas import tpu as pltpu


# ---------------------------------------------------------------------------
# XLA glue: patch extraction (im2col of the 4x4 / stride-2 / pad-1 conv)
# and weight re-packing.  These are tiny bf16 tensors.
# ---------------------------------------------------------------------------
def _im2col_4x4_s2_p1(x_nhwc):
    """(N,H,W,C) -> (N, H//2, W//2, 16*C) patches, columns ordered [kh, kw, c]."""
    N, H, W, C = x_nhwc.shape
    Ho, Wo = H // 2, W // 2
    xp = jnp.pad(x_nhwc, ((0, 0), (1, 1), (1, 1), (0, 0)))
    cols = [xp[:, kh:kh + 2 * Ho - 1:2, kw:kw + 2 * Wo - 1:2, :]
            for kh in range(4) for kw in range(4)]
    return jnp.concatenate(cols, axis=-1)


def _pack_conv_w(w_oihw):
    """(Cout,Cin,4,4) -> (16*Cin, Cout) bf16, row order [kh, kw, ci] (matches im2col)."""
    Cout, Cin, KH, KW = w_oihw.shape
    w = jnp.transpose(w_oihw, (2, 3, 1, 0))          # (KH, KW, Cin, Cout)
    return w.reshape(KH * KW * Cin, Cout).astype(jnp.bfloat16)


# ---------------------------------------------------------------------------
# Pallas kernels
# ---------------------------------------------------------------------------
def _stage1_kernel(x_ref, w_ref, o_ref):
    """conv1 (single dot) + LeakyReLU.  One image per grid step (parallel axis)."""
    acc = jnp.dot(x_ref[0], w_ref[...], preferred_element_type=jnp.float32)
    o_ref[0] = jnp.maximum(acc, 0.2 * acc).astype(o_ref.dtype)


def _stage_bn_kernel(x_ref, w_ref, g_ref, b_ref, o_ref):
    """conv (single big dot) + BatchNorm (batch stats, two-pass) + LeakyReLU."""
    acc = jnp.dot(x_ref[...], w_ref[...], preferred_element_type=jnp.float32)  # (M,Cout)
    mean = jnp.mean(acc, axis=0, keepdims=True)
    xc = acc - mean
    var = jnp.mean(xc * xc, axis=0, keepdims=True)          # biased var (PyTorch BN)
    scale = jax.lax.rsqrt(var + 1e-5) * g_ref[...]
    y = xc * scale + b_ref[...]
    o_ref[...] = jnp.maximum(y, 0.2 * y).astype(o_ref.dtype)


def _head_kernel(x_ref, w4_ref, g_ref, b_ref, w5_ref, o_ref, *, n):
    """conv4 + BatchNorm + LeakyReLU + conv5 (4x4 full window) + sigmoid."""
    acc = jnp.dot(x_ref[...], w4_ref[...], preferred_element_type=jnp.float32)  # (n*16,C)
    mean = jnp.mean(acc, axis=0, keepdims=True)
    xc = acc - mean
    var = jnp.mean(xc * xc, axis=0, keepdims=True)
    scale = jax.lax.rsqrt(var + 1e-5) * g_ref[...]
    y = xc * scale + b_ref[...]
    y = jnp.maximum(y, 0.2 * y)                              # (n*16, C), f32
    # conv5: weighted sum over the full 4x4xC window per image, then sigmoid.
    c = y.shape[-1]
    p = y.reshape(n, 16, c) * w5_ref[...][None, :, :]        # broadcast over batch
    z = jnp.sum(jnp.sum(p, axis=2), axis=1, keepdims=True)   # (n, 1)
    o_ref[...] = jax.nn.sigmoid(z)


# ---------------------------------------------------------------------------
# Stage wrappers (one pallas_call per fused stage)
# ---------------------------------------------------------------------------
def _stage1_call(lhs3, w):
    N, M, K = lhs3.shape
    Cout = w.shape[-1]
    return pl.pallas_call(
        _stage1_kernel,
        out_shape=jax.ShapeDtypeStruct((N, M, Cout), jnp.bfloat16),
        grid_spec=pltpu.PrefetchScalarGridSpec(
            num_scalar_prefetch=0,
            grid=(N,),
            in_specs=[pl.BlockSpec((1, M, K), lambda n: (n, 0, 0)),
                      pl.BlockSpec((K, Cout), lambda n: (0, 0))],
            out_specs=pl.BlockSpec((1, M, Cout), lambda n: (n, 0, 0)),
        ),
        compiler_params=pltpu.CompilerParams(dimension_semantics=("parallel",)),
    )(lhs3, w)


def _stage_bn_call(lhs, w, gamma, beta):
    M, K = lhs.shape
    Cout = w.shape[-1]
    return pl.pallas_call(
        _stage_bn_kernel,
        out_shape=jax.ShapeDtypeStruct((M, Cout), jnp.bfloat16),
        grid_spec=pltpu.PrefetchScalarGridSpec(
            num_scalar_prefetch=0,
            grid=(1,),
            in_specs=[pl.BlockSpec((M, K), lambda i: (0, 0)),
                      pl.BlockSpec((K, Cout), lambda i: (0, 0)),
                      pl.BlockSpec((1, Cout), lambda i: (0, 0)),
                      pl.BlockSpec((1, Cout), lambda i: (0, 0))],
            out_specs=pl.BlockSpec((M, Cout), lambda i: (0, 0)),
        ),
        compiler_params=pltpu.CompilerParams(dimension_semantics=("arbitrary",)),
    )(lhs, w,
      gamma.reshape(1, Cout).astype(jnp.float32),
      beta.reshape(1, Cout).astype(jnp.float32))


def _head_call(lhs, w4, gamma, beta, w5_oihw, n):
    M, K = lhs.shape                     # M == n * 16
    Cout = w4.shape[-1]
    # conv5 weight as a (16, Cout) f32 table indexed by (i*4+j, c).
    w5 = jnp.transpose(w5_oihw[0], (1, 2, 0)).reshape(16, Cout).astype(jnp.float32)
    kernel = functools.partial(_head_kernel, n=n)
    return pl.pallas_call(
        kernel,
        out_shape=jax.ShapeDtypeStruct((n, 1), jnp.float32),
        grid_spec=pltpu.PrefetchScalarGridSpec(
            num_scalar_prefetch=0,
            grid=(1,),
            in_specs=[pl.BlockSpec((M, K), lambda i: (0, 0)),
                      pl.BlockSpec((K, Cout), lambda i: (0, 0)),
                      pl.BlockSpec((1, Cout), lambda i: (0, 0)),
                      pl.BlockSpec((1, Cout), lambda i: (0, 0)),
                      pl.BlockSpec((16, Cout), lambda i: (0, 0))],
            out_specs=pl.BlockSpec((n, 1), lambda i: (0, 0)),
        ),
        compiler_params=pltpu.CompilerParams(dimension_semantics=("arbitrary",)),
    )(lhs, w4,
      gamma.reshape(1, Cout).astype(jnp.float32),
      beta.reshape(1, Cout).astype(jnp.float32), w5)


# ---------------------------------------------------------------------------
# _netlocalD parameters & forward
# ---------------------------------------------------------------------------
def init_params(key, nc, ndf):
    ks = jax.random.split(key, 8)

    def conv_w(k, cout, cin):
        return 0.02 * jax.random.normal(k, (cout, cin, 4, 4), jnp.float32)

    def bn_g(k, c):
        return 1.0 + 0.02 * jax.random.normal(k, (c,), jnp.float32)

    return {
        "w1": conv_w(ks[0], ndf, nc),
        "w2": conv_w(ks[1], ndf * 2, ndf),
        "g2": bn_g(ks[2], ndf * 2), "b2": jnp.zeros((ndf * 2,), jnp.float32),
        "w3": conv_w(ks[3], ndf * 4, ndf * 2),
        "g3": bn_g(ks[4], ndf * 4), "b3": jnp.zeros((ndf * 4,), jnp.float32),
        "w4": conv_w(ks[5], ndf * 8, ndf * 4),
        "g4": bn_g(ks[6], ndf * 8), "b4": jnp.zeros((ndf * 8,), jnp.float32),
        "w5": conv_w(ks[7], 1, ndf * 8),
    }


def netlocalD_forward(x_nchw, params):
    # NCHW (PyTorch) -> NHWC (kernel layout), bf16 activations between stages.
    x = jnp.transpose(x_nchw, (0, 2, 3, 1)).astype(jnp.bfloat16)
    N = x.shape[0]

    # stage 1: conv1 + LeakyReLU  (parallel over batch)
    p = _im2col_4x4_s2_p1(x)                                       # (N,Ho,Wo,16*nc)
    _, Ho, Wo, K = p.shape
    x = _stage1_call(p.reshape(N, Ho * Wo, K), _pack_conv_w(params["w1"]))
    x = x.reshape(N, Ho, Wo, -1)

    # stages 2 & 3: conv + BN + LeakyReLU (one fused dot each)
    for wk, gk, bk in (("w2", "g2", "b2"), ("w3", "g3", "b3")):
        p = _im2col_4x4_s2_p1(x)
        _, Ho, Wo, K = p.shape
        x = _stage_bn_call(p.reshape(N * Ho * Wo, K), _pack_conv_w(params[wk]),
                           params[gk], params[bk])
        x = x.reshape(N, Ho, Wo, -1)

    # stage 4 head: conv4 + BN + LeakyReLU + conv5 + sigmoid  (== output.view(-1, 1))
    p = _im2col_4x4_s2_p1(x)                                       # (N,4,4,16*4ndf)
    _, Ho, Wo, K = p.shape
    assert Ho == 4 and Wo == 4, (Ho, Wo)
    return _head_call(p.reshape(N * 16, K), _pack_conv_w(params["w4"]),
                      params["g4"], params["b4"], params["w5"], N)


# ---------------------------------------------------------------------------
# Pure-JAX reference (numerical sanity check)
# ---------------------------------------------------------------------------
def _reference_forward(x_nchw, params):
    x = jnp.transpose(x_nchw, (0, 2, 3, 1)).astype(jnp.float32)

    def conv(x, w, stride, pad):
        return jax.lax.conv_general_dilated(
            x, jnp.transpose(w, (2, 3, 1, 0)), (stride, stride),
            [(pad, pad), (pad, pad)],
            dimension_numbers=("NHWC", "HWIO", "NHWC"))

    def bn(x, g, b):
        m = jnp.mean(x, axis=(0, 1, 2), keepdims=True)
        v = jnp.mean((x - m) ** 2, axis=(0, 1, 2), keepdims=True)
        return (x - m) * jax.lax.rsqrt(v + 1e-5) * g + b

    lrelu = lambda t: jnp.where(t >= 0.0, t, 0.2 * t)

    x = lrelu(conv(x, params["w1"], 2, 1))
    x = lrelu(bn(conv(x, params["w2"], 2, 1), params["g2"], params["b2"]))
    x = lrelu(bn(conv(x, params["w3"], 2, 1), params["g3"], params["b3"]))
    x = lrelu(bn(conv(x, params["w4"], 2, 1), params["g4"], params["b4"]))
    x = jax.nn.sigmoid(conv(x, params["w5"], 1, 0))
    return x.reshape(-1, 1)


if __name__ == "__main__":
    key = jax.random.PRNGKey(0)
    kx, kp = jax.random.split(key)

    # opt.nc = 3, opt.ndf = 8 (small), 64x64 input so the net collapses to 1x1.
    nc, ndf = 3, 8
    x = jax.random.normal(kx, (2, nc, 64, 64), jnp.float32)
    params = init_params(kp, nc, ndf)

    out = jax.block_until_ready(jax.jit(netlocalD_forward)(x, params))

    assert out.shape == (2, 1), out.shape
    assert bool(jnp.all(jnp.isfinite(out)))
    assert bool(jnp.all((out >= 0.0) & (out <= 1.0)))

    ref = jax.block_until_ready(jax.jit(_reference_forward)(x, params))
    max_err = float(jnp.max(jnp.abs(out - ref)))
    assert max_err < 5e-2, max_err

    print("KERNEL_OK")
</pallas_src>

<mosaic_0001>
module attributes {stable_mosaic.version = 11 : i64} {
  func.func @_stage1_kernel(%arg0: i32, %arg1: memref<1x1024x48xbf16, #tpu.memory_space<vmem>>, %arg2: memref<48x8xbf16, #tpu.memory_space<vmem>>, %arg3: memref<1x1024x8xbf16, #tpu.memory_space<vmem>>) attributes {dimension_semantics = [#tpu.dimension_semantics<parallel>], iteration_bounds = array<i64: 2>, scalar_prefetch = 0 : i64, scratch_operands = 0 : i64, tpu.core_type = #tpu.core_type<tc>, window_params = [{transform_indices = @transform_0, window_bounds = array<i64: 1, 1024, 48>}, {pipeline_mode = #tpu.pipeline_mode<synchronous>, transform_indices = @transform_1, window_bounds = array<i64: 48, 8>}, {transform_indices = @transform_2, window_bounds = array<i64: 1, 1024, 8>}]} {
    %c0 = arith.constant 0 : index
    %c0_0 = arith.constant 0 : index
    %c0_1 = arith.constant 0 : index
    %0 = vector.load %arg1[%c0, %c0_0, %c0_1] : memref<1x1024x48xbf16, #tpu.memory_space<vmem>>, vector<1x1024x48xbf16>
    %1 = vector.shape_cast %0 : vector<1x1024x48xbf16> to vector<1024x48xbf16>
    %c0_2 = arith.constant 0 : index
    %c0_3 = arith.constant 0 : index
    %2 = vector.load %arg2[%c0_2, %c0_3] : memref<48x8xbf16, #tpu.memory_space<vmem>>, vector<48x8xbf16>
    %cst = arith.constant dense<0.000000e+00> : vector<1024x8xf32>
    %3 = tpu.matmul %1, %2, %cst {dimension_numbers = #tpu.dot_dimension_numbers<[1], [0], [0], [1], [0, 0, 1, 1], [], []>} : vector<1024x48xbf16>, vector<48x8xbf16>, vector<1024x8xf32> -> vector<1024x8xf32>
    %cst_4 = arith.constant 2.000000e-01 : f32
    %4 = vector.broadcast %cst_4 : f32 to vector<1024x8xf32>
    %5 = arith.mulf %4, %3 : vector<1024x8xf32>
    %6 = arith.maximumf %3, %5 : vector<1024x8xf32>
    %7 = arith.truncf %6 : vector<1024x8xf32> to vector<1024x8xbf16>
    %c0_5 = arith.constant 0 : index
    %c0_6 = arith.constant 0 : index
    %c0_7 = arith.constant 0 : index
    %8 = vector.load %arg3[%c0_5, %c0_6, %c0_7] : memref<1x1024x8xbf16, #tpu.memory_space<vmem>>, vector<1x1024x8xbf16>
    %9 = vector.shape_cast %8 : vector<1x1024x8xbf16> to vector<1024x8xbf16>
    %10 = vector.shape_cast %7 : vector<1024x8xbf16> to vector<1x1024x8xbf16>
    tpu.vector_store %arg3[%c0_5, %c0_6, %c0_7], %10 {strides = array<i32>} : memref<1x1024x8xbf16, #tpu.memory_space<vmem>>, vector<1x1024x8xbf16>,
    return
  }
  func.func @transform_0(%arg0: i32) -> (i32, i32, i32) {
    %c0_i32 = arith.constant 0 : i32
    %c0_i32_0 = arith.constant 0 : i32
    %c0_i32_1 = arith.constant 0 : i32
    return %arg0, %c0_i32, %c0_i32_0 : i32, i32, i32
  }
  func.func @transform_1(%arg0: i32) -> (i32, i32) {
    %c0_i32 = arith.constant 0 : i32
    %c0_i32_0 = arith.constant 0 : i32
    %c0_i32_1 = arith.constant 0 : i32
    return %c0_i32, %c0_i32_0 : i32, i32
  }
  func.func @transform_2(%arg0: i32) -> (i32, i32, i32) {
    %c0_i32 = arith.constant 0 : i32
    %c0_i32_0 = arith.constant 0 : i32
    %c0_i32_1 = arith.constant 0 : i32
    return %arg0, %c0_i32, %c0_i32_0 : i32, i32, i32
  }
}

module attributes {stable_mosaic.version = 11 : i64} {
  func.func @_stage_bn_kernel(%arg0: i32, %arg1: memref<512x128xbf16, #tpu.memory_space<vmem>>, %arg2: memref<128x16xbf16, #tpu.memory_space<vmem>>, %arg3: memref<1x16xf32, #tpu.memory_space<vmem>>, %arg4: memref<1x16xf32, #tpu.memory_space<vmem>>, %arg5: memref<512x16xbf16, #tpu.memory_space<vmem>>) attributes {dimension_semantics = [#tpu.dimension_semantics<arbitrary>], iteration_bounds = array<i64: 1>, scalar_prefetch = 0 : i64, scratch_operands = 0 : i64, tpu.core_type = #tpu.core_type<tc>, window_params = [{pipeline_mode = #tpu.pipeline_mode<synchronous>, transform_indices = @transform_0, window_bounds = array<i64: 512, 128>}, {pipeline_mode = #tpu.pipeline_mode<synchronous>, transform_indices = @transform_1, window_bounds = array<i64: 128, 16>}, {pipeline_mode = #tpu.pipeline_mode<synchronous>, transform_indices = @transform_2, window_bounds = array<i64: 1, 16>}, {pipeline_mode = #tpu.pipeline_mode<synchronous>, transform_indices = @transform_3, window_bounds = array<i64: 1, 16>}, {pipeline_mode = #tpu.pipeline_mode<synchronous>, transform_indices = @transform_4, window_bounds = array<i64: 512, 16>}]} {
    %c0 = arith.constant 0 : index
    %c0_0 = arith.constant 0 : index
    %0 = vector.load %arg1[%c0, %c0_0] : memref<512x128xbf16, #tpu.memory_space<vmem>>, vector<512x128xbf16>
    %c0_1 = arith.constant 0 : index
    %c0_2 = arith.constant 0 : index
    %1 = vector.load %arg2[%c0_1, %c0_2] : memref<128x16xbf16, #tpu.memory_space<vmem>>, vector<128x16xbf16>
    %cst = arith.constant dense<0.000000e+00> : vector<512x16xf32>
    %2 = tpu.matmul %0, %1, %cst {dimension_numbers = #tpu.dot_dimension_numbers<[1], [0], [0], [1], [0, 0, 1, 1], [], []>} : vector<512x128xbf16>, vector<128x16xbf16>, vector<512x16xf32> -> vector<512x16xf32>
    %cst_3 = arith.constant dense<0.000000e+00> : vector<16xf32>
    %3 = vector.multi_reduction <add>, %2, %cst_3 [0] : vector<512x16xf32> to vector<16xf32>
    %4 = vector.shape_cast %3 : vector<16xf32> to vector<1x16xf32>
    %cst_4 = arith.constant 5.120000e+02 : f32
    %5 = vector.broadcast %cst_4 : f32 to vector<1x16xf32>
    %6 = arith.divf %4, %5 : vector<1x16xf32>
    %7 = vector.broadcast %6 : vector<1x16xf32> to vector<512x16xf32>
    %8 = arith.subf %2, %7 : vector<512x16xf32>
    %9 = arith.mulf %8, %8 : vector<512x16xf32>
    %cst_5 = arith.constant dense<0.000000e+00> : vector<16xf32>
    %10 = vector.multi_reduction <add>, %9, %cst_5 [0] : vector<512x16xf32> to vector<16xf32>
    %11 = vector.shape_cast %10 : vector<16xf32> to vector<1x16xf32>
    %cst_6 = arith.constant 5.120000e+02 : f32
    %12 = vector.broadcast %cst_6 : f32 to vector<1x16xf32>
    %13 = arith.divf %11, %12 : vector<1x16xf32>
    %cst_7 = arith.constant 9.99999974E-6 : f32
    %14 = vector.broadcast %cst_7 : f32 to vector<1x16xf32>
    %15 = arith.addf %13, %14 : vector<1x16xf32>
    %16 = math.rsqrt %15 : vector<1x16xf32>
    %c0_8 = arith.constant 0 : index
    %c0_9 = arith.constant 0 : index
    %17 = vector.load %arg3[%c0_8, %c0_9] : memref<1x16xf32, #tpu.memory_space<vmem>>, vector<1x16xf32>
    %18 = arith.mulf %16, %17 : vector<1x16xf32>
    %19 = vector.broadcast %18 : vector<1x16xf32> to vector<512x16xf32>
    %20 = arith.mulf %8, %19 : vector<512x16xf32>
    %c0_10 = arith.constant 0 : index
    %c0_11 = arith.constant 0 : index
    %21 = vector.load %arg4[%c0_10, %c0_11] : memref<1x16xf32, #tpu.memory_space<vmem>>, vector<1x16xf32>
    %22 = vector.broadcast %21 : vector<1x16xf32> to vector<512x16xf32>
    %23 = arith.addf %20, %22 : vector<512x16xf32>
    %cst_12 = arith.constant 2.000000e-01 : f32
    %24 = vector.broadcast %cst_12 : f32 to vector<512x16xf32>
    %25 = arith.mulf %24, %23 : vector<512x16xf32>
    %26 = arith.maximumf %23, %25 : vector<512x16xf32>
    %27 = arith.truncf %26 : vector<512x16xf32> to vector<512x16xbf16>
    %c0_13 = arith.constant 0 : index
    %c0_14 = arith.constant 0 : index
    %28 = vector.load %arg5[%c0_13, %c0_14] : memref<512x16xbf16, #tpu.memory_space<vmem>>, vector<512x16xbf16>
    tpu.vector_store %arg5[%c0_13, %c0_14], %27 {strides = array<i32>} : memref<512x16xbf16, #tpu.memory_space<vmem>>, vector<512x16xbf16>,
    return
  }
  func.func @transform_0(%arg0: i32) -> (i32, i32) {
    %c0_i32 = arith.constant 0 : i32
    %c0_i32_0 = arith.constant 0 : i32
    %c0_i32_1 = arith.constant 0 : i32
    return %c0_i32, %c0_i32_0 : i32, i32
  }
  func.func @transform_1(%arg0: i32) -> (i32, i32) {
    %c0_i32 = arith.constant 0 : i32
    %c0_i32_0 = arith.constant 0 : i32
    %c0_i32_1 = arith.constant 0 : i32
    return %c0_i32, %c0_i32_0 : i32, i32
  }
  func.func @transform_2(%arg0: i32) -> (i32, i32) {
    %c0_i32 = arith.constant 0 : i32
    %c0_i32_0 = arith.constant 0 : i32
    %c0_i32_1 = arith.constant 0 : i32
    return %c0_i32, %c0_i32_0 : i32, i32
  }
  func.func @transform_3(%arg0: i32) -> (i32, i32) {
    %c0_i32 = arith.constant 0 : i32
    %c0_i32_0 = arith.constant 0 : i32
    %c0_i32_1 = arith.constant 0 : i32
    return %c0_i32, %c0_i32_0 : i32, i32
  }
  func.func @transform_4(%arg0: i32) -> (i32, i32) {
    %c0_i32 = arith.constant 0 : i32
    %c0_i32_0 = arith.constant 0 : i32
    %c0_i32_1 = arith.constant 0 : i32
    return %c0_i32, %c0_i32_0 : i32, i32
  }
}

module attributes {stable_mosaic.version = 11 : i64} {
  func.func @_stage_bn_kernel(%arg0: i32, %arg1: memref<128x256xbf16, #tpu.memory_space<vmem>>, %arg2: memref<256x32xbf16, #tpu.memory_space<vmem>>, %arg3: memref<1x32xf32, #tpu.memory_space<vmem>>, %arg4: memref<1x32xf32, #tpu.memory_space<vmem>>, %arg5: memref<128x32xbf16, #tpu.memory_space<vmem>>) attributes {dimension_semantics = [#tpu.dimension_semantics<arbitrary>], iteration_bounds = array<i64: 1>, scalar_prefetch = 0 : i64, scratch_operands = 0 : i64, tpu.core_type = #tpu.core_type<tc>, window_params = [{pipeline_mode = #tpu.pipeline_mode<synchronous>, transform_indices = @transform_0, window_bounds = array<i64: 128, 256>}, {pipeline_mode = #tpu.pipeline_mode<synchronous>, transform_indices = @transform_1, window_bounds = array<i64: 256, 32>}, {pipeline_mode = #tpu.pipeline_mode<synchronous>, transform_indices = @transform_2, window_bounds = array<i64: 1, 32>}, {pipeline_mode = #tpu.pipeline_mode<synchronous>, transform_indices = @transform_3, window_bounds = array<i64: 1, 32>}, {pipeline_mode = #tpu.pipeline_mode<synchronous>, transform_indices = @transform_4, window_bounds = array<i64: 128, 32>}]} {
    %c0 = arith.constant 0 : index
    %c0_0 = arith.constant 0 : index
    %0 = vector.load %arg1[%c0, %c0_0] : memref<128x256xbf16, #tpu.memory_space<vmem>>, vector<128x256xbf16>
    %c0_1 = arith.constant 0 : index
    %c0_2 = arith.constant 0 : index
    %1 = vector.load %arg2[%c0_1, %c0_2] : memref<256x32xbf16, #tpu.memory_space<vmem>>, vector<256x32xbf16>
    %cst = arith.constant dense<0.000000e+00> : vector<128x32xf32>
    %2 = tpu.matmul %0, %1, %cst {dimension_numbers = #tpu.dot_dimension_numbers<[1], [0], [0], [1], [0, 0, 1, 1], [], []>} : vector<128x256xbf16>, vector<256x32xbf16>, vector<128x32xf32> -> vector<128x32xf32>
    %cst_3 = arith.constant dense<0.000000e+00> : vector<32xf32>
    %3 = vector.multi_reduction <add>, %2, %cst_3 [0] : vector<128x32xf32> to vector<32xf32>
    %4 = vector.shape_cast %3 : vector<32xf32> to vector<1x32xf32>
    %cst_4 = arith.constant 1.280000e+02 : f32
    %5 = vector.broadcast %cst_4 : f32 to vector<1x32xf32>
    %6 = arith.divf %4, %5 : vector<1x32xf32>
    %7 = vector.broadcast %6 : vector<1x32xf32> to vector<128x32xf32>
    %8 = arith.subf %2, %7 : vector<128x32xf32>
    %9 = arith.mulf %8, %8 : vector<128x32xf32>
    %cst_5 = arith.constant dense<0.000000e+00> : vector<32xf32>
    %10 = vector.multi_reduction <add>, %9, %cst_5 [0] : vector<128x32xf32> to vector<32xf32>
    %11 = vector.shape_cast %10 : vector<32xf32> to vector<1x32xf32>
    %cst_6 = arith.constant 1.280000e+02 : f32
    %12 = vector.broadcast %cst_6 : f32 to vector<1x32xf32>
    %13 = arith.divf %11, %12 : vector<1x32xf32>
    %cst_7 = arith.constant 9.99999974E-6 : f32
    %14 = vector.broadcast %cst_7 : f32 to vector<1x32xf32>
    %15 = arith.addf %13, %14 : vector<1x32xf32>
    %16 = math.rsqrt %15 : vector<1x32xf32>
    %c0_8 = arith.constant 0 : index
    %c0_9 = arith.constant 0 : index
    %17 = vector.load %arg3[%c0_8, %c0_9] : memref<1x32xf32, #tpu.memory_space<vmem>>, vector<1x32xf32>
    %18 = arith.mulf %16, %17 : vector<1x32xf32>
    %19 = vector.broadcast %18 : vector<1x32xf32> to vector<128x32xf32>
    %20 = arith.mulf %8, %19 : vector<128x32xf32>
    %c0_10 = arith.constant 0 : index
    %c0_11 = arith.constant 0 : index
    %21 = vector.load %arg4[%c0_10, %c0_11] : memref<1x32xf32, #tpu.memory_space<vmem>>, vector<1x32xf32>
    %22 = vector.broadcast %21 : vector<1x32xf32> to vector<128x32xf32>
    %23 = arith.addf %20, %22 : vector<128x32xf32>
    %cst_12 = arith.constant 2.000000e-01 : f32
    %24 = vector.broadcast %cst_12 : f32 to vector<128x32xf32>
    %25 = arith.mulf %24, %23 : vector<128x32xf32>
    %26 = arith.maximumf %23, %25 : vector<128x32xf32>
    %27 = arith.truncf %26 : vector<128x32xf32> to vector<128x32xbf16>
    %c0_13 = arith.constant 0 : index
    %c0_14 = arith.constant 0 : index
    %28 = vector.load %arg5[%c0_13, %c0_14] : memref<128x32xbf16, #tpu.memory_space<vmem>>, vector<128x32xbf16>
    tpu.vector_store %arg5[%c0_13, %c0_14], %27 {strides = array<i32>} : memref<128x32xbf16, #tpu.memory_space<vmem>>, vector<128x32xbf16>,
    return
  }
  func.func @transform_0(%arg0: i32) -> (i32, i32) {
    %c0_i32 = arith.constant 0 : i32
    %c0_i32_0 = arith.constant 0 : i32
    %c0_i32_1 = arith.constant 0 : i32
    return %c0_i32, %c0_i32_0 : i32, i32
  }
  func.func @transform_1(%arg0: i32) -> (i32, i32) {
    %c0_i32 = arith.constant 0 : i32
    %c0_i32_0 = arith.constant 0 : i32
    %c0_i32_1 = arith.constant 0 : i32
    return %c0_i32, %c0_i32_0 : i32, i32
  }
  func.func @transform_2(%arg0: i32) -> (i32, i32) {
    %c0_i32 = arith.constant 0 : i32
    %c0_i32_0 = arith.constant 0 : i32
    %c0_i32_1 = arith.constant 0 : i32
    return %c0_i32, %c0_i32_0 : i32, i32
  }
  func.func @transform_3(%arg0: i32) -> (i32, i32) {
    %c0_i32 = arith.constant 0 : i32
    %c0_i32_0 = arith.constant 0 : i32
    %c0_i32_1 = arith.constant 0 : i32
    return %c0_i32, %c0_i32_0 : i32, i32
  }
  func.func @transform_4(%arg0: i32) -> (i32, i32) {
    %c0_i32 = arith.constant 0 : i32
    %c0_i32_0 = arith.constant 0 : i32
    %c0_i32_1 = arith.constant 0 : i32
    return %c0_i32, %c0_i32_0 : i32, i32
  }
}

module attributes {stable_mosaic.version = 11 : i64} {
  func.func @_head_kernel(%arg0: i32, %arg1: memref<32x512xbf16, #tpu.memory_space<vmem>>, %arg2: memref<512x64xbf16, #tpu.memory_space<vmem>>, %arg3: memref<1x64xf32, #tpu.memory_space<vmem>>, %arg4: memref<1x64xf32, #tpu.memory_space<vmem>>, %arg5: memref<16x64xf32, #tpu.memory_space<vmem>>, %arg6: memref<2x1xf32, #tpu.memory_space<vmem>>) attributes {dimension_semantics = [#tpu.dimension_semantics<arbitrary>], iteration_bounds = array<i64: 1>, scalar_prefetch = 0 : i64, scratch_operands = 0 : i64, tpu.core_type = #tpu.core_type<tc>, window_params = [{pipeline_mode = #tpu.pipeline_mode<synchronous>, transform_indices = @transform_0, window_bounds = array<i64: 32, 512>}, {pipeline_mode = #tpu.pipeline_mode<synchronous>, transform_indices = @transform_1, window_bounds = array<i64: 512, 64>}, {pipeline_mode = #tpu.pipeline_mode<synchronous>, transform_indices = @transform_2, window_bounds = array<i64: 1, 64>}, {pipeline_mode = #tpu.pipeline_mode<synchronous>, transform_indices = @transform_3, window_bounds = array<i64: 1, 64>}, {pipeline_mode = #tpu.pipeline_mode<synchronous>, transform_indices = @transform_4, window_bounds = array<i64: 16, 64>}, {pipeline_mode = #tpu.pipeline_mode<synchronous>, transform_indices = @transform_5, window_bounds = array<i64: 2, 1>}]} {
    %c0 = arith.constant 0 : index
    %c0_0 = arith.constant 0 : index
    %0 = vector.load %arg1[%c0, %c0_0] : memref<32x512xbf16, #tpu.memory_space<vmem>>, vector<32x512xbf16>
    %c0_1 = arith.constant 0 : index
    %c0_2 = arith.constant 0 : index
    %1 = vector.load %arg2[%c0_1, %c0_2] : memref<512x64xbf16, #tpu.memory_space<vmem>>, vector<512x64xbf16>
    %cst = arith.constant dense<0.000000e+00> : vector<32x64xf32>
    %2 = tpu.matmul %0, %1, %cst {dimension_numbers = #tpu.dot_dimension_numbers<[1], [0], [0], [1], [0, 0, 1, 1], [], []>} : vector<32x512xbf16>, vector<512x64xbf16>, vector<32x64xf32> -> vector<32x64xf32>
    %cst_3 = arith.constant dense<0.000000e+00> : vector<64xf32>
    %3 = vector.multi_reduction <add>, %2, %cst_3 [0] : vector<32x64xf32> to vector<64xf32>
    %4 = vector.shape_cast %3 : vector<64xf32> to vector<1x64xf32>
    %cst_4 = arith.constant 3.200000e+01 : f32
    %5 = vector.broadcast %cst_4 : f32 to vector<1x64xf32>
    %6 = arith.divf %4, %5 : vector<1x64xf32>
    %7 = vector.broadcast %6 : vector<1x64xf32> to vector<32x64xf32>
    %8 = arith.subf %2, %7 : vector<32x64xf32>
    %9 = arith.mulf %8, %8 : vector<32x64xf32>
    %cst_5 = arith.constant dense<0.000000e+00> : vector<64xf32>
    %10 = vector.multi_reduction <add>, %9, %cst_5 [0] : vector<32x64xf32> to vector<64xf32>
    %11 = vector.shape_cast %10 : vector<64xf32> to vector<1x64xf32>
    %cst_6 = arith.constant 3.200000e+01 : f32
    %12 = vector.broadcast %cst_6 : f32 to vector<1x64xf32>
    %13 = arith.divf %11, %12 : vector<1x64xf32>
    %cst_7 = arith.constant 9.99999974E-6 : f32
    %14 = vector.broadcast %cst_7 : f32 to vector<1x64xf32>
    %15 = arith.addf %13, %14 : vector<1x64xf32>
    %16 = math.rsqrt %15 : vector<1x64xf32>
    %c0_8 = arith.constant 0 : index
    %c0_9 = arith.constant 0 : index
    %17 = vector.load %arg3[%c0_8, %c0_9] : memref<1x64xf32, #tpu.memory_space<vmem>>, vector<1x64xf32>
    %18 = arith.mulf %16, %17 : vector<1x64xf32>
    %19 = vector.broadcast %18 : vector<1x64xf32> to vector<32x64xf32>
    %20 = arith.mulf %8, %19 : vector<32x64xf32>
    %c0_10 = arith.constant 0 : index
    %c0_11 = arith.constant 0 : index
    %21 = vector.load %arg4[%c0_10, %c0_11] : memref<1x64xf32, #tpu.memory_space<vmem>>, vector<1x64xf32>
    %22 = vector.broadcast %21 : vector<1x64xf32> to vector<32x64xf32>
    %23 = arith.addf %20, %22 : vector<32x64xf32>
    %cst_12 = arith.constant 2.000000e-01 : f32
    %24 = vector.broadcast %cst_12 : f32 to vector<32x64xf32>
    %25 = arith.mulf %24, %23 : vector<32x64xf32>
    %26 = arith.maximumf %23, %25 : vector<32x64xf32>
    %27 = vector.shape_cast %26 : vector<32x64xf32> to vector<2x16x64xf32>
    %c0_13 = arith.constant 0 : index
    %c0_14 = arith.constant 0 : index
    %28 = vector.load %arg5[%c0_13, %c0_14] : memref<16x64xf32, #tpu.memory_space<vmem>>, vector<16x64xf32>
    %29 = vector.shape_cast %28 : vector<16x64xf32> to vector<1x16x64xf32>
    %30 = vector.broadcast %29 : vector<1x16x64xf32> to vector<2x16x64xf32>
    %31 = arith.mulf %27, %30 : vector<2x16x64xf32>
    %cst_15 = arith.constant dense<0.000000e+00> : vector<2x16xf32>
    %32 = vector.multi_reduction <add>, %31, %cst_15 [2] : vector<2x16x64xf32> to vector<2x16xf32>
    %cst_16 = arith.constant dense<0.000000e+00> : vector<2xf32>
    %33 = vector.multi_reduction <add>, %32, %cst_16 [1] : vector<2x16xf32> to vector<2xf32>
    %34 = vector.shape_cast %33 : vector<2xf32> to vector<2x1xf32>
    %35 = arith.negf %34 : vector<2x1xf32>
    %36 = math.exp %35 : vector<2x1xf32>
    %cst_17 = arith.constant 1.000000e+00 : f32
    %37 = vector.broadcast %cst_17 : f32 to vector<2x1xf32>
    %38 = arith.addf %37, %36 : vector<2x1xf32>
    %39 = arith.divf %37, %38 : vector<2x1xf32>
    %c0_18 = arith.constant 0 : index
    %c0_19 = arith.constant 0 : index
    %40 = vector.load %arg6[%c0_18, %c0_19] : memref<2x1xf32, #tpu.memory_space<vmem>>, vector<2x1xf32>
    tpu.vector_store %arg6[%c0_18, %c0_19], %39 {strides = array<i32>} : memref<2x1xf32, #tpu.memory_space<vmem>>, vector<2x1xf32>,
    return
  }
  func.func @transform_0(%arg0: i32) -> (i32, i32) {
    %c0_i32 = arith.constant 0 : i32
    %c0_i32_0 = arith.constant 0 : i32
    %c0_i32_1 = arith.constant 0 : i32
    return %c0_i32, %c0_i32_0 : i32, i32
  }
  func.func @transform_1(%arg0: i32) -> (i32, i32) {
    %c0_i32 = arith.constant 0 : i32
    %c0_i32_0 = arith.constant 0 : i32
    %c0_i32_1 = arith.constant 0 : i32
    return %c0_i32, %c0_i32_0 : i32, i32
  }
  func.func @transform_2(%arg0: i32) -> (i32, i32) {
    %c0_i32 = arith.constant 0 : i32
    %c0_i32_0 = arith.constant 0 : i32
    %c0_i32_1 = arith.constant 0 : i32
    return %c0_i32, %c0_i32_0 : i32, i32
  }
  func.func @transform_3(%arg0: i32) -> (i32, i32) {
    %c0_i32 = arith.constant 0 : i32
    %c0_i32_0 = arith.constant 0 : i32
    %c0_i32_1 = arith.constant 0 : i32
    return %c0_i32, %c0_i32_0 : i32, i32
  }
  func.func @transform_4(%arg0: i32) -> (i32, i32) {
    %c0_i32 = arith.constant 0 : i32
    %c0_i32_0 = arith.constant 0 : i32
    %c0_i32_1 = arith.constant 0 : i32
    return %c0_i32, %c0_i32_0 : i32, i32
  }
  func.func @transform_5(%arg0: i32) -> (i32, i32) {
    %c0_i32 = arith.constant 0 : i32
    %c0_i32_0 = arith.constant 0 : i32
    %c0_i32_1 = arith.constant 0 : i32
    return %c0_i32, %c0_i32_0 : i32, i32
  }
}

</mosaic_0001>

<bundles_post_ra>
// kernel: netlocalD_forward.4
= control target key start
LH: loop header
LB: loop body
LE: loop exit
PB: predicated region body
PF: predicated region fallthrough
CT: control target
= control target key end

     0   :  { %s3012_s9 = smov 0   ;;  %s3433_s0 = inlined_call_operand.vmem [shape: bf16[2,1024,48], index: 0, kind: input, shape index: {}]   ;;  %s3434_s1 = inlined_call_operand.vmem [shape: bf16[48,8], index: 1, kind: input, shape index: {}]   ;;  %s3435_s2 = inlined_call_operand.vmem [shape: bf16[2,1024,8], index: 2, kind: output, shape index: {}]  }
   0x1 LB: > { %s2307_s10 = sadd.s32 4294967295, %s2995_s9   ;;  %p2311_p0 = scmp.ge.s32.totalorder %s2995_s9, 1  ;;  %s2995_s9 = sphi %s3012_s9, %s12_s9  }
   0x2   : > { %p112_p1 = scmp.lt.s32.totalorder %s2995_s9, 3 }
   0x4   : > { %p113_p2 = pnand %p2311_p0, %p112_p1 }
   0x5   : > { %v2922_v0 = vld [vmem:[%s3434_s1] sm:$0xff] (!%p113_p2)   ;;  %p134_p3 = scmp.lt.s32.totalorder (!%p113_p2), %s2307_s10, 1  ;;  %v2923_v1 = vld [vmem:[%s3434_s1 + $0x8] sm:$0xff] (!%p113_p2)   ;;  %v2924_v2 = vld [vmem:[%s3434_s1 + $0x10] sm:$0xff] (!%p113_p2)   ;;  %vm617_vm0 = vcmask (!%p113_p2), 392192   ;;  %vm2123_vm1 = vcmask (!%p113_p2), 60416  }
   0x6   : > { %116 = sbr.rel (%p113_p2) target bundleno = 363 (0x16b), region = 28  ;;  %2774 = vmatprep.subr.bf16.mxu0 (!%p113_p2), %v2922_v0  ;;  %2908 = vmatprep.subr.bf16.mxu1 (!%p113_p2), %v2922_v0 }
   0x7   : > { %2775 = vmatpush3.bf16.msra.mxu0 (!%p113_p2), %v2922_v0  ;;  %2911 = vmatpush3.bf16.msra.mxu1 (!%p113_p2), %v2922_v0 }
   0x8   : > { %2776 = vmatprep.subr.bf16.mxu0 (!%p113_p2), %v2923_v1  ;;  %2909 = vmatprep.subr.bf16.mxu1 (!%p113_p2), %v2923_v1 }
   0xb   : > { %2777 = vmatpush3.bf16.msra.mxu0 (!%p113_p2), %v2923_v1  ;;  %2912 = vmatpush3.bf16.msra.mxu1 (!%p113_p2), %v2923_v1 }
   0xc   : > { %2778 = vmatprep.subr.bf16.mxu0 (!%p113_p2), %v2924_v2  ;;  %2910 = vmatprep.subr.bf16.mxu1 (!%p113_p2), %v2924_v2 }
   0xd   : > { %s3437_s10 = smov (!%p134_p3, %s2307_s10), 1 }
   0xe   : > { %s2577_s17 = sshll.u32 %s3437_s10, 9 }
   0xf   : > { %s3037_s20 = scalar_lea.vmem %s3433_s0, %s2577_s17  ;;  %2779 = vmatpush3.bf16.msra.mxu0 %v2924_v2  ;;  %2913 = vmatpush3.bf16.msra.mxu1 %v2924_v2  ;;  %s3172_s23 = scalar_lea.vmem %s3435_s2, %s2577_s17 }
  0x10   : > { %v2925_v3 = vld [vmem:[%s3037_s20] sm:$0xff]   ;;  %v2927_v5 = vld [vmem:[%s3037_s20 + $0x8] sm:$0xff]   ;;  %v2929_v7 = vld [vmem:[%s3037_s20 + $0x10] sm:$0xff]  }
  0x11   : > { %v2926_v4 = vld [vmem:[%s3037_s20 + $0x100] sm:$0xff]   ;;  %2780 = vmatprep.mubr.msk.bf16.mxu0 %vm617_vm0, %v2925_v3  ;;  %v2928_v6 = vld [vmem:[%s3037_s20 + $0x108] sm:$0xff]   ;;  %v2930_v8 = vld [vmem:[%s3037_s20 + $0x110] sm:$0xff]  }
  0x12   : > { %2844 = vmatprep.mubr.msk.bf16.mxu1 %vm617_vm0, %v2926_v4  ;;  %2781 = vmatmul.mubr.msk.bf16.vlgmr.msra.gmra.mrb[0].mxu0 %vm617_vm0, %v2927_v5  ;;  %v2931_v9 = vld [vmem:[%s3037_s20 + $0x18] sm:$0xff]   ;;  %v2933_v11 = vld [vmem:[%s3037_s20 + $0x20] sm:$0xff]   ;;  %v2935_v13 = vld [vmem:[%s3037_s20 + $0x28] sm:$0xff]  }
  0x13   : > { %2845 = vmatmul.mubr.msk.bf16.vlgmr.msra.gmra.mrb[0].mxu1 %vm617_vm0, %v2928_v6  ;;  %2784 = vmatprep.mubr.msk.bf16.mxu0 %vm617_vm0, %v2929_v7  ;;  %v2932_v10 = vld [vmem:[%s3037_s20 + $0x118] sm:$0xff]   ;;  %v2934_v12 = vld [vmem:[%s3037_s20 + $0x120] sm:$0xff]   ;;  %v2936_v14 = vld [vmem:[%s3037_s20 + $0x128] sm:$0xff]  }
  0x14   : > { %2848 = vmatprep.mubr.msk.bf16.mxu1 %vm617_vm0, %v2930_v8  ;;  %v2937_v15 = vld [vmem:[%s3037_s20 + $0x30] sm:$0xff]   ;;  %v2939_v17 = vld [vmem:[%s3037_s20 + $0x38] sm:$0xff]   ;;  %v2941_v19 = vld [vmem:[%s3037_s20 + $0x40] sm:$0xff]  }
  0x15   : > { %v2938_v16 = vld [vmem:[%s3037_s20 + $0x130] sm:$0xff]   ;;  %v2940_v18 = vld [vmem:[%s3037_s20 + $0x138] sm:$0xff]   ;;  %v2942_v20 = vld [vmem:[%s3037_s20 + $0x140] sm:$0xff]  }
  0x16   : > { %v2943_v21 = vld [vmem:[%s3037_s20 + $0x48] sm:$0xff]   ;;  %v2945_v23 = vld [vmem:[%s3037_s20 + $0x50] sm:$0xff]   ;;  %v2947_v25 = vld [vmem:[%s3037_s20 + $0x58] sm:$0xff]  }
  0x17   : > { %v2944_v22 = vld [vmem:[%s3037_s20 + $0x148] sm:$0xff]   ;;  %v2946_v24 = vld [vmem:[%s3037_s20 + $0x150] sm:$0xff]   ;;  %v2948_v26 = vld [vmem:[%s3037_s20 + $0x158] sm:$0xff]  }
  0x18   : > { %v2949_v27 = vld [vmem:[%s3037_s20 + $0x60] sm:$0xff]   ;;  %v2951_v29 = vld [vmem:[%s3037_s20 + $0x68] sm:$0xff]   ;;  %v2953_v31 = vld [vmem:[%s3037_s20 + $0x70] sm:$0xff]  }
  0x19   : > { %v2950_v28 = vld [vmem:[%s3037_s20 + $0x160] sm:$0xff]   ;;  %v2952_v30 = vld [vmem:[%s3037_s20 + $0x168] sm:$0xff]   ;;  %v2954_v32 = vld [vmem:[%s3037_s20 + $0x170] sm:$0xff]  }
  0x1a   : > { %2785 = vmatmul.mubr.msk.bf16.gmra.mrb[4].mxu0 %vm617_vm0, %v2931_v9  ;;  %v2955_v33 = vld [vmem:[%s3037_s20 + $0x78] sm:$0xff]   ;;  %v2957_v35 = vld [vmem:[%s3037_s20 + $0x80] sm:$0xff]   ;;  %v2959_v37 = vld [vmem:[%s3037_s20 + $0x88] sm:$0xff]  }
  0x1b   : > { %2849 = vmatmul.mubr.msk.bf16.gmra.mrb[4].mxu1 %vm617_vm0, %v2932_v10  ;;  %2788 = vmatprep.mubr.msk.bf16.mxu0 %vm617_vm0, %v2933_v11  ;;  %v2956_v34 = vld [vmem:[%s3037_s20 + $0x178] sm:$0xff]   ;;  %v2958_v36 = vld [vmem:[%s3037_s20 + $0x180] sm:$0xff]   ;;  %v2960_v38 = vld [vmem:[%s3037_s20 + $0x188] sm:$0xff]  }
  0x1c   : > { %2852 = vmatprep.mubr.msk.bf16.mxu1 %vm617_vm0, %v2934_v12  ;;  %v2961_v39 = vld [vmem:[%s3037_s20 + $0x90] sm:$0xff]   ;;  %v2963_v41 = vld [vmem:[%s3037_s20 + $0x98] sm:$0xff]   ;;  %v2965_v43 = vld [vmem:[%s3037_s20 + $0xa0] sm:$0xff]  }
  0x1d   : > { %v2962_v40 = vld [vmem:[%s3037_s20 + $0x190] sm:$0xff]   ;;  %v2964_v42 = vld [vmem:[%s3037_s20 + $0x198] sm:$0xff]   ;;  %v2966_v44 = vld [vmem:[%s3037_s20 + $0x1a0] sm:$0xff]  }
  0x1e   : > { %v2967_v45 = vld [vmem:[%s3037_s20 + $0xa8] sm:$0xff]   ;;  %v2969_v47 = vld [vmem:[%s3037_s20 + $0xb0] sm:$0xff]   ;;  %v2971_v49 = vld [vmem:[%s3037_s20 + $0xb8] sm:$0xff]  }
  0x1f   : > { %v2968_v46 = vld [vmem:[%s3037_s20 + $0x1a8] sm:$0xff]   ;;  %v2970_v48 = vld [vmem:[%s3037_s20 + $0x1b0] sm:$0xff]   ;;  %v2972_v50 = vld [vmem:[%s3037_s20 + $0x1b8] sm:$0xff]  }
  0x20   : > { %v2973_v51 = vld [vmem:[%s3037_s20 + $0xc0] sm:$0xff]   ;;  %v2975_v53 = vld [vmem:[%s3037_s20 + $0xc8] sm:$0xff]   ;;  %v2977_v55 = vld [vmem:[%s3037_s20 + $0xd0] sm:$0xff]  }
  0x21   : > { %v2974_v52 = vld [vmem:[%s3037_s20 + $0x1c0] sm:$0xff]   ;;  %v2976_v54 = vld [vmem:[%s3037_s20 + $0x1c8] sm:$0xff]   ;;  %v2978_v56 = vld [vmem:[%s3037_s20 + $0x1d0] sm:$0xff]  }
  0x22   : > { %2789 = vmatmul.mubr.msk.bf16.gmra.mrb[8].mxu0 %vm617_vm0, %v2935_v13  ;;  %v2979_v57 = vld [vmem:[%s3037_s20 + $0xd8] sm:$0xff]   ;;  %v2981_v59 = vld [vmem:[%s3037_s20 + $0xe0] sm:$0xff]   ;;  %v2983_v61 = vld [vmem:[%s3037_s20 + $0xe8] sm:$0xff]  }
  0x23   : > { %2853 = vmatmul.mubr.msk.bf16.gmra.mrb[8].mxu1 %vm617_vm0, %v2936_v14  ;;  %2792 = vmatprep.mubr.msk.bf16.mxu0 %vm617_vm0, %v2937_v15  ;;  %v2980_v58 = vld [vmem:[%s3037_s20 + $0x1d8] sm:$0xff]   ;;  %v2982_v60 = vld [vmem:[%s3037_s20 + $0x1e0] sm:$0xff]   ;;  %v2984_v62 = vld [vmem:[%s3037_s20 + $0x1e8] sm:$0xff]  }
  0x24   : > { %2856 = vmatprep.mubr.msk.bf16.mxu1 %vm617_vm0, %v2938_v16  ;;  %v2985_v63 = vld [vmem:[%s3037_s20 + $0xf0] sm:$0xff]   ;;  %v2987_v1 = vld [vmem:[%s3037_s20 + $0xf8] sm:$0xff]  }
  0x25   : > { %v2986_v0 = vld [vmem:[%s3037_s20 + $0x1f0] sm:$0xff]   ;;  %v2988_v2 = vld [vmem:[%s3037_s20 + $0x1f8] sm:$0xff]  }
  0x2a   : > { %2793 = vmatmul.mubr.msk.bf16.gmra.mrb[12].mxu0 %vm617_vm0, %v2939_v17 }
  0x2b   : > { %2857 = vmatmul.mubr.msk.bf16.gmra.mrb[12].mxu1 %vm617_vm0, %v2940_v18  ;;  %2796 = vmatprep.mubr.msk.bf16.mxu0 %vm617_vm0, %v2941_v19 }
  0x2c   : > { %2860 = vmatprep.mubr.msk.bf16.mxu1 %vm617_vm0, %v2942_v20 }
  0x32   : > { %2797 = vmatmul.mubr.msk.bf16.gmra.mrb[16].mxu0 %vm617_vm0, %v2943_v21 }
  0x33   : > { %2861 = vmatmul.mubr.msk.bf16.gmra.mrb[16].mxu1 %vm617_vm0, %v2944_v22  ;;  %2800 = vmatprep.mubr.msk.bf16.mxu0 %vm617_vm0, %v2945_v23 }
  0x34   : > { %2864 = vmatprep.mubr.msk.bf16.mxu1 %vm617_vm0, %v2946_v24 }
  0x3a   : > { %2801 = vmatmul.mubr.msk.bf16.gmra.mrb[20].mxu0 %vm617_vm0, %v2947_v25 }
  0x3b   : > { %2865 = vmatmul.mubr.msk.bf16.gmra.mrb[20].mxu1 %vm617_vm0, %v2948_v26  ;;  %2804 = vmatprep.mubr.msk.bf16.mxu0 %vm617_vm0, %v2949_v27 }
  0x3c   : > { %2868 = vmatprep.mubr.msk.bf16.mxu1 %vm617_vm0, %v2950_v28 }
  0x42   : > { %2805 = vmatmul.mubr.msk.bf16.gmra.mrb[24].mxu0 %vm617_vm0, %v2951_v29 }
  0x43   : > { %2869 = vmatmul.mubr.msk.bf16.gmra.mrb[24].mxu1 %vm617_vm0, %v2952_v30  ;;  %2808 = vmatprep.mubr.msk.bf16.mxu0 %vm617_vm0, %v2953_v31 }
  0x44   : > { %2872 = vmatprep.mubr.msk.bf16.mxu1 %vm617_vm0, %v2954_v32 }
  0x4a   : > { %2809 = vmatmul.mubr.msk.bf16.gmra.mrb[28].mxu0 %vm617_vm0, %v2955_v33 }
  0x4b   : > { %2873 = vmatmul.mubr.msk.bf16.gmra.mrb[28].mxu1 %vm617_vm0, %v2956_v34  ;;  %2812 = vmatprep.mubr.msk.bf16.mxu0 %vm617_vm0, %v2957_v35 }
  0x4c   : > { %2876 = vmatprep.mubr.msk.bf16.mxu1 %vm617_vm0, %v2958_v36 }
  0x52   : > { %2813 = vmatmul.mubr.msk.bf16.gmra.mrb[32].mxu0 %vm617_vm0, %v2959_v37 }
  0x53   : > { %2877 = vmatmul.mubr.msk.bf16.gmra.mrb[32].mxu1 %vm617_vm0, %v2960_v38  ;;  %2816 = vmatprep.mubr.msk.bf16.mxu0 %vm617_vm0, %v2961_v39 }
  0x54   : > { %2880 = vmatprep.mubr.msk.bf16.mxu1 %vm617_vm0, %v2962_v40 }
  0x5a   : > { %2817 = vmatmul.mubr.msk.bf16.gmra.mrb[36].mxu0 %vm617_vm0, %v2963_v41 }
  0x5b   : > { %2881 = vmatmul.mubr.msk.bf16.gmra.mrb[36].mxu1 %vm617_vm0, %v2964_v42  ;;  %2820 = vmatprep.mubr.msk.bf16.mxu0 %vm617_vm0, %v2965_v43 }
  0x5c   : > { %2884 = vmatprep.mubr.msk.bf16.mxu1 %vm617_vm0, %v2966_v44 }
  0x62   : > { %2821 = vmatmul.mubr.msk.bf16.gmra.mrb[40].mxu0 %vm617_vm0, %v2967_v45 }
  0x63   : > { %2885 = vmatmul.mubr.msk.bf16.gmra.mrb[40].mxu1 %vm617_vm0, %v2968_v46  ;;  %2824 = vmatprep.mubr.msk.bf16.mxu0 %vm617_vm0, %v2969_v47 }
  0x64   : > { %2888 = vmatprep.mubr.msk.bf16.mxu1 %vm617_vm0, %v2970_v48 }
  0x6a   : > { %2825 = vmatmul.mubr.msk.bf16.gmra.mrb[44].mxu0 %vm617_vm0, %v2971_v49 }
  0x6b   : > { %2889 = vmatmul.mubr.msk.bf16.gmra.mrb[44].mxu1 %vm617_vm0, %v2972_v50  ;;  %2828 = vmatprep.mubr.msk.bf16.mxu0 %vm617_vm0, %v2973_v51 }
  0x6c   : > { %2892 = vmatprep.mubr.msk.bf16.mxu1 %vm617_vm0, %v2974_v52 }
  0x72   : > { %2829 = vmatmul.mubr.msk.bf16.gmra.mrb[48].mxu0 %vm617_vm0, %v2975_v53 }
  0x73   : > { %2893 = vmatmul.mubr.msk.bf16.gmra.mrb[48].mxu1 %vm617_vm0, %v2976_v54  ;;  %2832 = vmatprep.mubr.msk.bf16.mxu0 %vm617_vm0, %v2977_v55 }
  0x74   : > { %2896 = vmatprep.mubr.msk.bf16.mxu1 %vm617_vm0, %v2978_v56 }
  0x7a   : > { %2833 = vmatmul.mubr.msk.bf16.gmra.mrb[52].mxu0 %vm617_vm0, %v2979_v57 }
  0x7b   : > { %2897 = vmatmul.mubr.msk.bf16.gmra.mrb[52].mxu1 %vm617_vm0, %v2980_v58  ;;  %2836 = vmatprep.mubr.msk.bf16.mxu0 %vm617_vm0, %v2981_v59 }
  0x7c   : > { %2900 = vmatprep.mubr.msk.bf16.mxu1 %vm617_vm0, %v2982_v60 }
  0x82   : > { %2837 = vmatmul.mubr.msk.bf16.gmra.mrb[56].mxu0 %vm617_vm0, %v2983_v61 }
  0x83   : > { %2901 = vmatmul.mubr.msk.bf16.gmra.mrb[56].mxu1 %vm617_vm0, %v2984_v62  ;;  %2840 = vmatprep.mubr.msk.bf16.mxu0 %vm617_vm0, %v2985_v63 }
  0x84   : > { %2904 = vmatprep.mubr.msk.bf16.mxu1 %vm617_vm0, %v2986_v0 }
  0x8a   : > { %2841 = vmatmul.mubr.msk.bf16.gmra.mrb[60].mxu0 %vm617_vm0, %v2987_v1 }
  0x8b   : > { %2905 = vmatmul.mubr.msk.bf16.gmra.mrb[60].mxu1 %vm617_vm0, %v2988_v2 }
  0xe5   : > { %v2782_v3 = vpop.f32.mrb[0].mxu0 }
  0xe6   : > { %v2846_v4 = vpop.f32.mrb[0].mxu1  ;;  %v1357_v5 = vmul.f32 0.2, %v2782_v3  ;;  %v844_v7 = vpop.f32.mrb[1].mxu0 }
  0xe7   : > { %v1421_v6 = vmul.f32 0.2, %v2846_v4  ;;  %v1100_v8 = vpop.f32.mrb[1].mxu1  ;;  %v1355_v9 = vmul.f32 0.2, %v844_v7  ;;  %v2783_v11 = vpop.f32.mrb[2].mxu0 }
  0xe8   : > { %v1419_v10 = vmul.f32 0.2, %v1100_v8  ;;  %v2847_v12 = vpop.f32.mrb[2].mxu1  ;;  %v1485_v13 = vmax.f32 %v2782_v3, %v1357_v5  ;;  %v1358_v15 = vmul.f32 0.2, %v2783_v11  ;;  %v847_v17 = vpop.f32.mrb[3].mxu0 }
  0xe9   : > { %v1549_v14 = vmax.f32 %v2846_v4, %v1421_v6  ;;  %v1422_v16 = vmul.f32 0.2, %v2847_v12  ;;  %v1103_v18 = vpop.f32.mrb[3].mxu1  ;;  %v1483_v19 = vmax.f32 %v844_v7, %v1355_v9  ;;  %v1356_v21 = vmul.f32 0.2, %v847_v17 }
  0xea   : > { %v1547_v20 = vmax.f32 %v1100_v8, %v1419_v10  ;;  %v1420_v22 = vmul.f32 0.2, %v1103_v18  ;;  %v2581_v23 = vpack.c.bf16 %v1485_v13, %v1485_v13  ;;  %v1486_v25 = vmax.f32 %v2783_v11, %v1358_v15 }
  0xeb   : > { %v2645_v24 = vpack.c.bf16 %v1549_v14, %v1549_v14  ;;  %v1550_v26 = vmax.f32 %v2847_v12, %v1422_v16  ;;  %v2579_v27 = vpack.c.bf16 %v1483_v19, %v1483_v19  ;;  %v1484_v29 = vmax.f32 %v847_v17, %v1356_v21 }
  0xec   : > { %v2643_v28 = vpack.c.bf16 %v1547_v20, %v1547_v20  ;;  %v1548_v30 = vmax.f32 %v1103_v18, %v1420_v22  ;;  %2126 = vst.msk [vmem:[%s3172_s23 + $0x8] sm:$0xf] %vm2123_vm1, %v2581_v23  ;;  %v2582_v31 = vpack.c.bf16 %v1486_v25, %v1486_v25 }
  0xed   : > { %2190 = vst.msk [vmem:[%s3172_s23 + $0x108] sm:$0xf] %vm2123_vm1, %v2645_v24  ;;  %v2646_v32 = vpack.c.bf16 %v1550_v26, %v1550_v26  ;;  %2124 = vst.msk [vmem:[%s3172_s23] sm:$0xf] %vm2123_vm1, %v2579_v27  ;;  %v2580_v33 = vpack.c.bf16 %v1484_v29, %v1484_v29  ;;  %v2786_v35 = vpop.f32.mrb[4].mxu0 }
  0xee   : > { %2188 = vst.msk [vmem:[%s3172_s23 + $0x100] sm:$0xf] %vm2123_vm1, %v2643_v28  ;;  %v2644_v34 = vpack.c.bf16 %v1548_v30, %v1548_v30  ;;  %v2850_v36 = vpop.f32.mrb[4].mxu1  ;;  %2127 = vst.msk [vmem:[%s3172_s23 + $0xc] sm:$0xf] %vm2123_vm1, %v2582_v31  ;;  %v860_v39 = vpop.f32.mrb[5].mxu0 }
  0xef   : > { %2191 = vst.msk [vmem:[%s3172_s23 + $0x10c] sm:$0xf] %vm2123_vm1, %v2646_v32  ;;  %v1361_v37 = vmul.f32 0.2, %v2786_v35  ;;  %v1425_v38 = vmul.f32 0.2, %v2850_v36 }
  0xf0   : > { %v1116_v40 = vpop.f32.mrb[5].mxu1  ;;  %2125 = vst.msk [vmem:[%s3172_s23 + $0x4] sm:$0xf] %vm2123_vm1, %v2580_v33  ;;  %2189 = vst.msk [vmem:[%s3172_s23 + $0x104] sm:$0xf] %vm2123_vm1, %v2644_v34  ;;  %v2787_v43 = vpop.f32.mrb[6].mxu0 }
  0xf1   : > { %v1359_v41 = vmul.f32 0.2, %v860_v39  ;;  %v1423_v42 = vmul.f32 0.2, %v1116_v40  ;;  %v2851_v44 = vpop.f32.mrb[6].mxu1  ;;  %v1489_v45 = vmax.f32 %v2786_v35, %v1361_v37  ;;  %v1553_v46 = vmax.f32 %v2850_v36, %v1425_v38  ;;  %v863_v49 = vpop.f32.mrb[7].mxu0 }
  0xf2   : > { %v1362_v47 = vmul.f32 0.2, %v2787_v43  ;;  %v1426_v48 = vmul.f32 0.2, %v2851_v44  ;;  %v1119_v50 = vpop.f32.mrb[7].mxu1 }
  0xf3   : > { %v1487_v51 = vmax.f32 %v860_v39, %v1359_v41  ;;  %v1551_v52 = vmax.f32 %v1116_v40, %v1423_v42  ;;  %v1360_v53 = vmul.f32 0.2, %v863_v49  ;;  %v1424_v54 = vmul.f32 0.2, %v1119_v50 }
  0xf4   : > { %v2585_v55 = vpack.c.bf16 %v1489_v45, %v1489_v45  ;;  %v2649_v56 = vpack.c.bf16 %v1553_v46, %v1553_v46  ;;  %v1490_v57 = vmax.f32 %v2787_v43, %v1362_v47  ;;  %v1554_v58 = vmax.f32 %v2851_v44, %v1426_v48 }
  0xf5   : > { %v2583_v59 = vpack.c.bf16 %v1487_v51, %v1487_v51  ;;  %v2647_v60 = vpack.c.bf16 %v1551_v52, %v1551_v52  ;;  %v1488_v61 = vmax.f32 %v863_v49, %v1360_v53  ;;  %v1552_v62 = vmax.f32 %v1119_v50, %v1424_v54  ;;  %v2790_v3 = vpop.f32.mrb[8].mxu0 }
  0xf6   : > { %2130 = vst.msk [vmem:[%s3172_s23 + $0x18] sm:$0xf] %vm2123_vm1, %v2585_v55  ;;  %2194 = vst.msk [vmem:[%s3172_s23 + $0x118] sm:$0xf] %vm2123_vm1, %v2649_v56  ;;  %v2586_v63 = vpack.c.bf16 %v1490_v57, %v1490_v57  ;;  %v2650_v0 = vpack.c.bf16 %v1554_v58, %v1554_v58  ;;  %v2854_v4 = vpop.f32.mrb[8].mxu1  ;;  %v876_v7 = vpop.f32.mrb[9].mxu0 }
  0xf7   : > { %2128 = vst.msk [vmem:[%s3172_s23 + $0x10] sm:$0xf] %vm2123_vm1, %v2583_v59  ;;  %2192 = vst.msk [vmem:[%s3172_s23 + $0x110] sm:$0xf] %vm2123_vm1, %v2647_v60  ;;  %v2584_v1 = vpack.c.bf16 %v1488_v61, %v1488_v61  ;;  %v2648_v2 = vpack.c.bf16 %v1552_v62, %v1552_v62  ;;  %v1365_v5 = vmul.f32 0.2, %v2790_v3 }
  0xf8   : > { %2131 = vst.msk [vmem:[%s3172_s23 + $0x1c] sm:$0xf] %vm2123_vm1, %v2586_v63  ;;  %2195 = vst.msk [vmem:[%s3172_s23 + $0x11c] sm:$0xf] %vm2123_vm1, %v2650_v0  ;;  %v1429_v6 = vmul.f32 0.2, %v2854_v4 }
  0xf9   : > { %v1132_v8 = vpop.f32.mrb[9].mxu1  ;;  %2129 = vst.msk [vmem:[%s3172_s23 + $0x14] sm:$0xf] %vm2123_vm1, %v2584_v1  ;;  %2193 = vst.msk [vmem:[%s3172_s23 + $0x114] sm:$0xf] %vm2123_vm1, %v2648_v2  ;;  %v2791_v11 = vpop.f32.mrb[10].mxu0  ;;  %v1493_v13 = vmax.f32 %v2790_v3, %v1365_v5 }
  0xfa   : > { %v1363_v9 = vmul.f32 0.2, %v876_v7  ;;  %v1427_v10 = vmul.f32 0.2, %v1132_v8  ;;  %v2855_v12 = vpop.f32.mrb[10].mxu1  ;;  %v1557_v14 = vmax.f32 %v2854_v4, %v1429_v6  ;;  %v879_v17 = vpop.f32.mrb[11].mxu0 }
  0xfb   : > { %v1366_v15 = vmul.f32 0.2, %v2791_v11  ;;  %v1430_v16 = vmul.f32 0.2, %v2855_v12  ;;  %v1135_v18 = vpop.f32.mrb[11].mxu1  ;;  %v2589_v23 = vpack.c.bf16 %v1493_v13, %v1493_v13 }
  0xfc   : > { %v1491_v19 = vmax.f32 %v876_v7, %v1363_v9  ;;  %v1555_v20 = vmax.f32 %v1132_v8, %v1427_v10  ;;  %v1364_v21 = vmul.f32 0.2, %v879_v17  ;;  %v1428_v22 = vmul.f32 0.2, %v1135_v18 }
  0xfd   : > { %v2653_v24 = vpack.c.bf16 %v1557_v14, %v1557_v14  ;;  %v1494_v25 = vmax.f32 %v2791_v11, %v1366_v15  ;;  %v1558_v26 = vmax.f32 %v2855_v12, %v1430_v16  ;;  %2134 = vst.msk [vmem:[%s3172_s23 + $0x28] sm:$0xf] %vm2123_vm1, %v2589_v23  ;;  %v2794_v35 = vpop.f32.mrb[12].mxu0 }
  0xfe   : > { %v2587_v27 = vpack.c.bf16 %v1491_v19, %v1491_v19  ;;  %v2651_v28 = vpack.c.bf16 %v1555_v20, %v1555_v20  ;;  %v1492_v29 = vmax.f32 %v879_v17, %v1364_v21  ;;  %v1556_v30 = vmax.f32 %v1135_v18, %v1428_v22  ;;  %v2858_v36 = vpop.f32.mrb[12].mxu1  ;;  %v892_v39 = vpop.f32.mrb[13].mxu0 }
  0xff   : > { %2198 = vst.msk [vmem:[%s3172_s23 + $0x128] sm:$0xf] %vm2123_vm1, %v2653_v24  ;;  %v2590_v31 = vpack.c.bf16 %v1494_v25, %v1494_v25  ;;  %v2654_v32 = vpack.c.bf16 %v1558_v26, %v1558_v26  ;;  %v1369_v37 = vmul.f32 0.2, %v2794_v35  ;;  %v1433_v38 = vmul.f32 0.2, %v2858_v36 }
 0x100   : > { %2132 = vst.msk [vmem:[%s3172_s23 + $0x20] sm:$0xf] %vm2123_vm1, %v2587_v27  ;;  %2196 = vst.msk [vmem:[%s3172_s23 + $0x120] sm:$0xf] %vm2123_vm1, %v2651_v28  ;;  %v2588_v33 = vpack.c.bf16 %v1492_v29, %v1492_v29  ;;  %v2652_v34 = vpack.c.bf16 %v1556_v30, %v1556_v30  ;;  %v1148_v40 = vpop.f32.mrb[13].mxu1  ;;  %v2795_v43 = vpop.f32.mrb[14].mxu0 }
 0x101   : > { %2135 = vst.msk [vmem:[%s3172_s23 + $0x2c] sm:$0xf] %vm2123_vm1, %v2590_v31  ;;  %2199 = vst.msk [vmem:[%s3172_s23 + $0x12c] sm:$0xf] %vm2123_vm1, %v2654_v32  ;;  %v1367_v41 = vmul.f32 0.2, %v892_v39  ;;  %v1497_v45 = vmax.f32 %v2794_v35, %v1369_v37  ;;  %v1561_v46 = vmax.f32 %v2858_v36, %v1433_v38 }
 0x102   : > { %2133 = vst.msk [vmem:[%s3172_s23 + $0x24] sm:$0xf] %vm2123_vm1, %v2588_v33  ;;  %2197 = vst.msk [vmem:[%s3172_s23 + $0x124] sm:$0xf] %vm2123_vm1, %v2652_v34  ;;  %v1431_v42 = vmul.f32 0.2, %v1148_v40 }
 0x103   : > { %v2859_v44 = vpop.f32.mrb[14].mxu1  ;;  %v1370_v47 = vmul.f32 0.2, %v2795_v43  ;;  %v895_v49 = vpop.f32.mrb[15].mxu0  ;;  %v1495_v51 = vmax.f32 %v892_v39, %v1367_v41  ;;  %v2593_v55 = vpack.c.bf16 %v1497_v45, %v1497_v45  ;;  %v2657_v56 = vpack.c.bf16 %v1561_v46, %v1561_v46 }
 0x104   : > { %v1434_v48 = vmul.f32 0.2, %v2859_v44  ;;  %v1151_v50 = vpop.f32.mrb[15].mxu1  ;;  %v1559_v52 = vmax.f32 %v1148_v40, %v1431_v42  ;;  %v1368_v53 = vmul.f32 0.2, %v895_v49 }
 0x105   : > { %v1432_v54 = vmul.f32 0.2, %v1151_v50  ;;  %v1498_v57 = vmax.f32 %v2795_v43, %v1370_v47  ;;  %v2591_v59 = vpack.c.bf16 %v1495_v51, %v1495_v51  ;;  %2138 = vst.msk [vmem:[%s3172_s23 + $0x38] sm:$0xf] %vm2123_vm1, %v2593_v55  ;;  %2202 = vst.msk [vmem:[%s3172_s23 + $0x138] sm:$0xf] %vm2123_vm1, %v2657_v56 }
 0x106   : > { %v1562_v58 = vmax.f32 %v2859_v44, %v1434_v48  ;;  %v2655_v60 = vpack.c.bf16 %v1559_v52, %v1559_v52  ;;  %v1496_v61 = vmax.f32 %v895_v49, %v1368_v53  ;;  %v2798_v3 = vpop.f32.mrb[16].mxu0  ;;  %v2862_v4 = vpop.f32.mrb[16].mxu1 }
 0x107   : > { %v1560_v62 = vmax.f32 %v1151_v50, %v1432_v54  ;;  %v2594_v63 = vpack.c.bf16 %v1498_v57, %v1498_v57  ;;  %2136 = vst.msk [vmem:[%s3172_s23 + $0x30] sm:$0xf] %vm2123_vm1, %v2591_v59  ;;  %v1373_v5 = vmul.f32 0.2, %v2798_v3  ;;  %v1437_v6 = vmul.f32 0.2, %v2862_v4 }
 0x108   : > { %v2658_v0 = vpack.c.bf16 %v1562_v58, %v1562_v58  ;;  %2200 = vst.msk [vmem:[%s3172_s23 + $0x130] sm:$0xf] %vm2123_vm1, %v2655_v60  ;;  %v2592_v1 = vpack.c.bf16 %v1496_v61, %v1496_v61  ;;  %v908_v7 = vpop.f32.mrb[17].mxu0  ;;  %v1164_v8 = vpop.f32.mrb[17].mxu1 }
 0x109   : > { %v2656_v2 = vpack.c.bf16 %v1560_v62, %v1560_v62  ;;  %2139 = vst.msk [vmem:[%s3172_s23 + $0x3c] sm:$0xf] %vm2123_vm1, %v2594_v63  ;;  %v1371_v9 = vmul.f32 0.2, %v908_v7  ;;  %v1435_v10 = vmul.f32 0.2, %v1164_v8  ;;  %v1501_v13 = vmax.f32 %v2798_v3, %v1373_v5 }
 0x10a   : > { %2203 = vst.msk [vmem:[%s3172_s23 + $0x13c] sm:$0xf] %vm2123_vm1, %v2658_v0  ;;  %2137 = vst.msk [vmem:[%s3172_s23 + $0x34] sm:$0xf] %vm2123_vm1, %v2592_v1  ;;  %v2799_v11 = vpop.f32.mrb[18].mxu0  ;;  %v2863_v12 = vpop.f32.mrb[18].mxu1  ;;  %v1565_v14 = vmax.f32 %v2862_v4, %v1437_v6 }
 0x10b   : > { %2201 = vst.msk [vmem:[%s3172_s23 + $0x134] sm:$0xf] %vm2123_vm1, %v2656_v2  ;;  %v1374_v15 = vmul.f32 0.2, %v2799_v11  ;;  %v1438_v16 = vmul.f32 0.2, %v2863_v12  ;;  %v1499_v19 = vmax.f32 %v908_v7, %v1371_v9  ;;  %v1563_v20 = vmax.f32 %v1164_v8, %v1435_v10 }
 0x10c   : > { %v911_v17 = vpop.f32.mrb[19].mxu0  ;;  %v1167_v18 = vpop.f32.mrb[19].mxu1  ;;  %v2597_v23 = vpack.c.bf16 %v1501_v13, %v1501_v13  ;;  %v2661_v24 = vpack.c.bf16 %v1565_v14, %v1565_v14 }
 0x10d   : > { %v1372_v21 = vmul.f32 0.2, %v911_v17  ;;  %v1436_v22 = vmul.f32 0.2, %v1167_v18  ;;  %v1502_v25 = vmax.f32 %v2799_v11, %v1374_v15  ;;  %v1566_v26 = vmax.f32 %v2863_v12, %v1438_v16  ;;  %v2802_v35 = vpop.f32.mrb[20].mxu0 }
 0x10e   : > { %v2595_v27 = vpack.c.bf16 %v1499_v19, %v1499_v19  ;;  %v2659_v28 = vpack.c.bf16 %v1563_v20, %v1563_v20  ;;  %2142 = vst.msk [vmem:[%s3172_s23 + $0x48] sm:$0xf] %vm2123_vm1, %v2597_v23  ;;  %2206 = vst.msk [vmem:[%s3172_s23 + $0x148] sm:$0xf] %vm2123_vm1, %v2661_v24  ;;  %v2866_v36 = vpop.f32.mrb[20].mxu1  ;;  %v924_v39 = vpop.f32.mrb[21].mxu0 }
 0x10f   : > { %v1500_v29 = vmax.f32 %v911_v17, %v1372_v21  ;;  %v1564_v30 = vmax.f32 %v1167_v18, %v1436_v22  ;;  %v2598_v31 = vpack.c.bf16 %v1502_v25, %v1502_v25  ;;  %v2662_v32 = vpack.c.bf16 %v1566_v26, %v1566_v26  ;;  %v1180_v40 = vpop.f32.mrb[21].mxu1  ;;  %v2803_v43 = vpop.f32.mrb[22].mxu0 }
 0x110   : > { %2140 = vst.msk [vmem:[%s3172_s23 + $0x40] sm:$0xf] %vm2123_vm1, %v2595_v27  ;;  %2204 = vst.msk [vmem:[%s3172_s23 + $0x140] sm:$0xf] %vm2123_vm1, %v2659_v28  ;;  %v1377_v37 = vmul.f32 0.2, %v2802_v35 }
 0x111   : > { %v2596_v33 = vpack.c.bf16 %v1500_v29, %v1500_v29  ;;  %v2660_v34 = vpack.c.bf16 %v1564_v30, %v1564_v30  ;;  %2143 = vst.msk [vmem:[%s3172_s23 + $0x4c] sm:$0xf] %vm2123_vm1, %v2598_v31  ;;  %2207 = vst.msk [vmem:[%s3172_s23 + $0x14c] sm:$0xf] %vm2123_vm1, %v2662_v32  ;;  %v1441_v38 = vmul.f32 0.2, %v2866_v36 }
 0x112   : > { %v1375_v41 = vmul.f32 0.2, %v924_v39  ;;  %v1439_v42 = vmul.f32 0.2, %v1180_v40  ;;  %v2867_v44 = vpop.f32.mrb[22].mxu1  ;;  %v1505_v45 = vmax.f32 %v2802_v35, %v1377_v37  ;;  %v927_v49 = vpop.f32.mrb[23].mxu0 }
 0x113   : > { %2141 = vst.msk [vmem:[%s3172_s23 + $0x44] sm:$0xf] %vm2123_vm1, %v2596_v33  ;;  %2205 = vst.msk [vmem:[%s3172_s23 + $0x144] sm:$0xf] %vm2123_vm1, %v2660_v34  ;;  %v1569_v46 = vmax.f32 %v2866_v36, %v1441_v38  ;;  %v1378_v47 = vmul.f32 0.2, %v2803_v43 }
 0x114   : > { %v1442_v48 = vmul.f32 0.2, %v2867_v44  ;;  %v1183_v50 = vpop.f32.mrb[23].mxu1  ;;  %v1503_v51 = vmax.f32 %v924_v39, %v1375_v41  ;;  %v1567_v52 = vmax.f32 %v1180_v40, %v1439_v42  ;;  %v1376_v53 = vmul.f32 0.2, %v927_v49 }
 0x115   : > { %v1440_v54 = vmul.f32 0.2, %v1183_v50  ;;  %v2601_v55 = vpack.c.bf16 %v1505_v45, %v1505_v45  ;;  %v2665_v56 = vpack.c.bf16 %v1569_v46, %v1569_v46  ;;  %v1506_v57 = vmax.f32 %v2803_v43, %v1378_v47  ;;  %v2806_v3 = vpop.f32.mrb[24].mxu0 }
 0x116   : > { %v1570_v58 = vmax.f32 %v2867_v44, %v1442_v48  ;;  %v2599_v59 = vpack.c.bf16 %v1503_v51, %v1503_v51  ;;  %v2663_v60 = vpack.c.bf16 %v1567_v52, %v1567_v52  ;;  %v1504_v61 = vmax.f32 %v927_v49, %v1376_v53  ;;  %v2870_v4 = vpop.f32.mrb[24].mxu1  ;;  %v940_v7 = vpop.f32.mrb[25].mxu0 }
 0x117   : > { %v1568_v62 = vmax.f32 %v1183_v50, %v1440_v54  ;;  %2146 = vst.msk [vmem:[%s3172_s23 + $0x58] sm:$0xf] %vm2123_vm1, %v2601_v55  ;;  %2210 = vst.msk [vmem:[%s3172_s23 + $0x158] sm:$0xf] %vm2123_vm1, %v2665_v56  ;;  %v2602_v63 = vpack.c.bf16 %v1506_v57, %v1506_v57  ;;  %v1381_v5 = vmul.f32 0.2, %v2806_v3 }
 0x118   : > { %v2666_v0 = vpack.c.bf16 %v1570_v58, %v1570_v58  ;;  %2144 = vst.msk [vmem:[%s3172_s23 + $0x50] sm:$0xf] %vm2123_vm1, %v2599_v59  ;;  %2208 = vst.msk [vmem:[%s3172_s23 + $0x150] sm:$0xf] %vm2123_vm1, %v2663_v60  ;;  %v2600_v1 = vpack.c.bf16 %v1504_v61, %v1504_v61  ;;  %v1445_v6 = vmul.f32 0.2, %v2870_v4 }
 0x119   : > { %v2664_v2 = vpack.c.bf16 %v1568_v62, %v1568_v62  ;;  %2147 = vst.msk [vmem:[%s3172_s23 + $0x5c] sm:$0xf] %vm2123_vm1, %v2602_v63  ;;  %v1196_v8 = vpop.f32.mrb[25].mxu1  ;;  %v1379_v9 = vmul.f32 0.2, %v940_v7  ;;  %v2807_v11 = vpop.f32.mrb[26].mxu0  ;;  %v1509_v13 = vmax.f32 %v2806_v3, %v1381_v5 }
 0x11a   : > { %2211 = vst.msk [vmem:[%s3172_s23 + $0x15c] sm:$0xf] %vm2123_vm1, %v2666_v0  ;;  %2145 = vst.msk [vmem:[%s3172_s23 + $0x54] sm:$0xf] %vm2123_vm1, %v2600_v1  ;;  %v1443_v10 = vmul.f32 0.2, %v1196_v8  ;;  %v1573_v14 = vmax.f32 %v2870_v4, %v1445_v6 }
 0x11b   : > { %2209 = vst.msk [vmem:[%s3172_s23 + $0x154] sm:$0xf] %vm2123_vm1, %v2664_v2  ;;  %v2871_v12 = vpop.f32.mrb[26].mxu1  ;;  %v1382_v15 = vmul.f32 0.2, %v2807_v11  ;;  %v943_v17 = vpop.f32.mrb[27].mxu0  ;;  %v1507_v19 = vmax.f32 %v940_v7, %v1379_v9  ;;  %v2605_v23 = vpack.c.bf16 %v1509_v13, %v1509_v13 }
 0x11c   : > { %v1446_v16 = vmul.f32 0.2, %v2871_v12  ;;  %v1199_v18 = vpop.f32.mrb[27].mxu1  ;;  %v1571_v20 = vmax.f32 %v1196_v8, %v1443_v10  ;;  %v1380_v21 = vmul.f32 0.2, %v943_v17  ;;  %v2669_v24 = vpack.c.bf16 %v1573_v14, %v1573_v14 }
 0x11d   : > { %v1444_v22 = vmul.f32 0.2, %v1199_v18  ;;  %v1510_v25 = vmax.f32 %v2807_v11, %v1382_v15  ;;  %v2603_v27 = vpack.c.bf16 %v1507_v19, %v1507_v19  ;;  %2150 = vst.msk [vmem:[%s3172_s23 + $0x68] sm:$0xf] %vm2123_vm1, %v2605_v23  ;;  %v2810_v35 = vpop.f32.mrb[28].mxu0 }
 0x11e   : > { %v1574_v26 = vmax.f32 %v2871_v12, %v1446_v16  ;;  %v2667_v28 = vpack.c.bf16 %v1571_v20, %v1571_v20  ;;  %v1508_v29 = vmax.f32 %v943_v17, %v1380_v21  ;;  %2214 = vst.msk [vmem:[%s3172_s23 + $0x168] sm:$0xf] %vm2123_vm1, %v2669_v24  ;;  %v2874_v36 = vpop.f32.mrb[28].mxu1  ;;  %v1385_v37 = vmul.f32 0.2, %v2810_v35  ;;  %v956_v39 = vpop.f32.mrb[29].mxu0 }
 0x11f   : > { %v1572_v30 = vmax.f32 %v1199_v18, %v1444_v22  ;;  %v2606_v31 = vpack.c.bf16 %v1510_v25, %v1510_v25  ;;  %2148 = vst.msk [vmem:[%s3172_s23 + $0x60] sm:$0xf] %vm2123_vm1, %v2603_v27  ;;  %v1449_v38 = vmul.f32 0.2, %v2874_v36  ;;  %v1212_v40 = vpop.f32.mrb[29].mxu1  ;;  %v2811_v43 = vpop.f32.mrb[30].mxu0 }
 0x120   : > { %v2670_v32 = vpack.c.bf16 %v1574_v26, %v1574_v26  ;;  %2212 = vst.msk [vmem:[%s3172_s23 + $0x160] sm:$0xf] %vm2123_vm1, %v2667_v28  ;;  %v2604_v33 = vpack.c.bf16 %v1508_v29, %v1508_v29  ;;  %v1383_v41 = vmul.f32 0.2, %v956_v39  ;;  %v1447_v42 = vmul.f32 0.2, %v1212_v40 }
 0x121   : > { %v2668_v34 = vpack.c.bf16 %v1572_v30, %v1572_v30  ;;  %2151 = vst.msk [vmem:[%s3172_s23 + $0x6c] sm:$0xf] %vm2123_vm1, %v2606_v31  ;;  %v2875_v44 = vpop.f32.mrb[30].mxu1  ;;  %v1513_v45 = vmax.f32 %v2810_v35, %v1385_v37  ;;  %v1577_v46 = vmax.f32 %v2874_v36, %v1449_v38  ;;  %v1386_v47 = vmul.f32 0.2, %v2811_v43  ;;  %v959_v49 = vpop.f32.mrb[31].mxu0 }
 0x122   : > { %2215 = vst.msk [vmem:[%s3172_s23 + $0x16c] sm:$0xf] %vm2123_vm1, %v2670_v32  ;;  %2149 = vst.msk [vmem:[%s3172_s23 + $0x64] sm:$0xf] %vm2123_vm1, %v2604_v33  ;;  %v1450_v48 = vmul.f32 0.2, %v2875_v44  ;;  %v1511_v51 = vmax.f32 %v956_v39, %v1383_v41  ;;  %v1575_v52 = vmax.f32 %v1212_v40, %v1447_v42 }
 0x123   : > { %2213 = vst.msk [vmem:[%s3172_s23 + $0x164] sm:$0xf] %vm2123_vm1, %v2668_v34  ;;  %v1215_v50 = vpop.f32.mrb[31].mxu1  ;;  %v1384_v53 = vmul.f32 0.2, %v959_v49  ;;  %v2609_v55 = vpack.c.bf16 %v1513_v45, %v1513_v45  ;;  %v2673_v56 = vpack.c.bf16 %v1577_v46, %v1577_v46  ;;  %v1514_v57 = vmax.f32 %v2811_v43, %v1386_v47 }
 0x124   : > { %v1448_v54 = vmul.f32 0.2, %v1215_v50  ;;  %v1578_v58 = vmax.f32 %v2875_v44, %v1450_v48  ;;  %v2607_v59 = vpack.c.bf16 %v1511_v51, %v1511_v51  ;;  %v2671_v60 = vpack.c.bf16 %v1575_v52, %v1575_v52 }
 0x125   : > { %v1512_v61 = vmax.f32 %v959_v49, %v1384_v53  ;;  %2154 = vst.msk [vmem:[%s3172_s23 + $0x78] sm:$0xf] %vm2123_vm1, %v2609_v55  ;;  %2218 = vst.msk [vmem:[%s3172_s23 + $0x178] sm:$0xf] %vm2123_vm1, %v2673_v56  ;;  %v2610_v63 = vpack.c.bf16 %v1514_v57, %v1514_v57  ;;  %v2814_v3 = vpop.f32.mrb[32].mxu0 }
 0x126   : > { %v1576_v62 = vmax.f32 %v1215_v50, %v1448_v54  ;;  %v2674_v0 = vpack.c.bf16 %v1578_v58, %v1578_v58  ;;  %2152 = vst.msk [vmem:[%s3172_s23 + $0x70] sm:$0xf] %vm2123_vm1, %v2607_v59  ;;  %2216 = vst.msk [vmem:[%s3172_s23 + $0x170] sm:$0xf] %vm2123_vm1, %v2671_v60  ;;  %v2878_v4 = vpop.f32.mrb[32].mxu1  ;;  %v972_v7 = vpop.f32.mrb[33].mxu0 }
 0x127   : > { %v2608_v1 = vpack.c.bf16 %v1512_v61, %v1512_v61  ;;  %2155 = vst.msk [vmem:[%s3172_s23 + $0x7c] sm:$0xf] %vm2123_vm1, %v2610_v63  ;;  %v1389_v5 = vmul.f32 0.2, %v2814_v3  ;;  %v1453_v6 = vmul.f32 0.2, %v2878_v4 }
 0x128   : > { %v2672_v2 = vpack.c.bf16 %v1576_v62, %v1576_v62  ;;  %2219 = vst.msk [vmem:[%s3172_s23 + $0x17c] sm:$0xf] %vm2123_vm1, %v2674_v0  ;;  %v1228_v8 = vpop.f32.mrb[33].mxu1  ;;  %v1387_v9 = vmul.f32 0.2, %v972_v7  ;;  %v2815_v11 = vpop.f32.mrb[34].mxu0 }
 0x129   : > { %2153 = vst.msk [vmem:[%s3172_s23 + $0x74] sm:$0xf] %vm2123_vm1, %v2608_v1  ;;  %v1451_v10 = vmul.f32 0.2, %v1228_v8  ;;  %v2879_v12 = vpop.f32.mrb[34].mxu1  ;;  %v1517_v13 = vmax.f32 %v2814_v3, %v1389_v5  ;;  %v1581_v14 = vmax.f32 %v2878_v4, %v1453_v6  ;;  %v975_v17 = vpop.f32.mrb[35].mxu0 }
 0x12a   : > { %2217 = vst.msk [vmem:[%s3172_s23 + $0x174] sm:$0xf] %vm2123_vm1, %v2672_v2  ;;  %v1390_v15 = vmul.f32 0.2, %v2815_v11  ;;  %v1454_v16 = vmul.f32 0.2, %v2879_v12  ;;  %v1515_v19 = vmax.f32 %v972_v7, %v1387_v9 }
 0x12b   : > { %v1231_v18 = vpop.f32.mrb[35].mxu1  ;;  %v1579_v20 = vmax.f32 %v1228_v8, %v1451_v10  ;;  %v1388_v21 = vmul.f32 0.2, %v975_v17  ;;  %v2613_v23 = vpack.c.bf16 %v1517_v13, %v1517_v13  ;;  %v2677_v24 = vpack.c.bf16 %v1581_v14, %v1581_v14 }
 0x12c   : > { %v1452_v22 = vmul.f32 0.2, %v1231_v18  ;;  %v1518_v25 = vmax.f32 %v2815_v11, %v1390_v15  ;;  %v1582_v26 = vmax.f32 %v2879_v12, %v1454_v16  ;;  %v2611_v27 = vpack.c.bf16 %v1515_v19, %v1515_v19 }
 0x12d   : > { %v2675_v28 = vpack.c.bf16 %v1579_v20, %v1579_v20  ;;  %v1516_v29 = vmax.f32 %v975_v17, %v1388_v21  ;;  %2158 = vst.msk [vmem:[%s3172_s23 + $0x88] sm:$0xf] %vm2123_vm1, %v2613_v23  ;;  %2222 = vst.msk [vmem:[%s3172_s23 + $0x188] sm:$0xf] %vm2123_vm1, %v2677_v24  ;;  %v2818_v35 = vpop.f32.mrb[36].mxu0 }
 0x12e   : > { %v1580_v30 = vmax.f32 %v1231_v18, %v1452_v22  ;;  %v2614_v31 = vpack.c.bf16 %v1518_v25, %v1518_v25  ;;  %v2678_v32 = vpack.c.bf16 %v1582_v26, %v1582_v26  ;;  %2156 = vst.msk [vmem:[%s3172_s23 + $0x80] sm:$0xf] %vm2123_vm1, %v2611_v27  ;;  %v2882_v36 = vpop.f32.mrb[36].mxu1  ;;  %v1393_v37 = vmul.f32 0.2, %v2818_v35  ;;  %v988_v39 = vpop.f32.mrb[37].mxu0 }
 0x12f   : > { %2220 = vst.msk [vmem:[%s3172_s23 + $0x180] sm:$0xf] %vm2123_vm1, %v2675_v28  ;;  %v2612_v33 = vpack.c.bf16 %v1516_v29, %v1516_v29  ;;  %v1457_v38 = vmul.f32 0.2, %v2882_v36  ;;  %v1244_v40 = vpop.f32.mrb[37].mxu1  ;;  %v2819_v43 = vpop.f32.mrb[38].mxu0 }
 0x130   : > { %v2676_v34 = vpack.c.bf16 %v1580_v30, %v1580_v30  ;;  %2159 = vst.msk [vmem:[%s3172_s23 + $0x8c] sm:$0xf] %vm2123_vm1, %v2614_v31  ;;  %2223 = vst.msk [vmem:[%s3172_s23 + $0x18c] sm:$0xf] %vm2123_vm1, %v2678_v32  ;;  %v1391_v41 = vmul.f32 0.2, %v988_v39  ;;  %v1521_v45 = vmax.f32 %v2818_v35, %v1393_v37 }
 0x131   : > { %2157 = vst.msk [vmem:[%s3172_s23 + $0x84] sm:$0xf] %vm2123_vm1, %v2612_v33  ;;  %v1455_v42 = vmul.f32 0.2, %v1244_v40  ;;  %v2883_v44 = vpop.f32.mrb[38].mxu1  ;;  %v1585_v46 = vmax.f32 %v2882_v36, %v1457_v38  ;;  %v991_v49 = vpop.f32.mrb[39].mxu0 }
 0x132   : > { %2221 = vst.msk [vmem:[%s3172_s23 + $0x184] sm:$0xf] %vm2123_vm1, %v2676_v34  ;;  %v1394_v47 = vmul.f32 0.2, %v2819_v43  ;;  %v1458_v48 = vmul.f32 0.2, %v2883_v44  ;;  %v1519_v51 = vmax.f32 %v988_v39, %v1391_v41  ;;  %v2617_v55 = vpack.c.bf16 %v1521_v45, %v1521_v45 }
 0x133   : > { %v1247_v50 = vpop.f32.mrb[39].mxu1  ;;  %v1583_v52 = vmax.f32 %v1244_v40, %v1455_v42  ;;  %v1392_v53 = vmul.f32 0.2, %v991_v49  ;;  %v2681_v56 = vpack.c.bf16 %v1585_v46, %v1585_v46 }
 0x134   : > { %v1456_v54 = vmul.f32 0.2, %v1247_v50  ;;  %v1522_v57 = vmax.f32 %v2819_v43, %v1394_v47  ;;  %v1586_v58 = vmax.f32 %v2883_v44, %v1458_v48  ;;  %v2615_v59 = vpack.c.bf16 %v1519_v51, %v1519_v51  ;;  %2162 = vst.msk [vmem:[%s3172_s23 + $0x98] sm:$0xf] %vm2123_vm1, %v2617_v55 }
 0x135   : > { %v2679_v60 = vpack.c.bf16 %v1583_v52, %v1583_v52  ;;  %v1520_v61 = vmax.f32 %v991_v49, %v1392_v53  ;;  %2226 = vst.msk [vmem:[%s3172_s23 + $0x198] sm:$0xf] %vm2123_vm1, %v2681_v56  ;;  %v2822_v3 = vpop.f32.mrb[40].mxu0 }
 0x136   : > { %v1584_v62 = vmax.f32 %v1247_v50, %v1456_v54  ;;  %v2618_v63 = vpack.c.bf16 %v1522_v57, %v1522_v57  ;;  %v2682_v0 = vpack.c.bf16 %v1586_v58, %v1586_v58  ;;  %2160 = vst.msk [vmem:[%s3172_s23 + $0x90] sm:$0xf] %vm2123_vm1, %v2615_v59  ;;  %v2886_v4 = vpop.f32.mrb[40].mxu1  ;;  %v1397_v5 = vmul.f32 0.2, %v2822_v3  ;;  %v1004_v7 = vpop.f32.mrb[41].mxu0 }
 0x137   : > { %2224 = vst.msk [vmem:[%s3172_s23 + $0x190] sm:$0xf] %vm2123_vm1, %v2679_v60  ;;  %v2616_v1 = vpack.c.bf16 %v1520_v61, %v1520_v61  ;;  %v1461_v6 = vmul.f32 0.2, %v2886_v4  ;;  %v1260_v8 = vpop.f32.mrb[41].mxu1  ;;  %v2823_v11 = vpop.f32.mrb[42].mxu0 }
 0x138   : > { %v2680_v2 = vpack.c.bf16 %v1584_v62, %v1584_v62  ;;  %2163 = vst.msk [vmem:[%s3172_s23 + $0x9c] sm:$0xf] %vm2123_vm1, %v2618_v63  ;;  %2227 = vst.msk [vmem:[%s3172_s23 + $0x19c] sm:$0xf] %vm2123_vm1, %v2682_v0  ;;  %v1395_v9 = vmul.f32 0.2, %v1004_v7  ;;  %v1525_v13 = vmax.f32 %v2822_v3, %v1397_v5 }
 0x139   : > { %2161 = vst.msk [vmem:[%s3172_s23 + $0x94] sm:$0xf] %vm2123_vm1, %v2616_v1  ;;  %v1459_v10 = vmul.f32 0.2, %v1260_v8  ;;  %v2887_v12 = vpop.f32.mrb[42].mxu1  ;;  %v1589_v14 = vmax.f32 %v2886_v4, %v1461_v6  ;;  %v1007_v17 = vpop.f32.mrb[43].mxu0 }
 0x13a   : > { %2225 = vst.msk [vmem:[%s3172_s23 + $0x194] sm:$0xf] %vm2123_vm1, %v2680_v2  ;;  %v1398_v15 = vmul.f32 0.2, %v2823_v11  ;;  %v1462_v16 = vmul.f32 0.2, %v2887_v12  ;;  %v1523_v19 = vmax.f32 %v1004_v7, %v1395_v9  ;;  %v2621_v23 = vpack.c.bf16 %v1525_v13, %v1525_v13 }
 0x13b   : > { %v1263_v18 = vpop.f32.mrb[43].mxu1  ;;  %v1587_v20 = vmax.f32 %v1260_v8, %v1459_v10  ;;  %v1396_v21 = vmul.f32 0.2, %v1007_v17  ;;  %v2685_v24 = vpack.c.bf16 %v1589_v14, %v1589_v14 }
 0x13c   : > { %v1460_v22 = vmul.f32 0.2, %v1263_v18  ;;  %v1526_v25 = vmax.f32 %v2823_v11, %v1398_v15  ;;  %v1590_v26 = vmax.f32 %v2887_v12, %v1462_v16  ;;  %v2619_v27 = vpack.c.bf16 %v1523_v19, %v1523_v19  ;;  %2166 = vst.msk [vmem:[%s3172_s23 + $0xa8] sm:$0xf] %vm2123_vm1, %v2621_v23 }
 0x13d   : > { %v2683_v28 = vpack.c.bf16 %v1587_v20, %v1587_v20  ;;  %v1524_v29 = vmax.f32 %v1007_v17, %v1396_v21  ;;  %2230 = vst.msk [vmem:[%s3172_s23 + $0x1a8] sm:$0xf] %vm2123_vm1, %v2685_v24  ;;  %v2826_v35 = vpop.f32.mrb[44].mxu0 }
 0x13e   : > { %v1588_v30 = vmax.f32 %v1263_v18, %v1460_v22  ;;  %v2622_v31 = vpack.c.bf16 %v1526_v25, %v1526_v25  ;;  %v2686_v32 = vpack.c.bf16 %v1590_v26, %v1590_v26  ;;  %2164 = vst.msk [vmem:[%s3172_s23 + $0xa0] sm:$0xf] %vm2123_vm1, %v2619_v27  ;;  %v2890_v36 = vpop.f32.mrb[44].mxu1  ;;  %v1401_v37 = vmul.f32 0.2, %v2826_v35  ;;  %v1020_v39 = vpop.f32.mrb[45].mxu0 }
 0x13f   : > { %2228 = vst.msk [vmem:[%s3172_s23 + $0x1a0] sm:$0xf] %vm2123_vm1, %v2683_v28  ;;  %v2620_v33 = vpack.c.bf16 %v1524_v29, %v1524_v29  ;;  %v1465_v38 = vmul.f32 0.2, %v2890_v36  ;;  %v1276_v40 = vpop.f32.mrb[45].mxu1  ;;  %v2827_v43 = vpop.f32.mrb[46].mxu0 }
 0x140   : > { %v2684_v34 = vpack.c.bf16 %v1588_v30, %v1588_v30  ;;  %2167 = vst.msk [vmem:[%s3172_s23 + $0xac] sm:$0xf] %vm2123_vm1, %v2622_v31  ;;  %2231 = vst.msk [vmem:[%s3172_s23 + $0x1ac] sm:$0xf] %vm2123_vm1, %v2686_v32  ;;  %v1399_v41 = vmul.f32 0.2, %v1020_v39  ;;  %v1529_v45 = vmax.f32 %v2826_v35, %v1401_v37 }
 0x141   : > { %2165 = vst.msk [vmem:[%s3172_s23 + $0xa4] sm:$0xf] %vm2123_vm1, %v2620_v33  ;;  %v1463_v42 = vmul.f32 0.2, %v1276_v40  ;;  %v2891_v44 = vpop.f32.mrb[46].mxu1  ;;  %v1593_v46 = vmax.f32 %v2890_v36, %v1465_v38  ;;  %v1023_v49 = vpop.f32.mrb[47].mxu0 }
 0x142   : > { %2229 = vst.msk [vmem:[%s3172_s23 + $0x1a4] sm:$0xf] %vm2123_vm1, %v2684_v34  ;;  %v1402_v47 = vmul.f32 0.2, %v2827_v43  ;;  %v1466_v48 = vmul.f32 0.2, %v2891_v44  ;;  %v1527_v51 = vmax.f32 %v1020_v39, %v1399_v41  ;;  %v2625_v55 = vpack.c.bf16 %v1529_v45, %v1529_v45 }
 0x143   : > { %v1279_v50 = vpop.f32.mrb[47].mxu1  ;;  %v1591_v52 = vmax.f32 %v1276_v40, %v1463_v42  ;;  %v1400_v53 = vmul.f32 0.2, %v1023_v49  ;;  %v2689_v56 = vpack.c.bf16 %v1593_v46, %v1593_v46 }
 0x144   : > { %v1464_v54 = vmul.f32 0.2, %v1279_v50  ;;  %v1530_v57 = vmax.f32 %v2827_v43, %v1402_v47  ;;  %v1594_v58 = vmax.f32 %v2891_v44, %v1466_v48  ;;  %v2623_v59 = vpack.c.bf16 %v1527_v51, %v1527_v51  ;;  %2170 = vst.msk [vmem:[%s3172_s23 + $0xb8] sm:$0xf] %vm2123_vm1, %v2625_v55 }
 0x145   : > { %v2687_v60 = vpack.c.bf16 %v1591_v52, %v1591_v52  ;;  %v1528_v61 = vmax.f32 %v1023_v49, %v1400_v53  ;;  %2234 = vst.msk [vmem:[%s3172_s23 + $0x1b8] sm:$0xf] %vm2123_vm1, %v2689_v56  ;;  %v2830_v3 = vpop.f32.mrb[48].mxu0 }
 0x146   : > { %v1592_v62 = vmax.f32 %v1279_v50, %v1464_v54  ;;  %v2626_v63 = vpack.c.bf16 %v1530_v57, %v1530_v57  ;;  %v2690_v0 = vpack.c.bf16 %v1594_v58, %v1594_v58  ;;  %2168 = vst.msk [vmem:[%s3172_s23 + $0xb0] sm:$0xf] %vm2123_vm1, %v2623_v59  ;;  %v2894_v4 = vpop.f32.mrb[48].mxu1  ;;  %v1405_v5 = vmul.f32 0.2, %v2830_v3  ;;  %v1036_v7 = vpop.f32.mrb[49].mxu0 }
 0x147   : > { %2232 = vst.msk [vmem:[%s3172_s23 + $0x1b0] sm:$0xf] %vm2123_vm1, %v2687_v60  ;;  %v2624_v1 = vpack.c.bf16 %v1528_v61, %v1528_v61  ;;  %v1469_v6 = vmul.f32 0.2, %v2894_v4  ;;  %v1292_v8 = vpop.f32.mrb[49].mxu1  ;;  %v2831_v11 = vpop.f32.mrb[50].mxu0 }
 0x148   : > { %v2688_v2 = vpack.c.bf16 %v1592_v62, %v1592_v62  ;;  %2171 = vst.msk [vmem:[%s3172_s23 + $0xbc] sm:$0xf] %vm2123_vm1, %v2626_v63  ;;  %2235 = vst.msk [vmem:[%s3172_s23 + $0x1bc] sm:$0xf] %vm2123_vm1, %v2690_v0  ;;  %v1403_v9 = vmul.f32 0.2, %v1036_v7  ;;  %v1533_v13 = vmax.f32 %v2830_v3, %v1405_v5 }
 0x149   : > { %2169 = vst.msk [vmem:[%s3172_s23 + $0xb4] sm:$0xf] %vm2123_vm1, %v2624_v1  ;;  %v1467_v10 = vmul.f32 0.2, %v1292_v8  ;;  %v2895_v12 = vpop.f32.mrb[50].mxu1  ;;  %v1597_v14 = vmax.f32 %v2894_v4, %v1469_v6  ;;  %v1039_v17 = vpop.f32.mrb[51].mxu0 }
 0x14a   : > { %2233 = vst.msk [vmem:[%s3172_s23 + $0x1b4] sm:$0xf] %vm2123_vm1, %v2688_v2  ;;  %v1406_v15 = vmul.f32 0.2, %v2831_v11  ;;  %v1470_v16 = vmul.f32 0.2, %v2895_v12  ;;  %v1531_v19 = vmax.f32 %v1036_v7, %v1403_v9  ;;  %v2629_v23 = vpack.c.bf16 %v1533_v13, %v1533_v13 }
 0x14b   : > { %v1295_v18 = vpop.f32.mrb[51].mxu1  ;;  %v1595_v20 = vmax.f32 %v1292_v8, %v1467_v10  ;;  %v1404_v21 = vmul.f32 0.2, %v1039_v17  ;;  %v2693_v24 = vpack.c.bf16 %v1597_v14, %v1597_v14 }
 0x14c   : > { %v1468_v22 = vmul.f32 0.2, %v1295_v18  ;;  %v1534_v25 = vmax.f32 %v2831_v11, %v1406_v15  ;;  %v1598_v26 = vmax.f32 %v2895_v12, %v1470_v16  ;;  %v2627_v27 = vpack.c.bf16 %v1531_v19, %v1531_v19  ;;  %2174 = vst.msk [vmem:[%s3172_s23 + $0xc8] sm:$0xf] %vm2123_vm1, %v2629_v23 }
 0x14d   : > { %v2691_v28 = vpack.c.bf16 %v1595_v20, %v1595_v20  ;;  %v1532_v29 = vmax.f32 %v1039_v17, %v1404_v21  ;;  %2238 = vst.msk [vmem:[%s3172_s23 + $0x1c8] sm:$0xf] %vm2123_vm1, %v2693_v24  ;;  %v2834_v35 = vpop.f32.mrb[52].mxu0 }
 0x14e   : > { %v1596_v30 = vmax.f32 %v1295_v18, %v1468_v22  ;;  %v2630_v31 = vpack.c.bf16 %v1534_v25, %v1534_v25  ;;  %v2694_v32 = vpack.c.bf16 %v1598_v26, %v1598_v26  ;;  %2172 = vst.msk [vmem:[%s3172_s23 + $0xc0] sm:$0xf] %vm2123_vm1, %v2627_v27  ;;  %v2898_v36 = vpop.f32.mrb[52].mxu1  ;;  %v1409_v37 = vmul.f32 0.2, %v2834_v35  ;;  %v1052_v39 = vpop.f32.mrb[53].mxu0 }
 0x14f   : > { %2236 = vst.msk [vmem:[%s3172_s23 + $0x1c0] sm:$0xf] %vm2123_vm1, %v2691_v28  ;;  %v2628_v33 = vpack.c.bf16 %v1532_v29, %v1532_v29  ;;  %v1473_v38 = vmul.f32 0.2, %v2898_v36  ;;  %v1308_v40 = vpop.f32.mrb[53].mxu1  ;;  %v2835_v43 = vpop.f32.mrb[54].mxu0 }
 0x150   : > { %v2692_v34 = vpack.c.bf16 %v1596_v30, %v1596_v30  ;;  %2175 = vst.msk [vmem:[%s3172_s23 + $0xcc] sm:$0xf] %vm2123_vm1, %v2630_v31  ;;  %2239 = vst.msk [vmem:[%s3172_s23 + $0x1cc] sm:$0xf] %vm2123_vm1, %v2694_v32  ;;  %v1407_v41 = vmul.f32 0.2, %v1052_v39  ;;  %v1537_v45 = vmax.f32 %v2834_v35, %v1409_v37 }
 0x151   : > { %2173 = vst.msk [vmem:[%s3172_s23 + $0xc4] sm:$0xf] %vm2123_vm1, %v2628_v33  ;;  %v1471_v42 = vmul.f32 0.2, %v1308_v40  ;;  %v2899_v44 = vpop.f32.mrb[54].mxu1  ;;  %v1601_v46 = vmax.f32 %v2898_v36, %v1473_v38  ;;  %v1055_v49 = vpop.f32.mrb[55].mxu0 }
 0x152   : > { %2237 = vst.msk [vmem:[%s3172_s23 + $0x1c4] sm:$0xf] %vm2123_vm1, %v2692_v34  ;;  %v1410_v47 = vmul.f32 0.2, %v2835_v43  ;;  %v1474_v48 = vmul.f32 0.2, %v2899_v44  ;;  %v1535_v51 = vmax.f32 %v1052_v39, %v1407_v41  ;;  %v2633_v55 = vpack.c.bf16 %v1537_v45, %v1537_v45 }
 0x153   : > { %v1311_v50 = vpop.f32.mrb[55].mxu1  ;;  %v1599_v52 = vmax.f32 %v1308_v40, %v1471_v42  ;;  %v1408_v53 = vmul.f32 0.2, %v1055_v49  ;;  %v2697_v56 = vpack.c.bf16 %v1601_v46, %v1601_v46 }
 0x154   : > { %v1472_v54 = vmul.f32 0.2, %v1311_v50  ;;  %v1538_v57 = vmax.f32 %v2835_v43, %v1410_v47  ;;  %v1602_v58 = vmax.f32 %v2899_v44, %v1474_v48  ;;  %v2631_v59 = vpack.c.bf16 %v1535_v51, %v1535_v51  ;;  %2178 = vst.msk [vmem:[%s3172_s23 + $0xd8] sm:$0xf] %vm2123_vm1, %v2633_v55 }
 0x155   : > { %v2695_v60 = vpack.c.bf16 %v1599_v52, %v1599_v52  ;;  %v1536_v61 = vmax.f32 %v1055_v49, %v1408_v53  ;;  %2242 = vst.msk [vmem:[%s3172_s23 + $0x1d8] sm:$0xf] %vm2123_vm1, %v2697_v56  ;;  %v2838_v3 = vpop.f32.mrb[56].mxu0 }
 0x156   : > { %v1600_v62 = vmax.f32 %v1311_v50, %v1472_v54  ;;  %v2634_v63 = vpack.c.bf16 %v1538_v57, %v1538_v57  ;;  %v2698_v0 = vpack.c.bf16 %v1602_v58, %v1602_v58  ;;  %2176 = vst.msk [vmem:[%s3172_s23 + $0xd0] sm:$0xf] %vm2123_vm1, %v2631_v59  ;;  %v2902_v4 = vpop.f32.mrb[56].mxu1  ;;  %v1413_v5 = vmul.f32 0.2, %v2838_v3  ;;  %v1068_v7 = vpop.f32.mrb[57].mxu0 }
 0x157   : > { %2240 = vst.msk [vmem:[%s3172_s23 + $0x1d0] sm:$0xf] %vm2123_vm1, %v2695_v60  ;;  %v2632_v1 = vpack.c.bf16 %v1536_v61, %v1536_v61  ;;  %v1477_v6 = vmul.f32 0.2, %v2902_v4  ;;  %v1324_v8 = vpop.f32.mrb[57].mxu1  ;;  %v2839_v11 = vpop.f32.mrb[58].mxu0 }
 0x158   : > { %v2696_v2 = vpack.c.bf16 %v1600_v62, %v1600_v62  ;;  %2179 = vst.msk [vmem:[%s3172_s23 + $0xdc] sm:$0xf] %vm2123_vm1, %v2634_v63  ;;  %2243 = vst.msk [vmem:[%s3172_s23 + $0x1dc] sm:$0xf] %vm2123_vm1, %v2698_v0  ;;  %v1411_v9 = vmul.f32 0.2, %v1068_v7  ;;  %v1541_v13 = vmax.f32 %v2838_v3, %v1413_v5 }
 0x159   : > { %2177 = vst.msk [vmem:[%s3172_s23 + $0xd4] sm:$0xf] %vm2123_vm1, %v2632_v1  ;;  %v1475_v10 = vmul.f32 0.2, %v1324_v8  ;;  %v2903_v12 = vpop.f32.mrb[58].mxu1  ;;  %v1605_v14 = vmax.f32 %v2902_v4, %v1477_v6  ;;  %v1071_v17 = vpop.f32.mrb[59].mxu0 }
 0x15a   : > { %2241 = vst.msk [vmem:[%s3172_s23 + $0x1d4] sm:$0xf] %vm2123_vm1, %v2696_v2  ;;  %v1414_v15 = vmul.f32 0.2, %v2839_v11  ;;  %v1478_v16 = vmul.f32 0.2, %v2903_v12  ;;  %v1539_v19 = vmax.f32 %v1068_v7, %v1411_v9  ;;  %v2637_v23 = vpack.c.bf16 %v1541_v13, %v1541_v13 }
 0x15b   : > { %v1327_v18 = vpop.f32.mrb[59].mxu1  ;;  %v1603_v20 = vmax.f32 %v1324_v8, %v1475_v10  ;;  %v1412_v21 = vmul.f32 0.2, %v1071_v17  ;;  %v2701_v24 = vpack.c.bf16 %v1605_v14, %v1605_v14 }
 0x15c   : > { %v1476_v22 = vmul.f32 0.2, %v1327_v18  ;;  %v1542_v25 = vmax.f32 %v2839_v11, %v1414_v15  ;;  %v1606_v26 = vmax.f32 %v2903_v12, %v1478_v16  ;;  %v2635_v27 = vpack.c.bf16 %v1539_v19, %v1539_v19  ;;  %2182 = vst.msk [vmem:[%s3172_s23 + $0xe8] sm:$0xf] %vm2123_vm1, %v2637_v23 }
 0x15d   : > { %v2699_v28 = vpack.c.bf16 %v1603_v20, %v1603_v20  ;;  %v1540_v29 = vmax.f32 %v1071_v17, %v1412_v21  ;;  %2246 = vst.msk [vmem:[%s3172_s23 + $0x1e8] sm:$0xf] %vm2123_vm1, %v2701_v24  ;;  %v2842_v35 = vpop.f32.mrb[60].mxu0 }
 0x15e   : > { %v1604_v30 = vmax.f32 %v1327_v18, %v1476_v22  ;;  %v2638_v31 = vpack.c.bf16 %v1542_v25, %v1542_v25  ;;  %v2702_v32 = vpack.c.bf16 %v1606_v26, %v1606_v26  ;;  %2180 = vst.msk [vmem:[%s3172_s23 + $0xe0] sm:$0xf] %vm2123_vm1, %v2635_v27  ;;  %v2906_v36 = vpop.f32.mrb[60].mxu1  ;;  %v1417_v37 = vmul.f32 0.2, %v2842_v35  ;;  %v1084_v39 = vpop.f32.mrb[61].mxu0 }
 0x15f   : > { %2244 = vst.msk [vmem:[%s3172_s23 + $0x1e0] sm:$0xf] %vm2123_vm1, %v2699_v28  ;;  %v2636_v33 = vpack.c.bf16 %v1540_v29, %v1540_v29  ;;  %v1481_v38 = vmul.f32 0.2, %v2906_v36  ;;  %v1340_v40 = vpop.f32.mrb[61].mxu1  ;;  %v2843_v43 = vpop.f32.mrb[62].mxu0 }
 0x160   : > { %v2700_v34 = vpack.c.bf16 %v1604_v30, %v1604_v30  ;;  %2183 = vst.msk [vmem:[%s3172_s23 + $0xec] sm:$0xf] %vm2123_vm1, %v2638_v31  ;;  %2247 = vst.msk [vmem:[%s3172_s23 + $0x1ec] sm:$0xf] %vm2123_vm1, %v2702_v32  ;;  %v1415_v41 = vmul.f32 0.2, %v1084_v39  ;;  %v1545_v45 = vmax.f32 %v2842_v35, %v1417_v37 }
 0x161   : > { %2181 = vst.msk [vmem:[%s3172_s23 + $0xe4] sm:$0xf] %vm2123_vm1, %v2636_v33  ;;  %v1479_v42 = vmul.f32 0.2, %v1340_v40  ;;  %v2907_v44 = vpop.f32.mrb[62].mxu1  ;;  %v1609_v46 = vmax.f32 %v2906_v36, %v1481_v38  ;;  %v1087_v49 = vpop.f32.mrb[63].mxu0 }
 0x162   : > { %2245 = vst.msk [vmem:[%s3172_s23 + $0x1e4] sm:$0xf] %vm2123_vm1, %v2700_v34  ;;  %v1418_v47 = vmul.f32 0.2, %v2843_v43  ;;  %v1482_v48 = vmul.f32 0.2, %v2907_v44  ;;  %v1543_v51 = vmax.f32 %v1084_v39, %v1415_v41  ;;  %v2641_v55 = vpack.c.bf16 %v1545_v45, %v1545_v45 }
 0x163   : > { %v1343_v50 = vpop.f32.mrb[63].mxu1  ;;  %v1607_v52 = vmax.f32 %v1340_v40, %v1479_v42  ;;  %v1416_v53 = vmul.f32 0.2, %v1087_v49  ;;  %v2705_v56 = vpack.c.bf16 %v1609_v46, %v1609_v46 }
 0x164   : > { %v1480_v54 = vmul.f32 0.2, %v1343_v50  ;;  %v1546_v57 = vmax.f32 %v2843_v43, %v1418_v47  ;;  %v1610_v58 = vmax.f32 %v2907_v44, %v1482_v48  ;;  %v2639_v59 = vpack.c.bf16 %v1543_v51, %v1543_v51  ;;  %2186 = vst.msk [vmem:[%s3172_s23 + $0xf8] sm:$0xf] %vm2123_vm1, %v2641_v55 }
 0x165   : > { %v2703_v60 = vpack.c.bf16 %v1607_v52, %v1607_v52  ;;  %v1544_v61 = vmax.f32 %v1087_v49, %v1416_v53  ;;  %2250 = vst.msk [vmem:[%s3172_s23 + $0x1f8] sm:$0xf] %vm2123_vm1, %v2705_v56 }
 0x166   : > { %v1608_v62 = vmax.f32 %v1343_v50, %v1480_v54  ;;  %v2642_v63 = vpack.c.bf16 %v1546_v57, %v1546_v57  ;;  %v2706_v0 = vpack.c.bf16 %v1610_v58, %v1610_v58  ;;  %2184 = vst.msk [vmem:[%s3172_s23 + $0xf0] sm:$0xf] %vm2123_vm1, %v2639_v59 }
 0x167   : > { %2248 = vst.msk [vmem:[%s3172_s23 + $0x1f0] sm:$0xf] %vm2123_vm1, %v2703_v60  ;;  %v2640_v1 = vpack.c.bf16 %v1544_v61, %v1544_v61 }
 0x168   : > { %v2704_v2 = vpack.c.bf16 %v1608_v62, %v1608_v62  ;;  %2187 = vst.msk [vmem:[%s3172_s23 + $0xfc] sm:$0xf] %vm2123_vm1, %v2642_v63  ;;  %2251 = vst.msk [vmem:[%s3172_s23 + $0x1fc] sm:$0xf] %vm2123_vm1, %v2706_v0 }
 0x169   : > { %2185 = vst.msk [vmem:[%s3172_s23 + $0xf4] sm:$0xf] %vm2123_vm1, %v2640_v1 }
 0x16a   : > { %2249 = vst.msk [vmem:[%s3172_s23 + $0x1f4] sm:$0xf] %vm2123_vm1, %v2704_v2 }
 0x16b PF: > { %s12_s9 = sadd.s32 1, %s2995_s9  }
 0x16c   : > { %p9_p4 = scmp.ge.s32.totalorder %s12_s9, 4  }
 0x16e   :  { %11 = sbr.rel (!%p9_p4) target bundleno = 1 (0x1), region = 58 }

// kernel: netlocalD_forward.5
= control target key start
LH: loop header
LB: loop body
LE: loop exit
PB: predicated region body
PF: predicated region fallthrough
CT: control target
= control target key end

     0   :  { %vm627_vm0 = vcmask 130048   ;;  %vm1552_vm1 = vcmask 125952   ;;  %s3975_s1 = inlined_call_operand.vmem [shape: bf16[128,16], index: 1, kind: input, shape index: {}]   ;;  %s3976_s0 = inlined_call_operand.vmem [shape: bf16[512,128], index: 0, kind: input, shape index: {}]   ;;  %s3977_s2 = inlined_call_operand.vmem [shape: f32[1,16], index: 2, kind: input, shape index: {}]   ;;  %s3978_s3 = inlined_call_operand.vmem [shape: f32[1,16], index: 3, kind: input, shape index: {}]   ;;  %s3979_s4 = inlined_call_operand.vmem [shape: bf16[512,16], index: 4, kind: output, shape index: {}]  }
   0x1   :  { %v1926_v0 = vld [vmem:[%s3975_s1] sm:$0xff]   ;;  %v1927_v1 = vld [vmem:[%s3975_s1 + $0x8] sm:$0xff]   ;;  %v1928_v2 = vld [vmem:[%s3975_s1 + $0x10] sm:$0xff]  }
   0x2   :  { %1830 = vmatprep.subr.bf16.mxu0 %v1926_v0  ;;  %1910 = vmatprep.subr.bf16.mxu1 %v1926_v0  ;;  %v1929_v3 = vld [vmem:[%s3975_s1 + $0x18] sm:$0xff]   ;;  %v1934_v4 = vld [vmem:[%s3976_s0] sm:$0xff]   ;;  %v1931_v6 = vld [vmem:[%s3975_s1 + $0x28] sm:$0xff]  }
   0x3   :  { %1831 = vmatpush3.bf16.msra.mxu0 %v1926_v0  ;;  %1918 = vmatpush3.bf16.msra.mxu1 %v1926_v0  ;;  %v1930_v5 = vld [vmem:[%s3975_s1 + $0x20] sm:$0xff]   ;;  %v1932_v7 = vld [vmem:[%s3975_s1 + $0x30] sm:$0xff]   ;;  %v1933_v8 = vld [vmem:[%s3975_s1 + $0x38] sm:$0xff]  }
   0x4   :  { %1832 = vmatprep.subr.bf16.mxu0 %v1927_v1  ;;  %1911 = vmatprep.subr.bf16.mxu1 %v1927_v1  ;;  %v1950_v9 = vld [vmem:[%s3976_s0 + $0x80] sm:$0xff]   ;;  %v1935_v10 = vld [vmem:[%s3976_s0 + $0x8] sm:$0xff]   ;;  %v1936_v11 = vld [vmem:[%s3976_s0 + $0x10] sm:$0xff]  }
   0x5   :  { %1846 = vmatprep.mubr.bf16.mxu0 %v1934_v4  ;;  %1878 = vmatprep.mubr.bf16.mxu1 %v1950_v9  ;;  %v1951_v12 = vld [vmem:[%s3976_s0 + $0x88] sm:$0xff]   ;;  %v1952_v13 = vld [vmem:[%s3976_s0 + $0x90] sm:$0xff]   ;;  %v1937_v14 = vld [vmem:[%s3976_s0 + $0x18] sm:$0xff]  }
   0x6   :  { %v1938_v15 = vld [vmem:[%s3976_s0 + $0x20] sm:$0xff]   ;;  %v1953_v16 = vld [vmem:[%s3976_s0 + $0x98] sm:$0xff]   ;;  %v1939_v18 = vld [vmem:[%s3976_s0 + $0x28] sm:$0xff]  }
   0x7   :  { %1833 = vmatpush3.bf16.msra.mxu0 %v1927_v1  ;;  %1919 = vmatpush3.bf16.msra.mxu1 %v1927_v1  ;;  %v1954_v17 = vld [vmem:[%s3976_s0 + $0xa0] sm:$0xff]   ;;  %v1955_v19 = vld [vmem:[%s3976_s0 + $0xa8] sm:$0xff]   ;;  %v1940_v20 = vld [vmem:[%s3976_s0 + $0x30] sm:$0xff]  }
   0x8   :  { %1834 = vmatprep.subr.bf16.mxu0 %v1928_v2  ;;  %1912 = vmatprep.subr.bf16.mxu1 %v1928_v2  ;;  %v1956_v21 = vld [vmem:[%s3976_s0 + $0xb0] sm:$0xff]   ;;  %v1941_v22 = vld [vmem:[%s3976_s0 + $0x38] sm:$0xff]   ;;  %v1942_v24 = vld [vmem:[%s3976_s0 + $0x40] sm:$0xff]  }
   0x9   :  { %v1957_v23 = vld [vmem:[%s3976_s0 + $0xb8] sm:$0xff]   ;;  %v1958_v25 = vld [vmem:[%s3976_s0 + $0xc0] sm:$0xff]   ;;  %v1943_v26 = vld [vmem:[%s3976_s0 + $0x48] sm:$0xff]  }
   0xa   :  { %v1959_v27 = vld [vmem:[%s3976_s0 + $0xc8] sm:$0xff]   ;;  %v1944_v28 = vld [vmem:[%s3976_s0 + $0x50] sm:$0xff]   ;;  %v1945_v30 = vld [vmem:[%s3976_s0 + $0x58] sm:$0xff]  }
   0xb   :  { %1835 = vmatpush3.bf16.msra.mxu0 %v1928_v2  ;;  %1920 = vmatpush3.bf16.msra.mxu1 %v1928_v2  ;;  %v1960_v29 = vld [vmem:[%s3976_s0 + $0xd0] sm:$0xff]   ;;  %v1961_v31 = vld [vmem:[%s3976_s0 + $0xd8] sm:$0xff]   ;;  %v1946_v32 = vld [vmem:[%s3976_s0 + $0x60] sm:$0xff]  }
   0xc   :  { %1836 = vmatprep.subr.bf16.mxu0 %v1929_v3  ;;  %1913 = vmatprep.subr.bf16.mxu1 %v1929_v3  ;;  %v1962_v33 = vld [vmem:[%s3976_s0 + $0xe0] sm:$0xff]   ;;  %v1947_v34 = vld [vmem:[%s3976_s0 + $0x68] sm:$0xff]   ;;  %v1948_v36 = vld [vmem:[%s3976_s0 + $0x70] sm:$0xff]  }
   0xd   :  { %v1963_v35 = vld [vmem:[%s3976_s0 + $0xe8] sm:$0xff]   ;;  %v1964_v37 = vld [vmem:[%s3976_s0 + $0xf0] sm:$0xff]   ;;  %v1949_v38 = vld [vmem:[%s3976_s0 + $0x78] sm:$0xff]  }
   0xe   :  { %v1965_v39 = vld [vmem:[%s3976_s0 + $0xf8] sm:$0xff]  }
   0xf   :  { %1837 = vmatpush3.bf16.msra.mxu0 %v1929_v3  ;;  %1921 = vmatpush3.bf16.msra.mxu1 %v1929_v3 }
  0x10   :  { %1838 = vmatprep.subr.bf16.mxu0 %v1930_v5  ;;  %1914 = vmatprep.subr.bf16.mxu1 %v1930_v5 }
  0x13   :  { %1839 = vmatpush3.bf16.msra.mxu0 %v1930_v5  ;;  %1922 = vmatpush3.bf16.msra.mxu1 %v1930_v5 }
  0x14   :  { %1840 = vmatprep.subr.bf16.mxu0 %v1931_v6  ;;  %1915 = vmatprep.subr.bf16.mxu1 %v1931_v6 }
  0x17   :  { %1841 = vmatpush3.bf16.msra.mxu0 %v1931_v6  ;;  %1923 = vmatpush3.bf16.msra.mxu1 %v1931_v6 }
  0x18   :  { %1842 = vmatprep.subr.bf16.mxu0 %v1932_v7  ;;  %1916 = vmatprep.subr.bf16.mxu1 %v1932_v7 }
  0x1b   :  { %1843 = vmatpush3.bf16.msra.mxu0 %v1932_v7  ;;  %1924 = vmatpush3.bf16.msra.mxu1 %v1932_v7 }
  0x1c   :  { %1844 = vmatprep.subr.bf16.mxu0 %v1933_v8  ;;  %1917 = vmatprep.subr.bf16.mxu1 %v1933_v8 }
  0x1f   :  { %1845 = vmatpush3.bf16.msra.mxu0 %v1933_v8  ;;  %1925 = vmatpush3.bf16.msra.mxu1 %v1933_v8 }
  0x22   :  { %1847 = vmatmul.mubr.bf16.vlgmr.msra.gmra.mrb[0].mxu0 %v1935_v10  ;;  %1879 = vmatmul.mubr.bf16.vlgmr.msra.gmra.mrb[0].mxu1 %v1951_v12 }
  0x23   :  { %1850 = vmatprep.mubr.bf16.mxu0 %v1936_v11  ;;  %1882 = vmatprep.mubr.bf16.mxu1 %v1952_v13 }
  0x2a   :  { %1851 = vmatmul.mubr.bf16.gmra.mrb[4].mxu0 %v1937_v14  ;;  %1883 = vmatmul.mubr.bf16.gmra.mrb[4].mxu1 %v1953_v16 }
  0x2b   :  { %1854 = vmatprep.mubr.bf16.mxu0 %v1938_v15  ;;  %1886 = vmatprep.mubr.bf16.mxu1 %v1954_v17 }
  0x32   :  { %1855 = vmatmul.mubr.bf16.gmra.mrb[8].mxu0 %v1939_v18  ;;  %1887 = vmatmul.mubr.bf16.gmra.mrb[8].mxu1 %v1955_v19 }
  0x33   :  { %1858 = vmatprep.mubr.bf16.mxu0 %v1940_v20  ;;  %1890 = vmatprep.mubr.bf16.mxu1 %v1956_v21 }
  0x3a   :  { %1859 = vmatmul.mubr.bf16.gmra.mrb[12].mxu0 %v1941_v22  ;;  %1891 = vmatmul.mubr.bf16.gmra.mrb[12].mxu1 %v1957_v23 }
  0x3b   :  { %1862 = vmatprep.mubr.bf16.mxu0 %v1942_v24  ;;  %1894 = vmatprep.mubr.bf16.mxu1 %v1958_v25 }
  0x42   :  { %1863 = vmatmul.mubr.bf16.gmra.mrb[16].mxu0 %v1943_v26  ;;  %1895 = vmatmul.mubr.bf16.gmra.mrb[16].mxu1 %v1959_v27 }
  0x43   :  { %1866 = vmatprep.mubr.bf16.mxu0 %v1944_v28  ;;  %1898 = vmatprep.mubr.bf16.mxu1 %v1960_v29 }
  0x4a   :  { %1867 = vmatmul.mubr.bf16.gmra.mrb[20].mxu0 %v1945_v30  ;;  %1899 = vmatmul.mubr.bf16.gmra.mrb[20].mxu1 %v1961_v31 }
  0x4b   :  { %1870 = vmatprep.mubr.bf16.mxu0 %v1946_v32  ;;  %1902 = vmatprep.mubr.bf16.mxu1 %v1962_v33 }
  0x52   :  { %1871 = vmatmul.mubr.bf16.gmra.mrb[24].mxu0 %v1947_v34  ;;  %1903 = vmatmul.mubr.bf16.gmra.mrb[24].mxu1 %v1963_v35 }
  0x53   :  { %1874 = vmatprep.mubr.bf16.mxu0 %v1948_v36  ;;  %1906 = vmatprep.mubr.bf16.mxu1 %v1964_v37 }
  0x5a   :  { %1875 = vmatmul.mubr.bf16.gmra.mrb[28].mxu0 %v1949_v38  ;;  %1907 = vmatmul.mubr.bf16.gmra.mrb[28].mxu1 %v1965_v39 }
  0xf5   :  { %v2113_v40 = vpop.f32.mrb[0].mxu0  ;;  %v2115_v41 = vpop.f32.mrb[0].mxu1 }
  0xf6   :  { %v2117_v42 = vpop.f32.mrb[1].mxu0  ;;  %v2119_v43 = vpop.f32.mrb[1].mxu1  ;;  %v631_v51 = vsel %vm627_vm0, %v2113_v40, 0.0 }
  0xf7   :  { %v2121_v44 = vpop.f32.mrb[2].mxu0  ;;  %v2123_v45 = vpop.f32.mrb[2].mxu1  ;;  %v628_v48 = vsel %vm627_vm0, %v2117_v42, 0.0 }
  0xf8   :  { %v2125_v46 = vpop.f32.mrb[3].mxu0  ;;  %v2127_v47 = vpop.f32.mrb[3].mxu1  ;;  %v633_v53 = vsel %vm627_vm0, %v2121_v44, 0.0 }
  0xf9   :  { %v629_v49 = vsel %vm627_vm0, %v2125_v46, 0.0 }
  0xfa   :  { %v630_v50 = vadd.f32 %v629_v49, %v628_v48 }
  0xfc   :  { %v632_v52 = vadd.f32 %v631_v51, %v630_v50 }
  0xfd   :  { %v2137_v54 = vpop.f32.mrb[4].mxu0  ;;  %v2139_v55 = vpop.f32.mrb[4].mxu1 }
  0xfe   :  { %v2141_v56 = vpop.f32.mrb[5].mxu0  ;;  %v634_v57 = vadd.f32 %v633_v53, %v632_v52  ;;  %v2143_v58 = vpop.f32.mrb[5].mxu1  ;;  %v639_v3 = vsel %vm627_vm0, %v2137_v54, 0.0 }
  0xff   :  { %v635_v59 = vsel %vm627_vm0, %v2141_v56, 0.0  ;;  %v2147_v60 = vpop.f32.mrb[6].mxu0  ;;  %v2149_v61 = vpop.f32.mrb[6].mxu1 }
 0x100   :  { %v636_v62 = vadd.f32 %v635_v59, %v634_v57  ;;  %v2151_v63 = vpop.f32.mrb[7].mxu0  ;;  %v2153_v0 = vpop.f32.mrb[7].mxu1  ;;  %v641_v5 = vsel %vm627_vm0, %v2147_v60, 0.0 }
 0x101   :  { %v637_v1 = vsel %vm627_vm0, %v2151_v63, 0.0 }
 0x102   :  { %v638_v2 = vadd.f32 %v637_v1, %v636_v62 }
 0x104   :  { %v640_v4 = vadd.f32 %v639_v3, %v638_v2 }
 0x105   :  { %v2161_v6 = vpop.f32.mrb[8].mxu0  ;;  %v2163_v7 = vpop.f32.mrb[8].mxu1 }
 0x106   :  { %v2165_v8 = vpop.f32.mrb[9].mxu0  ;;  %v642_v9 = vadd.f32 %v641_v5, %v640_v4  ;;  %v2167_v10 = vpop.f32.mrb[9].mxu1  ;;  %v647_v19 = vsel %vm627_vm0, %v2161_v6, 0.0 }
 0x107   :  { %v643_v11 = vsel %vm627_vm0, %v2165_v8, 0.0  ;;  %v2171_v12 = vpop.f32.mrb[10].mxu0  ;;  %v2173_v13 = vpop.f32.mrb[10].mxu1 }
 0x108   :  { %v644_v14 = vadd.f32 %v643_v11, %v642_v9  ;;  %v2175_v15 = vpop.f32.mrb[11].mxu0  ;;  %v2177_v16 = vpop.f32.mrb[11].mxu1  ;;  %v649_v21 = vsel %vm627_vm0, %v2171_v12, 0.0 }
 0x109   :  { %v645_v17 = vsel %vm627_vm0, %v2175_v15, 0.0 }
 0x10a   :  { %v646_v18 = vadd.f32 %v645_v17, %v644_v14 }
 0x10c   :  { %v648_v20 = vadd.f32 %v647_v19, %v646_v18 }
 0x10d   :  { %v2185_v22 = vpop.f32.mrb[12].mxu0  ;;  %v2187_v23 = vpop.f32.mrb[12].mxu1 }
 0x10e   :  { %v2189_v24 = vpop.f32.mrb[13].mxu0  ;;  %v650_v25 = vadd.f32 %v649_v21, %v648_v20  ;;  %v2191_v26 = vpop.f32.mrb[13].mxu1  ;;  %v655_v35 = vsel %vm627_vm0, %v2185_v22, 0.0 }
 0x10f   :  { %v651_v27 = vsel %vm627_vm0, %v2189_v24, 0.0  ;;  %v2195_v28 = vpop.f32.mrb[14].mxu0  ;;  %v2197_v29 = vpop.f32.mrb[14].mxu1 }
 0x110   :  { %v652_v30 = vadd.f32 %v651_v27, %v650_v25  ;;  %v2199_v31 = vpop.f32.mrb[15].mxu0  ;;  %v2201_v32 = vpop.f32.mrb[15].mxu1  ;;  %v657_v37 = vsel %vm627_vm0, %v2195_v28, 0.0 }
 0x111   :  { %v653_v33 = vsel %vm627_vm0, %v2199_v31, 0.0 }
 0x112   :  { %v654_v34 = vadd.f32 %v653_v33, %v652_v30 }
 0x114   :  { %v656_v36 = vadd.f32 %v655_v35, %v654_v34 }
 0x115   :  { %v2209_v38 = vpop.f32.mrb[16].mxu0  ;;  %v2211_v39 = vpop.f32.mrb[16].mxu1 }
 0x116   :  { %4063 = vst [vmem:[#allocation2_spill] sm:$0xff] %v2209_v38  ;;  %v2213_v48 = vpop.f32.mrb[17].mxu0  ;;  %v658_v49 = vadd.f32 %v657_v37, %v656_v36  ;;  %v2215_v50 = vpop.f32.mrb[17].mxu1  ;;  %v663_v3 = vsel %vm627_vm0, %v2209_v38, 0.0 }
 0x117   :  { %v659_v51 = vsel %vm627_vm0, %v2213_v48, 0.0  ;;  %v2219_v52 = vpop.f32.mrb[18].mxu0  ;;  %v2221_v53 = vpop.f32.mrb[18].mxu1 }
 0x118   :  { %4064 = vst [vmem:[#allocation3_spill] sm:$0xff] %v2219_v52  ;;  %v660_v57 = vadd.f32 %v659_v51, %v658_v49  ;;  %v2223_v59 = vpop.f32.mrb[19].mxu0  ;;  %v2225_v62 = vpop.f32.mrb[19].mxu1  ;;  %v665_v5 = vsel %vm627_vm0, %v2219_v52, 0.0 }
 0x119   :  { %v661_v1 = vsel %vm627_vm0, %v2223_v59, 0.0 }
 0x11a   :  { %v662_v2 = vadd.f32 %v661_v1, %v660_v57 }
 0x11c   :  { %v664_v4 = vadd.f32 %v663_v3, %v662_v2 }
 0x11d   :  { %v2233_v9 = vpop.f32.mrb[20].mxu0  ;;  %v2235_v11 = vpop.f32.mrb[20].mxu1 }
 0x11e   :  { %4065 = vst [vmem:[#allocation4_spill] sm:$0xff] %v2233_v9  ;;  %v2237_v14 = vpop.f32.mrb[21].mxu0  ;;  %v666_v17 = vadd.f32 %v665_v5, %v664_v4  ;;  %v2239_v18 = vpop.f32.mrb[21].mxu1  ;;  %v671_v35 = vsel %vm627_vm0, %v2233_v9, 0.0 }
 0x11f   :  { %4066 = vst [vmem:[#allocation5_spill] sm:$0xff] %v2237_v14  ;;  %v667_v19 = vsel %vm627_vm0, %v2237_v14, 0.0  ;;  %v2243_v20 = vpop.f32.mrb[22].mxu0  ;;  %v2245_v21 = vpop.f32.mrb[22].mxu1  ;;  %v691_v14 = vsel %vm627_vm0, %v2119_v43, 0.0 }
 0x120   :  { %4067 = vst [vmem:[#allocation6_spill] sm:$0xff] %v2243_v20  ;;  %v668_v25 = vadd.f32 %v667_v19, %v666_v17  ;;  %v2247_v27 = vpop.f32.mrb[23].mxu0  ;;  %v2249_v30 = vpop.f32.mrb[23].mxu1  ;;  %v673_v37 = vsel %vm627_vm0, %v2243_v20, 0.0 }
 0x121   :  { %4068 = vst [vmem:[#allocation7_spill] sm:$0xff] %v2247_v27  ;;  %v669_v33 = vsel %vm627_vm0, %v2247_v27, 0.0 }
 0x122   :  { %v670_v34 = vadd.f32 %v669_v33, %v668_v25 }
 0x124   :  { %v672_v36 = vadd.f32 %v671_v35, %v670_v34 }
 0x125   :  { %v2257_v49 = vpop.f32.mrb[24].mxu0  ;;  %v2259_v51 = vpop.f32.mrb[24].mxu1 }
 0x126   :  { %4069 = vst [vmem:[#allocation8_spill] sm:$0xff] %v2257_v49  ;;  %4070 = vst [vmem:[#allocation9_spill] sm:$0xff] %v2259_v51  ;;  %v2261_v57 = vpop.f32.mrb[25].mxu0  ;;  %v674_v1 = vadd.f32 %v673_v37, %v672_v36  ;;  %v2263_v2 = vpop.f32.mrb[25].mxu1  ;;  %v679_v35 = vsel %vm627_vm0, %v2257_v49, 0.0 }
 0x127   :  { %4071 = vst [vmem:[#allocation10_spill] sm:$0xff] %v2261_v57  ;;  %v675_v3 = vsel %vm627_vm0, %v2261_v57, 0.0  ;;  %v2267_v4 = vpop.f32.mrb[26].mxu0  ;;  %v2269_v5 = vpop.f32.mrb[26].mxu1 }
 0x128   :  { %4072 = vst [vmem:[#allocation11_spill] sm:$0xff] %v2267_v4  ;;  %4073 = vst [vmem:[#allocation12_spill] sm:$0xff] %v2269_v5  ;;  %v676_v17 = vadd.f32 %v675_v3, %v674_v1  ;;  %v2271_v19 = vpop.f32.mrb[27].mxu0  ;;  %v2273_v25 = vpop.f32.mrb[27].mxu1  ;;  %v681_v37 = vsel %vm627_vm0, %v2267_v4, 0.0 }
 0x129   :  { %4074 = vst [vmem:[#allocation13_spill] sm:$0xff] %v2271_v19  ;;  %4075 = vst [vmem:[#allocation14_spill] sm:$0xff] %v2273_v25  ;;  %v677_v33 = vsel %vm627_vm0, %v2271_v19, 0.0 }
 0x12a   :  { %v678_v34 = vadd.f32 %v677_v33, %v676_v17 }
 0x12c   :  { %v680_v36 = vadd.f32 %v679_v35, %v678_v34 }
 0x12d   :  { %v2281_v57 = vpop.f32.mrb[28].mxu0  ;;  %v2283_v20 = vpop.f32.mrb[28].mxu1 }
 0x12e   :  { %v2285_v1 = vpop.f32.mrb[29].mxu0  ;;  %v682_v3 = vadd.f32 %v681_v37, %v680_v36  ;;  %v2287_v9 = vpop.f32.mrb[29].mxu1  ;;  %v687_v36 = vsel %vm627_vm0, %v2281_v57, 0.0 }
 0x12f   :  { %4076 = vst [vmem:[#allocation15_spill] sm:$0xff] %v2285_v1  ;;  %4077 = vst [vmem:[#allocation16_spill] sm:$0xff] %v2287_v9  ;;  %v683_v19 = vsel %vm627_vm0, %v2285_v1, 0.0  ;;  %v2291_v17 = vpop.f32.mrb[30].mxu0  ;;  %v2293_v33 = vpop.f32.mrb[30].mxu1 }
 0x130   :  { %4078 = vst [vmem:[#allocation17_spill] sm:$0xff] %v2291_v17  ;;  %v684_v34 = vadd.f32 %v683_v19, %v682_v3  ;;  %v2295_v35 = vpop.f32.mrb[31].mxu0  ;;  %v2297_v4 = vpop.f32.mrb[31].mxu1  ;;  %v689_v1 = vsel %vm627_vm0, %v2291_v17, 0.0  ;;  %v693_v3 = vsel %vm627_vm0, %v2127_v47, 0.0 }
 0x131   :  { %4079 = vst [vmem:[#allocation18_spill] sm:$0xff] %v2295_v35  ;;  %v685_v49 = vsel %vm627_vm0, %v2295_v35, 0.0  ;;  %v695_v35 = vsel %vm627_vm0, %v2115_v41, 0.0 }
 0x132   :  { %v686_v27 = vadd.f32 %v685_v49, %v684_v34  ;;  %v697_v34 = vsel %vm627_vm0, %v2123_v45, 0.0 }
 0x134   :  { %v688_v37 = vadd.f32 %v687_v36, %v686_v27  ;;  %v699_v27 = vsel %vm627_vm0, %v2143_v58, 0.0 }
 0x136   :  { %v690_v52 = vadd.f32 %v689_v1, %v688_v37  ;;  %v701_v1 = vsel %vm627_vm0, %v2153_v0, 0.0 }
 0x138   :  { %v692_v19 = vadd.f32 %v691_v14, %v690_v52  ;;  %v703_v14 = vsel %vm627_vm0, %v2139_v55, 0.0 }
 0x13a   :  { %v694_v38 = vadd.f32 %v693_v3, %v692_v19  ;;  %v705_v19 = vsel %vm627_vm0, %v2149_v61, 0.0 }
 0x13c   :  { %v696_v49 = vadd.f32 %v695_v35, %v694_v38  ;;  %v707_v38 = vsel %vm627_vm0, %v2167_v10, 0.0 }
 0x13e   :  { %v698_v36 = vadd.f32 %v697_v34, %v696_v49  ;;  %v709_v49 = vsel %vm627_vm0, %v2177_v16, 0.0 }
 0x140   :  { %v700_v17 = vadd.f32 %v699_v27, %v698_v36  ;;  %v711_v27 = vsel %vm627_vm0, %v2163_v7, 0.0  ;;  %v713_v36 = vsel %vm627_vm0, %v2173_v13, 0.0 }
 0x142   :  { %v702_v52 = vadd.f32 %v701_v1, %v700_v17  ;;  %v715_v1 = vsel %vm627_vm0, %v2191_v26, 0.0 }
 0x144   :  { %v704_v37 = vadd.f32 %v703_v14, %v702_v52 }
 0x146   :  { %v706_v35 = vadd.f32 %v705_v19, %v704_v37  ;;  %v717_v37 = vsel %vm627_vm0, %v2201_v32, 0.0 }
 0x148   :  { %v708_v3 = vadd.f32 %v707_v38, %v706_v35  ;;  %v719_v38 = vsel %vm627_vm0, %v2187_v23, 0.0 }
 0x14a   :  { %v710_v34 = vadd.f32 %v709_v49, %v708_v3  ;;  %v721_v3 = vsel %vm627_vm0, %v2197_v29, 0.0  ;;  %v723_v49 = vsel %vm627_vm0, %v2215_v50, 0.0 }
 0x14c   :  { %v712_v17 = vadd.f32 %v711_v27, %v710_v34 }
 0x14e   :  { %v714_v52 = vadd.f32 %v713_v36, %v712_v17  ;;  %v725_v17 = vsel %vm627_vm0, %v2225_v62, 0.0 }
 0x150   :  { %v716_v14 = vadd.f32 %v715_v1, %v714_v52  ;;  %v727_v1 = vsel %vm627_vm0, %v2211_v39, 0.0 }
 0x152   :  { %v718_v19 = vadd.f32 %v717_v37, %v716_v14  ;;  %v729_v14 = vsel %vm627_vm0, %v2221_v53, 0.0  ;;  %v731_v37 = vsel %vm627_vm0, %v2239_v18, 0.0 }
 0x154   :  { %v720_v35 = vadd.f32 %v719_v38, %v718_v19 }
 0x156   :  { %v722_v34 = vadd.f32 %v721_v3, %v720_v35  ;;  %v733_v35 = vsel %vm627_vm0, %v2249_v30, 0.0 }
 0x158   :  { %v724_v27 = vadd.f32 %v723_v49, %v722_v34  ;;  %v735_v49 = vsel %vm627_vm0, %v2235_v11, 0.0 }
 0x15a   :  { %v726_v36 = vadd.f32 %v725_v17, %v724_v27  ;;  %v737_v27 = vsel %vm627_vm0, %v2245_v21, 0.0  ;;  %v739_v17 = vsel %vm627_vm0, %v2263_v2, 0.0 }
 0x15c   :  { %v728_v52 = vadd.f32 %v727_v1, %v726_v36 }
 0x15e   :  { %v730_v19 = vadd.f32 %v729_v14, %v728_v52  ;;  %v741_v52 = vsel %vm627_vm0, %v2273_v25, 0.0 }
 0x160   :  { %v732_v38 = vadd.f32 %v731_v37, %v730_v19  ;;  %v743_v37 = vsel %vm627_vm0, %v2259_v51, 0.0 }
 0x162   :  { %v734_v3 = vadd.f32 %v733_v35, %v732_v38  ;;  %v745_v38 = vsel %vm627_vm0, %v2269_v5, 0.0  ;;  %v747_v35 = vsel %vm627_vm0, %v2287_v9, 0.0 }
 0x164   :  { %v736_v34 = vadd.f32 %v735_v49, %v734_v3 }
 0x166   :  { %v738_v36 = vadd.f32 %v737_v27, %v736_v34  ;;  %v749_v34 = vsel %vm627_vm0, %v2297_v4, 0.0 }
 0x168   :  { %v740_v1 = vadd.f32 %v739_v17, %v738_v36  ;;  %v751_v17 = vsel %vm627_vm0, %v2283_v20, 0.0 }
 0x16a   :  { %v742_v14 = vadd.f32 %v741_v52, %v740_v1  ;;  %v753_v1 = vsel %vm627_vm0, %v2293_v33, 0.0 }
 0x16c   :  { %v744_v19 = vadd.f32 %v743_v37, %v742_v14 }
 0x16e   :  { %v746_v3 = vadd.f32 %v745_v38, %v744_v19 }
 0x170   :  { %v748_v49 = vadd.f32 %v747_v35, %v746_v3 }
 0x172   :  { %v750_v27 = vadd.f32 %v749_v34, %v748_v49  ;;  %v4088_v34 = vld [vmem:[#allocation7_spill] sm:$0xff] }
 0x174   :  { %v752_v36 = vadd.f32 %v751_v17, %v750_v27  ;;  %v4089_v27 = vld [vmem:[#allocation4_spill] sm:$0xff]  ;;  %v4091_v17 = vld [vmem:[#allocation6_spill] sm:$0xff] }
 0x176   :  { %v754_v52 = vadd.f32 %v753_v1, %v752_v36  ;;  %v4093_v1 = vld [vmem:[#allocation10_spill] sm:$0xff] }
 0x178   :  { %v755_v14 = vrot.slane %v754_v52, 4 }
 0x17a   :  { %v756_v37 = vadd.f32 %v755_v14, %v754_v52  ;;  %v4094_v14 = vld [vmem:[#allocation13_spill] sm:$0xff] }
 0x17c   :  { %v757_v5 = vrot.slane %v756_v37, 2 }
 0x17e   :  { %v758_v51 = vadd.f32 %v757_v5, %v756_v37  ;;  %v4085_v5 = vld [vmem:[#allocation3_spill] sm:$0xff] }
 0x180   :  { %v759_v25 = vrot.slane %v758_v51, 1 }
 0x182   :  { %v760_v9 = vadd.f32 %v759_v25, %v758_v51  ;;  %v4084_v51 = vld [vmem:[#allocation2_spill] sm:$0xff]  ;;  %v4086_v25 = vld [vmem:[#allocation5_spill] sm:$0xff] }
 0x184   :  { %v2369_v19 = vmul.f32 0.001953125, %v760_v9 }
 0x186   :  { %v2373_v38 = vsub.f32 %v2117_v42, %v2369_v19  ;;  %v2377_v35 = vsub.f32 %v2125_v46, %v2369_v19  ;;  %v2381_v3 = vsub.f32 %v2113_v40, %v2369_v19  ;;  %v2385_v49 = vsub.f32 %v2121_v44, %v2369_v19 }
 0x187   :  { %v2389_v9 = vsub.f32 %v2141_v56, %v2369_v19  ;;  %v2393_v42 = vsub.f32 %v2151_v63, %v2369_v19  ;;  %v2397_v46 = vsub.f32 %v2137_v54, %v2369_v19  ;;  %v2401_v40 = vsub.f32 %v2147_v60, %v2369_v19 }
 0x188   :  { %4080 = vst [vmem:[#allocation19_spill] sm:$0xff] %v2373_v38  ;;  %4081 = vst [vmem:[#allocation20_spill] sm:$0xff] %v2377_v35  ;;  %v2405_v44 = vsub.f32 %v2165_v8, %v2369_v19  ;;  %v2409_v56 = vsub.f32 %v2175_v15, %v2369_v19  ;;  %v2413_v63 = vsub.f32 %v2161_v6, %v2369_v19 }
 0x189   :  { %4082 = vst [vmem:[#allocation21_spill] sm:$0xff] %v2381_v3  ;;  %4083 = vst [vmem:[#allocation22_spill] sm:$0xff] %v2385_v49  ;;  %v2417_v54 = vsub.f32 %v2171_v12, %v2369_v19  ;;  %v2421_v60 = vsub.f32 %v2189_v24, %v2369_v19  ;;  %v2425_v8 = vsub.f32 %v2199_v31, %v2369_v19 }
 0x18a   :  { %v2429_v15 = vsub.f32 %v2185_v22, %v2369_v19  ;;  %v2433_v6 = vsub.f32 %v2195_v28, %v2369_v19  ;;  %v2437_v12 = vsub.f32 %v2213_v48, %v2369_v19  ;;  %v2441_v24 = vsub.f32 %v2223_v59, %v2369_v19 }
 0x18b   :  { %v2445_v31 = vsub.f32 %v4084_v51, %v2369_v19  ;;  %v2449_v22 = vsub.f32 %v4085_v5, %v2369_v19  ;;  %v2453_v28 = vsub.f32 %v4086_v25, %v2369_v19  ;;  %v2457_v48 = vsub.f32 %v4088_v34, %v2369_v19  ;;  %v4096_v51 = vld [vmem:[#allocation8_spill] sm:$0xff]  ;;  %v4097_v25 = vld [vmem:[#allocation11_spill] sm:$0xff] }
 0x18c   :  { %v2461_v59 = vsub.f32 %v4089_v27, %v2369_v19  ;;  %v2465_v36 = vsub.f32 %v4091_v17, %v2369_v19  ;;  %v2469_v52 = vsub.f32 %v4093_v1, %v2369_v19  ;;  %v2473_v37 = vsub.f32 %v4094_v14, %v2369_v19  ;;  %v4098_v27 = vld [vmem:[#allocation15_spill] sm:$0xff] }
 0x18d   :  { %4087 = vst [vmem:[#allocation2_spill] sm:$0xff] %v2453_v28  ;;  %v2477_v5 = vsub.f32 %v4096_v51, %v2369_v19  ;;  %v2481_v34 = vsub.f32 %v4097_v25, %v2369_v19  ;;  %v2485_v17 = vsub.f32 %v4098_v27, %v2369_v19  ;;  %v2493_v14 = vsub.f32 %v2281_v57, %v2369_v19 }
 0x18e   :  { %4090 = vst [vmem:[#allocation3_spill] sm:$0xff] %v2461_v59  ;;  %4092 = vst [vmem:[#allocation5_spill] sm:$0xff] %v2465_v36  ;;  %v4099_v36 = vld [vmem:[#allocation18_spill] sm:$0xff]  ;;  %v2501_v25 = vsub.f32 %v2119_v43, %v2369_v19  ;;  %v2505_v27 = vsub.f32 %v2127_v47, %v2369_v19  ;;  %v2513_v57 = vsub.f32 %v2123_v45, %v2369_v19 }
 0x18f   :  { %4095 = vst [vmem:[#allocation7_spill] sm:$0xff] %v2473_v37  ;;  %v2489_v1 = vsub.f32 %v4099_v36, %v2369_v19  ;;  %v4100_v37 = vld [vmem:[#allocation17_spill] sm:$0xff]  ;;  %v2509_v36 = vsub.f32 %v2115_v41, %v2369_v19  ;;  %v2521_v43 = vsub.f32 %v2153_v0, %v2369_v19  ;;  %v2525_v47 = vsub.f32 %v2139_v55, %v2369_v19 }
 0x190   :  { %v2497_v51 = vsub.f32 %v4100_v37, %v2369_v19  ;;  %v2517_v37 = vsub.f32 %v2143_v58, %v2369_v19  ;;  %v2529_v41 = vsub.f32 %v2149_v61, %v2369_v19  ;;  %v2533_v45 = vsub.f32 %v2167_v10, %v2369_v19 }
 0x191   :  { %v2537_v58 = vsub.f32 %v2177_v16, %v2369_v19  ;;  %v2541_v0 = vsub.f32 %v2163_v7, %v2369_v19  ;;  %v2545_v55 = vsub.f32 %v2173_v13, %v2369_v19  ;;  %v2549_v61 = vsub.f32 %v2191_v26, %v2369_v19 }
 0x192   :  { %v2553_v10 = vsub.f32 %v2201_v32, %v2369_v19  ;;  %v2557_v16 = vsub.f32 %v2187_v23, %v2369_v19  ;;  %v2561_v7 = vsub.f32 %v2197_v29, %v2369_v19  ;;  %v2565_v13 = vsub.f32 %v2215_v50, %v2369_v19 }
 0x193   :  { %v2569_v26 = vsub.f32 %v2225_v62, %v2369_v19  ;;  %v2573_v32 = vsub.f32 %v2211_v39, %v2369_v19  ;;  %v2577_v23 = vsub.f32 %v2221_v53, %v2369_v19  ;;  %v2581_v29 = vsub.f32 %v2239_v18, %v2369_v19 }
 0x194   :  { %4101 = vst [vmem:[#allocation4_spill] sm:$0xff] %v2565_v13  ;;  %v2585_v50 = vsub.f32 %v2249_v30, %v2369_v19  ;;  %v2589_v62 = vsub.f32 %v2235_v11, %v2369_v19  ;;  %v2593_v39 = vsub.f32 %v2245_v21, %v2369_v19  ;;  %v2597_v53 = vsub.f32 %v2263_v2, %v2369_v19 }
 0x195   :  { %4102 = vst [vmem:[#allocation6_spill] sm:$0xff] %v2569_v26  ;;  %4103 = vst [vmem:[#allocation10_spill] sm:$0xff] %v2573_v32  ;;  %v2617_v2 = vsub.f32 %v2297_v4, %v2369_v19  ;;  %v830_v4 = vmul.f32 %v2385_v49, %v2385_v49  ;;  %v833_v49 = vmul.f32 %v2397_v46, %v2397_v46 }
 0x196   :  { %4104 = vst [vmem:[#allocation13_spill] sm:$0xff] %v2577_v23  ;;  %4105 = vst [vmem:[#allocation8_spill] sm:$0xff] %v2581_v29  ;;  %v4110_v23 = vld [vmem:[#allocation14_spill] sm:$0xff]  ;;  %v4112_v29 = vld [vmem:[#allocation9_spill] sm:$0xff] }
 0x197   :  { %4106 = vst [vmem:[#allocation11_spill] sm:$0xff] %v2585_v50  ;;  %4107 = vst [vmem:[#allocation15_spill] sm:$0xff] %v2589_v62  ;;  %v2601_v18 = vsub.f32 %v4110_v23, %v2369_v19  ;;  %v2605_v30 = vsub.f32 %v4112_v29, %v2369_v19  ;;  %v4114_v50 = vld [vmem:[#allocation12_spill] sm:$0xff]  ;;  %v2621_v23 = vsub.f32 %v2283_v20, %v2369_v19 }
 0x198   :  { %4108 = vst [vmem:[#allocation18_spill] sm:$0xff] %v2593_v39  ;;  %4109 = vst [vmem:[#allocation17_spill] sm:$0xff] %v2597_v53  ;;  %v2609_v11 = vsub.f32 %v4114_v50, %v2369_v19  ;;  %v4116_v62 = vld [vmem:[#allocation16_spill] sm:$0xff]  ;;  %v2625_v29 = vsub.f32 %v2293_v33, %v2369_v19  ;;  %v827_v50 = vmul.f32 %v2373_v38, %v2373_v38 }
 0x199   :  { %4111 = vst [vmem:[#allocation14_spill] sm:$0xff] %v2601_v18  ;;  %4113 = vst [vmem:[#allocation9_spill] sm:$0xff] %v2605_v30  ;;  %v2613_v21 = vsub.f32 %v4116_v62, %v2369_v19  ;;  %v829_v62 = vmul.f32 %v2381_v3, %v2381_v3  ;;  %v831_v33 = vmul.f32 %v2389_v9, %v2389_v9 }
 0x19a   :  { %4115 = vst [vmem:[#allocation12_spill] sm:$0xff] %v2609_v11  ;;  %4118 = vst [vmem:[#allocation23_spill] sm:$0xff] %v2617_v2  ;;  %v828_v11 = vmul.f32 %v2377_v35, %v2377_v35  ;;  %v891_v2 = vsel %vm627_vm0, %v827_v50, 0.0  ;;  %v832_v35 = vmul.f32 %v2393_v42, %v2393_v42 }
 0x19b   :  { %4117 = vst [vmem:[#allocation16_spill] sm:$0xff] %v2613_v21  ;;  %4119 = vst [vmem:[#allocation24_spill] sm:$0xff] %v2621_v23  ;;  %v894_v19 = vsel %vm627_vm0, %v829_v62, 0.0  ;;  %v898_v50 = vsel %vm627_vm0, %v831_v33, 0.0  ;;  %v902_v62 = vsel %vm627_vm0, %v833_v49, 0.0  ;;  %v839_v49 = vmul.f32 %v2421_v60, %v2421_v60 }
 0x19c   :  { %4120 = vst [vmem:[#allocation25_spill] sm:$0xff] %v2625_v29  ;;  %v892_v20 = vsel %vm627_vm0, %v828_v11, 0.0  ;;  %v896_v29 = vsel %vm627_vm0, %v830_v4, 0.0  ;;  %v834_v11 = vmul.f32 %v2401_v40, %v2401_v40 }
 0x19d   :  { %v893_v23 = vadd.f32 %v892_v20, %v891_v2  ;;  %v900_v2 = vsel %vm627_vm0, %v832_v35, 0.0  ;;  %v838_v35 = vmul.f32 %v2417_v54, %v2417_v54 }
 0x19f   :  { %v895_v38 = vadd.f32 %v894_v19, %v893_v23  ;;  %v835_v23 = vmul.f32 %v2405_v44, %v2405_v44 }
 0x1a1   :  { %v897_v3 = vadd.f32 %v896_v29, %v895_v38  ;;  %v836_v38 = vmul.f32 %v2409_v56, %v2409_v56  ;;  %v904_v29 = vsel %vm627_vm0, %v834_v11, 0.0  ;;  %v906_v33 = vsel %vm627_vm0, %v835_v23, 0.0 }
 0x1a2   :  { %v840_v11 = vmul.f32 %v2425_v8, %v2425_v8  ;;  %v841_v23 = vmul.f32 %v2429_v15, %v2429_v15 }
 0x1a3   :  { %v899_v21 = vadd.f32 %v898_v50, %v897_v3  ;;  %v837_v3 = vmul.f32 %v2413_v63, %v2413_v63 }
 0x1a5   :  { %v901_v20 = vadd.f32 %v900_v2, %v899_v21  ;;  %v908_v21 = vsel %vm627_vm0, %v836_v38, 0.0  ;;  %v842_v38 = vmul.f32 %v2433_v6, %v2433_v6 }
 0x1a7   :  { %v903_v19 = vadd.f32 %v902_v62, %v901_v20  ;;  %v910_v20 = vsel %vm627_vm0, %v837_v3, 0.0  ;;  %v843_v3 = vmul.f32 %v2437_v12, %v2437_v12 }
 0x1a9   :  { %v905_v4 = vadd.f32 %v904_v29, %v903_v19  ;;  %v912_v19 = vsel %vm627_vm0, %v838_v35, 0.0  ;;  %v844_v35 = vmul.f32 %v2441_v24, %v2441_v24 }
 0x1ab   :  { %v907_v50 = vadd.f32 %v906_v33, %v905_v4  ;;  %v914_v4 = vsel %vm627_vm0, %v839_v49, 0.0  ;;  %v845_v49 = vmul.f32 %v2445_v31, %v2445_v31 }
 0x1ad   :  { %v909_v2 = vadd.f32 %v908_v21, %v907_v50  ;;  %v916_v50 = vsel %vm627_vm0, %v840_v11, 0.0  ;;  %v846_v11 = vmul.f32 %v2449_v22, %v2449_v22 }
 0x1af   :  { %v911_v62 = vadd.f32 %v910_v20, %v909_v2  ;;  %v918_v2 = vsel %vm627_vm0, %v841_v23, 0.0  ;;  %v847_v23 = vmul.f32 %v2453_v28, %v2453_v28 }
 0x1b1   :  { %v913_v29 = vadd.f32 %v912_v19, %v911_v62  ;;  %v920_v62 = vsel %vm627_vm0, %v842_v38, 0.0  ;;  %v848_v38 = vmul.f32 %v2457_v48, %v2457_v48 }
 0x1b3   :  { %v915_v33 = vadd.f32 %v914_v4, %v913_v29  ;;  %v922_v29 = vsel %vm627_vm0, %v843_v3, 0.0  ;;  %v849_v3 = vmul.f32 %v2461_v59, %v2461_v59 }
 0x1b5   :  { %v917_v21 = vadd.f32 %v916_v50, %v915_v33  ;;  %v924_v33 = vsel %vm627_vm0, %v844_v35, 0.0  ;;  %v4121_v35 = vld [vmem:[#allocation5_spill] sm:$0xff] }
 0x1b7   :  { %v919_v20 = vadd.f32 %v918_v2, %v917_v21  ;;  %v926_v21 = vsel %vm627_vm0, %v845_v49, 0.0  ;;  %v851_v49 = vmul.f32 %v2469_v52, %v2469_v52 }
 0x1b9   :  { %v921_v19 = vadd.f32 %v920_v62, %v919_v20  ;;  %v928_v20 = vsel %vm627_vm0, %v846_v11, 0.0  ;;  %v4122_v11 = vld [vmem:[#allocation7_spill] sm:$0xff] }
 0x1bb   :  { %v923_v4 = vadd.f32 %v922_v29, %v921_v19  ;;  %v930_v19 = vsel %vm627_vm0, %v847_v23, 0.0  ;;  %v853_v23 = vmul.f32 %v2477_v5, %v2477_v5 }
 0x1bd   :  { %v925_v50 = vadd.f32 %v924_v33, %v923_v4  ;;  %v850_v4 = vmul.f32 %v4121_v35, %v4121_v35  ;;  %v932_v33 = vsel %vm627_vm0, %v848_v38, 0.0  ;;  %v854_v38 = vmul.f32 %v2481_v34, %v2481_v34 }
 0x1bf   :  { %v927_v2 = vadd.f32 %v926_v21, %v925_v50  ;;  %v934_v50 = vsel %vm627_vm0, %v849_v3, 0.0  ;;  %v942_v3 = vsel %vm627_vm0, %v853_v23, 0.0  ;;  %v859_v23 = vmul.f32 %v2501_v25, %v2501_v25 }
 0x1c1   :  { %v929_v62 = vadd.f32 %v928_v20, %v927_v2  ;;  %v852_v2 = vmul.f32 %v4122_v11, %v4122_v11  ;;  %v936_v20 = vsel %vm627_vm0, %v850_v4, 0.0  ;;  %v856_v4 = vmul.f32 %v2489_v1, %v2489_v1 }
 0x1c3   :  { %v931_v29 = vadd.f32 %v930_v19, %v929_v62  ;;  %v938_v62 = vsel %vm627_vm0, %v851_v49, 0.0 }
 0x1c5   :  { %v933_v28 = vadd.f32 %v932_v33, %v931_v29  ;;  %v940_v29 = vsel %vm627_vm0, %v852_v2, 0.0  ;;  %v858_v2 = vmul.f32 %v2497_v51, %v2497_v51 }
 0x1c7   :  { %v935_v21 = vadd.f32 %v934_v50, %v933_v28  ;;  %v855_v28 = vmul.f32 %v2485_v17, %v2485_v17 }
 0x1c9   :  { %v937_v59 = vadd.f32 %v936_v20, %v935_v21  ;;  %v944_v21 = vsel %vm627_vm0, %v854_v38, 0.0  ;;  %v946_v49 = vsel %vm627_vm0, %v855_v28, 0.0  ;;  %v860_v38 = vmul.f32 %v2505_v27, %v2505_v27 }
 0x1ca   :  { %v861_v28 = vmul.f32 %v2509_v36, %v2509_v36 }
 0x1cb   :  { %v939_v19 = vadd.f32 %v938_v62, %v937_v59  ;;  %v857_v59 = vmul.f32 %v2493_v14, %v2493_v14 }
 0x1cd   :  { %v941_v33 = vadd.f32 %v940_v29, %v939_v19  ;;  %v948_v19 = vsel %vm627_vm0, %v856_v4, 0.0  ;;  %v862_v4 = vmul.f32 %v2513_v57, %v2513_v57 }
 0x1cf   :  { %v943_v50 = vadd.f32 %v942_v3, %v941_v33  ;;  %v950_v33 = vsel %vm627_vm0, %v857_v59, 0.0  ;;  %v863_v59 = vmul.f32 %v2517_v37, %v2517_v37 }
 0x1d1   :  { %v945_v20 = vadd.f32 %v944_v21, %v943_v50  ;;  %v952_v50 = vsel %vm627_vm0, %v858_v2, 0.0  ;;  %v864_v2 = vmul.f32 %v2521_v43, %v2521_v43 }
 0x1d3   :  { %v947_v62 = vadd.f32 %v946_v49, %v945_v20  ;;  %v954_v20 = vsel %vm627_vm0, %v859_v23, 0.0  ;;  %v865_v23 = vmul.f32 %v2525_v47, %v2525_v47 }
 0x1d5   :  { %v949_v29 = vadd.f32 %v948_v19, %v947_v62  ;;  %v956_v62 = vsel %vm627_vm0, %v860_v38, 0.0  ;;  %v866_v38 = vmul.f32 %v2529_v41, %v2529_v41 }
 0x1d7   :  { %v951_v3 = vadd.f32 %v950_v33, %v949_v29  ;;  %v958_v29 = vsel %vm627_vm0, %v861_v28, 0.0  ;;  %v867_v28 = vmul.f32 %v2533_v45, %v2533_v45 }
 0x1d9   :  { %v953_v21 = vadd.f32 %v952_v50, %v951_v3  ;;  %v960_v3 = vsel %vm627_vm0, %v862_v4, 0.0  ;;  %v868_v4 = vmul.f32 %v2537_v58, %v2537_v58 }
 0x1db   :  { %v955_v49 = vadd.f32 %v954_v20, %v953_v21  ;;  %v962_v21 = vsel %vm627_vm0, %v863_v59, 0.0  ;;  %v869_v59 = vmul.f32 %v2541_v0, %v2541_v0 }
 0x1dd   :  { %v957_v19 = vadd.f32 %v956_v62, %v955_v49  ;;  %v964_v49 = vsel %vm627_vm0, %v864_v2, 0.0  ;;  %v870_v2 = vmul.f32 %v2545_v55, %v2545_v55 }
 0x1df   :  { %v959_v33 = vadd.f32 %v958_v29, %v957_v19  ;;  %v966_v19 = vsel %vm627_vm0, %v865_v23, 0.0  ;;  %v871_v23 = vmul.f32 %v2549_v61, %v2549_v61 }
 0x1e1   :  { %v961_v50 = vadd.f32 %v960_v3, %v959_v33  ;;  %v968_v33 = vsel %vm627_vm0, %v866_v38, 0.0  ;;  %v872_v38 = vmul.f32 %v2553_v10, %v2553_v10 }
 0x1e3   :  { %v963_v20 = vadd.f32 %v962_v21, %v961_v50  ;;  %v970_v50 = vsel %vm627_vm0, %v867_v28, 0.0  ;;  %v873_v28 = vmul.f32 %v2557_v16, %v2557_v16 }
 0x1e5   :  { %v965_v62 = vadd.f32 %v964_v49, %v963_v20  ;;  %v972_v20 = vsel %vm627_vm0, %v868_v4, 0.0  ;;  %v874_v4 = vmul.f32 %v2561_v7, %v2561_v7 }
 0x1e7   :  { %v967_v29 = vadd.f32 %v966_v19, %v965_v62  ;;  %v974_v62 = vsel %vm627_vm0, %v869_v59, 0.0  ;;  %v875_v59 = vmul.f32 %v2565_v13, %v2565_v13 }
 0x1e9   :  { %v969_v3 = vadd.f32 %v968_v33, %v967_v29  ;;  %v976_v29 = vsel %vm627_vm0, %v870_v2, 0.0  ;;  %v876_v2 = vmul.f32 %v2569_v26, %v2569_v26 }
 0x1eb   :  { %v971_v21 = vadd.f32 %v970_v50, %v969_v3  ;;  %v978_v3 = vsel %vm627_vm0, %v871_v23, 0.0  ;;  %v877_v23 = vmul.f32 %v2573_v32, %v2573_v32 }
 0x1ed   :  { %v973_v49 = vadd.f32 %v972_v20, %v971_v21  ;;  %v980_v21 = vsel %vm627_vm0, %v872_v38, 0.0  ;;  %v4123_v38 = vld [vmem:[#allocation13_spill] sm:$0xff] }
 0x1ef   :  { %v975_v19 = vadd.f32 %v974_v62, %v973_v49  ;;  %v982_v49 = vsel %vm627_vm0, %v873_v28, 0.0  ;;  %v4124_v28 = vld [vmem:[#allocation8_spill] sm:$0xff] }
 0x1f1   :  { %v977_v33 = vadd.f32 %v976_v29, %v975_v19  ;;  %v984_v19 = vsel %vm627_vm0, %v874_v4, 0.0  ;;  %v4125_v4 = vld [vmem:[#allocation11_spill] sm:$0xff] }
 0x1f3   :  { %v979_v50 = vadd.f32 %v978_v3, %v977_v33  ;;  %v986_v33 = vsel %vm627_vm0, %v875_v59, 0.0  ;;  %v4126_v59 = vld [vmem:[#allocation15_spill] sm:$0xff] }
 0x1f5   :  { %v981_v20 = vadd.f32 %v980_v21, %v979_v50  ;;  %v878_v50 = vmul.f32 %v4123_v38, %v4123_v38  ;;  %v988_v21 = vsel %vm627_vm0, %v876_v2, 0.0  ;;  %v882_v2 = vmul.f32 %v2593_v39, %v2593_v39 }
 0x1f7   :  { %v983_v62 = vadd.f32 %v982_v49, %v981_v20  ;;  %v879_v20 = vmul.f32 %v4124_v28, %v4124_v28  ;;  %v990_v49 = vsel %vm627_vm0, %v877_v23, 0.0 }
 0x1f9   :  { %v985_v29 = vadd.f32 %v984_v19, %v983_v62  ;;  %v880_v62 = vmul.f32 %v4125_v4, %v4125_v4  ;;  %v992_v19 = vsel %vm627_vm0, %v878_v50, 0.0  ;;  %v1000_v50 = vsel %vm627_vm0, %v882_v2, 0.0  ;;  %v4129_v2 = vld [vmem:[#allocation23_spill] sm:$0xff] }
 0x1fb   :  { %v987_v3 = vadd.f32 %v986_v33, %v985_v29  ;;  %v881_v29 = vmul.f32 %v4126_v59, %v4126_v59  ;;  %v994_v33 = vsel %vm627_vm0, %v879_v20, 0.0 }
 0x1fd   :  { %v989_v13 = vadd.f32 %v988_v21, %v987_v3  ;;  %v996_v3 = vsel %vm627_vm0, %v880_v62, 0.0  ;;  %v998_v23 = vsel %vm627_vm0, %v881_v29, 0.0  ;;  %v4127_v62 = vld [vmem:[#allocation12_spill] sm:$0xff] }
 0x1fe   :  { %v4128_v29 = vld [vmem:[#allocation16_spill] sm:$0xff] }
 0x1ff   :  { %v991_v26 = vadd.f32 %v990_v49, %v989_v13  ;;  %v883_v13 = vmul.f32 %v2597_v53, %v2597_v53 }
 0x201   :  { %v993_v32 = vadd.f32 %v992_v19, %v991_v26  ;;  %v884_v26 = vmul.f32 %v2601_v18, %v2601_v18  ;;  %v1002_v20 = vsel %vm627_vm0, %v883_v13, 0.0  ;;  %v4130_v13 = vld [vmem:[#allocation24_spill] sm:$0xff] }
 0x203   :  { %v995_v38 = vadd.f32 %v994_v33, %v993_v32  ;;  %v885_v32 = vmul.f32 %v2605_v30, %v2605_v30 }
 0x205   :  { %v997_v21 = vadd.f32 %v996_v3, %v995_v38  ;;  %v886_v38 = vmul.f32 %v4127_v62, %v4127_v62  ;;  %v1004_v3 = vsel %vm627_vm0, %v884_v26, 0.0  ;;  %v4131_v26 = vld [vmem:[#allocation25_spill] sm:$0xff] }
 0x207   :  { %v999_v49 = vadd.f32 %v998_v23, %v997_v21  ;;  %v887_v21 = vmul.f32 %v4128_v29, %v4128_v29  ;;  %v1006_v23 = vsel %vm627_vm0, %v885_v32, 0.0 }
 0x209   :  { %v1001_v19 = vadd.f32 %v1000_v50, %v999_v49  ;;  %v888_v49 = vmul.f32 %v4129_v2, %v4129_v2  ;;  %v1008_v50 = vsel %vm627_vm0, %v886_v38, 0.0 }
 0x20b   :  { %v1003_v33 = vadd.f32 %v1002_v20, %v1001_v19  ;;  %v889_v19 = vmul.f32 %v4130_v13, %v4130_v13  ;;  %v1010_v20 = vsel %vm627_vm0, %v887_v21, 0.0 }
 0x20d   :  { %v1005_v39 = vadd.f32 %v1004_v3, %v1003_v33  ;;  %v890_v33 = vmul.f32 %v4131_v26, %v4131_v26  ;;  %v1012_v3 = vsel %vm627_vm0, %v888_v49, 0.0 }
 0x20f   :  { %v1007_v59 = vadd.f32 %v1006_v23, %v1005_v39  ;;  %v1014_v39 = vsel %vm627_vm0, %v889_v19, 0.0  ;;  %v1016_v23 = vsel %vm627_vm0, %v890_v33, 0.0 }
 0x211   :  { %v1009_v30 = vadd.f32 %v1008_v50, %v1007_v59 }
 0x213   :  { %v1011_v62 = vadd.f32 %v1010_v20, %v1009_v30  ;;  %v1029_v20 = vlaneseq }
 0x215   :  { %v1013_v29 = vadd.f32 %v1012_v3, %v1011_v62  ;;  %v1030_v26 = vshrl.u32 %v1029_v20, 7  ;;  %v1027_v62 = vld [vmem:[%s3977_s2] sm:$0x1]  ;;  %v4132_v3 = vld [vmem:[#allocation19_spill] sm:$0xff] }
 0x216   :  { %v4137_v20 = vld [vmem:[#allocation3_spill] sm:$0xff] }
 0x217   :  { %v1015_v32 = vadd.f32 %v1014_v39, %v1013_v29  ;;  %v1031_v49 = vsub.s32 0, %v1030_v26  ;;  %v4133_v39 = vld [vmem:[#allocation20_spill] sm:$0xff] }
 0x219   :  { %v1017_v2 = vadd.f32 %v1016_v23, %v1015_v32  ;;  %v4135_v32 = vld [vmem:[#allocation22_spill] sm:$0xff] }
 0x21b   :  { %v1018_v38 = vrot.slane %v1017_v2, 4 }
 0x21d   :  { %v1019_v59 = vadd.f32 %v1018_v38, %v1017_v2 }
 0x21f   :  { %v1020_v50 = vrot.slane %v1019_v59, 2 }
 0x221   :  { %v1021_v18 = vadd.f32 %v1020_v50, %v1019_v59 }
 0x223   :  { %v1022_v13 = vrot.slane %v1021_v18, 1 }
 0x225   :  { %v1023_v53 = vadd.f32 %v1022_v13, %v1021_v18  ;;  %v4134_v18 = vld [vmem:[#allocation21_spill] sm:$0xff] }
 0x227   :  { %v1024_v21 = vmul.f32 0.001953125, %v1023_v53 }
 0x229   :  { %v1025_v30 = vadd.f32 1e-05, %v1024_v21 }
 0x22b   :  { %1966 = vrsqrt.f32 %v1025_v30  ;;  %v4136_v30 = vld [vmem:[#allocation2_spill] sm:$0xff] }
 0x235   :  { %v1967_v29 = vpop.eup %1966 }
 0x236   :  { %v1028_v19 = vmul.f32 %v1967_v29, %v1027_v62  ;;  %v4138_v29 = vld [vmem:[#allocation4_spill] sm:$0xff] }
 0x238   :  { %v2822_v33 = vrot.slane %v1028_v19, %v1031_v49  ;;  %v4139_v19 = vld [vmem:[#allocation6_spill] sm:$0xff] }
 0x23a   :  { %v2826_v2 = vmul.f32 %v2822_v33, %v4132_v3  ;;  %v2830_v53 = vmul.f32 %v2822_v33, %v4133_v39  ;;  %v2834_v13 = vmul.f32 %v2822_v33, %v4134_v18  ;;  %v2838_v23 = vmul.f32 %v2822_v33, %v4135_v32  ;;  %v4140_v3 = vld [vmem:[#allocation10_spill] sm:$0xff]  ;;  %v4142_v39 = vld [vmem:[#allocation13_spill] sm:$0xff] }
 0x23b   :  { %v2842_v26 = vmul.f32 %v2822_v33, %v2389_v9  ;;  %v2846_v38 = vmul.f32 %v2822_v33, %v2393_v42  ;;  %v2850_v59 = vmul.f32 %v2822_v33, %v2397_v46  ;;  %v2854_v50 = vmul.f32 %v2822_v33, %v2401_v40  ;;  %v3043_v32 = vld [vmem:[%s3978_s3] ss:$0 sm:$0xff] }
 0x23c   :  { %v2858_v21 = vmul.f32 %v2822_v33, %v2405_v44  ;;  %v2862_v9 = vmul.f32 %v2822_v33, %v2409_v56  ;;  %v2866_v42 = vmul.f32 %v2822_v33, %v2413_v63  ;;  %v2870_v46 = vmul.f32 %v2822_v33, %v2417_v54 }
 0x23d   :  { %v2874_v40 = vmul.f32 %v2822_v33, %v2421_v60  ;;  %v2878_v44 = vmul.f32 %v2822_v33, %v2425_v8  ;;  %v2882_v56 = vmul.f32 %v2822_v33, %v2429_v15  ;;  %v2886_v63 = vmul.f32 %v2822_v33, %v2433_v6 }
 0x23e   :  { %v2890_v54 = vmul.f32 %v2822_v33, %v2437_v12  ;;  %v2894_v60 = vmul.f32 %v2822_v33, %v2441_v24  ;;  %v2898_v8 = vmul.f32 %v2822_v33, %v2445_v31  ;;  %v2902_v15 = vmul.f32 %v2822_v33, %v2449_v22 }
 0x23f   :  { %v2906_v6 = vmul.f32 %v2822_v33, %v4136_v30  ;;  %v2910_v12 = vmul.f32 %v2822_v33, %v2457_v48  ;;  %v2914_v24 = vmul.f32 %v2822_v33, %v4137_v20  ;;  %v2918_v31 = vmul.f32 %v2822_v33, %v4121_v35  ;;  %v4146_v30 = vld [vmem:[#allocation17_spill] sm:$0xff] }
 0x240   :  { %v2922_v22 = vmul.f32 %v2822_v33, %v2469_v52  ;;  %v2926_v62 = vmul.f32 %v2822_v33, %v4122_v11  ;;  %v2930_v48 = vmul.f32 %v2822_v33, %v2477_v5  ;;  %v2934_v49 = vmul.f32 %v2822_v33, %v2481_v34 }
 0x241   :  { %v2938_v35 = vmul.f32 %v2822_v33, %v2485_v17  ;;  %v2942_v52 = vmul.f32 %v2822_v33, %v2489_v1  ;;  %v2946_v11 = vmul.f32 %v2822_v33, %v2493_v14  ;;  %v2950_v5 = vmul.f32 %v2822_v33, %v2497_v51 }
 0x242   :  { %v2954_v34 = vmul.f32 %v2822_v33, %v2501_v25  ;;  %v2958_v17 = vmul.f32 %v2822_v33, %v2505_v27  ;;  %v2962_v1 = vmul.f32 %v2822_v33, %v2509_v36  ;;  %v2966_v14 = vmul.f32 %v2822_v33, %v2513_v57 }
 0x243   :  { %v2970_v51 = vmul.f32 %v2822_v33, %v2517_v37  ;;  %v2974_v25 = vmul.f32 %v2822_v33, %v2521_v43  ;;  %v2978_v27 = vmul.f32 %v2822_v33, %v2525_v47  ;;  %v2982_v36 = vmul.f32 %v2822_v33, %v2529_v41 }
 0x244   :  { %v2986_v57 = vmul.f32 %v2822_v33, %v2533_v45  ;;  %v2990_v37 = vmul.f32 %v2822_v33, %v2537_v58  ;;  %v2994_v43 = vmul.f32 %v2822_v33, %v2541_v0  ;;  %v2998_v47 = vmul.f32 %v2822_v33, %v2545_v55 }
 0x245   :  { %v3002_v41 = vmul.f32 %v2822_v33, %v2549_v61  ;;  %v3006_v45 = vmul.f32 %v2822_v33, %v2553_v10  ;;  %v3010_v58 = vmul.f32 %v2822_v33, %v2557_v16  ;;  %v3014_v0 = vmul.f32 %v2822_v33, %v2561_v7 }
 0x246   :  { %v3018_v55 = vmul.f32 %v2822_v33, %v4138_v29  ;;  %v3022_v61 = vmul.f32 %v2822_v33, %v4139_v19  ;;  %v3026_v10 = vmul.f32 %v2822_v33, %v4140_v3  ;;  %v3030_v16 = vmul.f32 %v2822_v33, %v4142_v39  ;;  %v4148_v29 = vld [vmem:[#allocation14_spill] sm:$0xff]  ;;  %v4150_v3 = vld [vmem:[#allocation9_spill] sm:$0xff]  ;;  %v4152_v39 = vld [vmem:[#allocation12_spill] sm:$0xff] }
 0x247   :  { %v3034_v7 = vmul.f32 %v2822_v33, %v4124_v28  ;;  %v3038_v18 = vmul.f32 %v2822_v33, %v4125_v4  ;;  %v3047_v20 = vmul.f32 %v2822_v33, %v4146_v30  ;;  %v3051_v19 = vmul.f32 %v2822_v33, %v4148_v29 }
 0x248   :  { %4141 = vst [vmem:[#allocation5_spill] sm:$0xff] %v3026_v10  ;;  %4143 = vst [vmem:[#allocation7_spill] sm:$0xff] %v3030_v16  ;;  %v3055_v28 = vmul.f32 %v2822_v33, %v4150_v3  ;;  %v3059_v4 = vmul.f32 %v2822_v33, %v4152_v39  ;;  %v4155_v16 = vld [vmem:[#allocation23_spill] sm:$0xff] }
 0x249   :  { %4144 = vst [vmem:[#allocation8_spill] sm:$0xff] %v3034_v7  ;;  %4145 = vst [vmem:[#allocation11_spill] sm:$0xff] %v3038_v18  ;;  %v4154_v18 = vld [vmem:[#allocation16_spill] sm:$0xff]  ;;  %v3067_v30 = vmul.f32 %v2822_v33, %v4155_v16  ;;  %v3087_v16 = vadd.f32 %v3043_v32, %v2830_v53  ;;  %v3111_v53 = vadd.f32 %v3043_v32, %v2854_v50 }
 0x24a   :  { %4147 = vst [vmem:[#allocation19_spill] sm:$0xff] %v3047_v20  ;;  %4149 = vst [vmem:[#allocation20_spill] sm:$0xff] %v3051_v19  ;;  %v3063_v7 = vmul.f32 %v2822_v33, %v4154_v18  ;;  %v4156_v20 = vld [vmem:[#allocation24_spill] sm:$0xff]  ;;  %v4157_v19 = vld [vmem:[#allocation25_spill] sm:$0xff]  ;;  %v3083_v18 = vadd.f32 %v3043_v32, %v2826_v2  ;;  %v3107_v2 = vadd.f32 %v3043_v32, %v2850_v59 }
 0x24b   :  { %4151 = vst [vmem:[#allocation21_spill] sm:$0xff] %v3055_v28  ;;  %4153 = vst [vmem:[#allocation22_spill] sm:$0xff] %v3059_v4  ;;  %v3071_v29 = vmul.f32 %v2822_v33, %v4156_v20  ;;  %v3075_v3 = vmul.f32 %v2822_v33, %v4157_v19  ;;  %v4158_v28 = vld [vmem:[#allocation15_spill] sm:$0xff]  ;;  %v4159_v4 = vld [vmem:[#allocation18_spill] sm:$0xff]  ;;  %v3091_v20 = vadd.f32 %v3043_v32, %v2834_v13 }
 0x24c   :  { %v1087_v39 = vmul.f32 %v2822_v33, %v4158_v28  ;;  %v1088_v10 = vmul.f32 %v2822_v33, %v4159_v4  ;;  %v3095_v19 = vadd.f32 %v3043_v32, %v2838_v23  ;;  %v3099_v28 = vadd.f32 %v3043_v32, %v2842_v26 }
 0x24d   :  { %v3103_v33 = vadd.f32 %v3043_v32, %v2846_v38  ;;  %v3115_v13 = vadd.f32 %v3043_v32, %v2858_v21  ;;  %v3119_v23 = vadd.f32 %v3043_v32, %v2862_v9  ;;  %v3123_v26 = vadd.f32 %v3043_v32, %v2866_v42 }
 0x24e   :  { %v3127_v38 = vadd.f32 %v3043_v32, %v2870_v46  ;;  %v3131_v59 = vadd.f32 %v3043_v32, %v2874_v40  ;;  %v3135_v50 = vadd.f32 %v3043_v32, %v2878_v44  ;;  %v3139_v21 = vadd.f32 %v3043_v32, %v2882_v56 }
 0x24f   :  { %v3143_v9 = vadd.f32 %v3043_v32, %v2886_v63  ;;  %v3147_v42 = vadd.f32 %v3043_v32, %v2890_v54  ;;  %v3151_v46 = vadd.f32 %v3043_v32, %v2894_v60  ;;  %v3155_v40 = vadd.f32 %v3043_v32, %v2898_v8  ;;  %v4190_v4 = vld [vmem:[#allocation7_spill] sm:$0xff] }
 0x250   :  { %4160 = vst [vmem:[#allocation2_spill] sm:$0xff] %v3139_v21  ;;  %v3159_v44 = vadd.f32 %v3043_v32, %v2902_v15  ;;  %v3163_v56 = vadd.f32 %v3043_v32, %v2906_v6  ;;  %v3167_v63 = vadd.f32 %v3043_v32, %v2910_v12  ;;  %v3171_v54 = vadd.f32 %v3043_v32, %v2914_v24 }
 0x251   :  { %4161 = vst [vmem:[#allocation3_spill] sm:$0xff] %v3151_v46  ;;  %v3175_v60 = vadd.f32 %v3043_v32, %v2918_v31  ;;  %v3179_v8 = vadd.f32 %v3043_v32, %v2922_v22  ;;  %v3183_v15 = vadd.f32 %v3043_v32, %v2926_v62  ;;  %v3187_v6 = vadd.f32 %v3043_v32, %v2930_v48 }
 0x252   :  { %4162 = vst [vmem:[#allocation4_spill] sm:$0xff] %v3163_v56  ;;  %v3191_v12 = vadd.f32 %v3043_v32, %v2934_v49  ;;  %v3195_v24 = vadd.f32 %v3043_v32, %v2938_v35  ;;  %v3199_v31 = vadd.f32 %v3043_v32, %v2942_v52  ;;  %v3203_v22 = vadd.f32 %v3043_v32, %v2946_v11 }
 0x253   :  { %4163 = vst [vmem:[#allocation6_spill] sm:$0xff] %v3175_v60  ;;  %4164 = vst [vmem:[#allocation10_spill] sm:$0xff] %v3187_v6  ;;  %v3207_v62 = vadd.f32 %v3043_v32, %v2950_v5  ;;  %v3211_v48 = vadd.f32 %v3043_v32, %v2954_v34  ;;  %v3215_v49 = vadd.f32 %v3043_v32, %v2958_v17 }
 0x254   :  { %4165 = vst [vmem:[#allocation13_spill] sm:$0xff] %v3191_v12  ;;  %4166 = vst [vmem:[#allocation17_spill] sm:$0xff] %v3195_v24  ;;  %v3219_v35 = vadd.f32 %v3043_v32, %v2962_v1  ;;  %v3223_v52 = vadd.f32 %v3043_v32, %v2966_v14  ;;  %v3227_v11 = vadd.f32 %v3043_v32, %v2970_v51 }
 0x255   :  { %4167 = vst [vmem:[#allocation14_spill] sm:$0xff] %v3199_v31  ;;  %4168 = vst [vmem:[#allocation9_spill] sm:$0xff] %v3203_v22  ;;  %v3231_v5 = vadd.f32 %v3043_v32, %v2974_v25  ;;  %v3235_v34 = vadd.f32 %v3043_v32, %v2978_v27  ;;  %v3239_v17 = vadd.f32 %v3043_v32, %v2982_v36 }
 0x256   :  { %4169 = vst [vmem:[#allocation12_spill] sm:$0xff] %v3207_v62  ;;  %4170 = vst [vmem:[#allocation16_spill] sm:$0xff] %v3211_v48  ;;  %v3243_v1 = vadd.f32 %v3043_v32, %v2986_v57  ;;  %v3247_v14 = vadd.f32 %v3043_v32, %v2990_v37  ;;  %v3251_v51 = vadd.f32 %v3043_v32, %v2994_v43 }
 0x257   :  { %4171 = vst [vmem:[#allocation23_spill] sm:$0xff] %v3215_v49  ;;  %4172 = vst [vmem:[#allocation24_spill] sm:$0xff] %v3219_v35  ;;  %v3255_v25 = vadd.f32 %v3043_v32, %v2998_v47  ;;  %v3259_v27 = vadd.f32 %v3043_v32, %v3002_v41  ;;  %v3263_v36 = vadd.f32 %v3043_v32, %v3006_v45  ;;  %v4188_v41 = vld [vmem:[#allocation5_spill] sm:$0xff] }
 0x258   :  { %4173 = vst [vmem:[#allocation25_spill] sm:$0xff] %v3223_v52  ;;  %4174 = vst [vmem:[#allocation15_spill] sm:$0xff] %v3227_v11  ;;  %v3267_v57 = vadd.f32 %v3043_v32, %v3010_v58  ;;  %v3271_v37 = vadd.f32 %v3043_v32, %v3014_v0  ;;  %v3275_v43 = vadd.f32 %v3043_v32, %v3018_v55 }
 0x259   :  { %4175 = vst [vmem:[#allocation18_spill] sm:$0xff] %v3231_v5  ;;  %4176 = vst [vmem:[#allocation26_spill] sm:$0xff] %v3235_v34  ;;  %v3279_v47 = vadd.f32 %v3043_v32, %v3022_v61  ;;  %v3283_v45 = vadd.f32 %v3043_v32, %v4188_v41  ;;  %v3287_v58 = vadd.f32 %v3043_v32, %v4190_v4  ;;  %v4198_v41 = vld [vmem:[#allocation19_spill] sm:$0xff]  ;;  %v4200_v4 = vld [vmem:[#allocation20_spill] sm:$0xff] }
 0x25a   :  { %4177 = vst [vmem:[#allocation27_spill] sm:$0xff] %v3239_v17  ;;  %4178 = vst [vmem:[#allocation28_spill] sm:$0xff] %v3243_v1  ;;  %v3301_v61 = vadd.f32 %v3043_v32, %v1088_v10  ;;  %v3321_v10 = vadd.f32 %v3043_v32, %v3063_v7  ;;  %v1171_v7 = vmul.f32 0.2, %v3095_v19 }
 0x25b   :  { %4179 = vst [vmem:[#allocation29_spill] sm:$0xff] %v3247_v14  ;;  %4180 = vst [vmem:[#allocation30_spill] sm:$0xff] %v3251_v51 }
 0x25c   :  { %4181 = vst [vmem:[#allocation31_spill] sm:$0xff] %v3255_v25  ;;  %4182 = vst [vmem:[#allocation32_spill] sm:$0xff] %v3259_v27 }
 0x25d   :  { %4183 = vst [vmem:[#allocation33_spill] sm:$0xff] %v3263_v36  ;;  %4184 = vst [vmem:[#allocation34_spill] sm:$0xff] %v3267_v57  ;;  %v4192_v57 = vld [vmem:[#allocation8_spill] sm:$0xff]  ;;  %v3363_v36 = vmax.f32 %v3095_v19, %v1171_v7  ;;  %v1192_v19 = vmul.f32 0.2, %v3179_v8 }
 0x25e   :  { %4185 = vst [vmem:[#allocation35_spill] sm:$0xff] %v3271_v37  ;;  %4186 = vst [vmem:[#allocation36_spill] sm:$0xff] %v3275_v43  ;;  %v3291_v0 = vadd.f32 %v3043_v32, %v4192_v57  ;;  %v4194_v37 = vld [vmem:[#allocation11_spill] sm:$0xff]  ;;  %v3298_v43 = vadd.f32 %v3043_v32, %v1087_v39  ;;  %v4202_v57 = vld [vmem:[#allocation21_spill] sm:$0xff]  ;;  %v3325_v39 = vadd.f32 %v3043_v32, %v3067_v30  ;;  %v1173_v30 = vmul.f32 0.2, %v3103_v33 }
 0x25f   :  { %4187 = vst [vmem:[#allocation37_spill] sm:$0xff] %v3279_v47  ;;  %4189 = vst [vmem:[#allocation5_spill] sm:$0xff] %v3283_v45  ;;  %v3295_v55 = vadd.f32 %v3043_v32, %v4194_v37  ;;  %v3305_v45 = vadd.f32 %v3043_v32, %v4198_v41  ;;  %v4204_v37 = vld [vmem:[#allocation22_spill] sm:$0xff]  ;;  %v3329_v41 = vadd.f32 %v3043_v32, %v3071_v29  ;;  %v1175_v29 = vmul.f32 0.2, %v3111_v53 }
 0x260   :  { %4191 = vst [vmem:[#allocation7_spill] sm:$0xff] %v3287_v58  ;;  %4193 = vst [vmem:[#allocation8_spill] sm:$0xff] %v3291_v0  ;;  %v3309_v58 = vadd.f32 %v3043_v32, %v4200_v4  ;;  %v3313_v0 = vadd.f32 %v3043_v32, %v4202_v57  ;;  %v1168_v4 = vmul.f32 0.2, %v3083_v18  ;;  %v1169_v57 = vmul.f32 0.2, %v3087_v16 }
 0x261   :  { %4195 = vst [vmem:[#allocation11_spill] sm:$0xff] %v3295_v55  ;;  %4196 = vst [vmem:[#allocation38_spill] sm:$0xff] %v3298_v43  ;;  %v3317_v55 = vadd.f32 %v3043_v32, %v4204_v37  ;;  %v3336_v37 = vadd.f32 %v3043_v32, %v3075_v3  ;;  %v1178_v32 = vmul.f32 0.2, %v3123_v26  ;;  %v1179_v3 = vmul.f32 0.2, %v3127_v38 }
 0x262   :  { %4197 = vst [vmem:[#allocation39_spill] sm:$0xff] %v3301_v61  ;;  %4199 = vst [vmem:[#allocation19_spill] sm:$0xff] %v3305_v45  ;;  %v1180_v45 = vmul.f32 0.2, %v3131_v59  ;;  %v1181_v61 = vmul.f32 0.2, %v3135_v50 }
 0x263   :  { %4201 = vst [vmem:[#allocation20_spill] sm:$0xff] %v3309_v58  ;;  %4203 = vst [vmem:[#allocation21_spill] sm:$0xff] %v3313_v0  ;;  %v1170_v0 = vmul.f32 0.2, %v3091_v20  ;;  %v1177_v58 = vmul.f32 0.2, %v3119_v23 }
 0x264   :  { %4205 = vst [vmem:[#allocation22_spill] sm:$0xff] %v3317_v55  ;;  %4206 = vst [vmem:[#allocation40_spill] sm:$0xff] %v3321_v10  ;;  %v1172_v10 = vmul.f32 0.2, %v3099_v28  ;;  %v3345_v55 = vmax.f32 %v3083_v18, %v1168_v4  ;;  %v1182_v43 = vmul.f32 0.2, %v3139_v21 }
 0x265   :  { %4207 = vst [vmem:[#allocation41_spill] sm:$0xff] %v3325_v39  ;;  %4208 = vst [vmem:[#allocation42_spill] sm:$0xff] %v3329_v41  ;;  %v1174_v39 = vmul.f32 0.2, %v3107_v2  ;;  %v1176_v41 = vmul.f32 0.2, %v3115_v13  ;;  %v3357_v47 = vmax.f32 %v3091_v20, %v1170_v0 }
 0x266   :  { %4209 = vst [vmem:[#allocation43_spill] sm:$0xff] %v3336_v37  ;;  %4210 = vst [vmem:[#allocation44_spill] sm:$0xff] %v3345_v55  ;;  %v3351_v37 = vmax.f32 %v3087_v16, %v1169_v57  ;;  %v1183_v18 = vmul.f32 0.2, %v3143_v9  ;;  %v1184_v4 = vmul.f32 0.2, %v3147_v42  ;;  %v3369_v21 = vmax.f32 %v3099_v28, %v1172_v10 }
 0x267   :  { %4212 = vst [vmem:[#allocation46_spill] sm:$0xff] %v3357_v47  ;;  %v1185_v55 = vmul.f32 0.2, %v3151_v46  ;;  %4213 = vst [vmem:[#allocation47_spill] sm:$0xff] %v3363_v36  ;;  %v1186_v16 = vmul.f32 0.2, %v3155_v40  ;;  %v3375_v46 = vmax.f32 %v3103_v33, %v1173_v30 }
 0x268   :  { %4211 = vst [vmem:[#allocation45_spill] sm:$0xff] %v3351_v37  ;;  %v1187_v57 = vmul.f32 0.2, %v3159_v44  ;;  %v1188_v37 = vmul.f32 0.2, %v3163_v56  ;;  %4214 = vst [vmem:[#allocation48_spill] sm:$0xff] %v3369_v21  ;;  %v3381_v56 = vmax.f32 %v3107_v2, %v1174_v39 }
 0x269   :  { %v1189_v20 = vmul.f32 0.2, %v3167_v63  ;;  %v1190_v0 = vmul.f32 0.2, %v3171_v54  ;;  %v1191_v47 = vmul.f32 0.2, %v3175_v60  ;;  %v3387_v60 = vmax.f32 %v3111_v53, %v1175_v29 }
 0x26a   :  { %4215 = vst [vmem:[#allocation49_spill] sm:$0xff] %v3375_v46  ;;  %v1193_v7 = vmul.f32 0.2, %v3183_v15  ;;  %v1194_v36 = vmul.f32 0.2, %v3187_v6  ;;  %4216 = vst [vmem:[#allocation50_spill] sm:$0xff] %v3381_v56  ;;  %v3393_v6 = vmax.f32 %v3115_v13, %v1176_v41 }
 0x26b   :  { %v1195_v28 = vmul.f32 0.2, %v3191_v12  ;;  %v1196_v10 = vmul.f32 0.2, %v3195_v24  ;;  %v1197_v21 = vmul.f32 0.2, %v3199_v31  ;;  %v3399_v31 = vmax.f32 %v3119_v23, %v1177_v58 }
 0x26c   :  { %4217 = vst [vmem:[#allocation51_spill] sm:$0xff] %v3387_v60  ;;  %v1198_v33 = vmul.f32 0.2, %v3203_v22  ;;  %v1199_v30 = vmul.f32 0.2, %v3207_v62  ;;  %4218 = vst [vmem:[#allocation52_spill] sm:$0xff] %v3393_v6 }
 0x26d   :  { %v1200_v46 = vmul.f32 0.2, %v3211_v48  ;;  %v1201_v2 = vmul.f32 0.2, %v3215_v49  ;;  %v1202_v39 = vmul.f32 0.2, %v3219_v35  ;;  %v3405_v48 = vmax.f32 %v3123_v26, %v1178_v32 }
 0x26e   :  { %v1203_v56 = vmul.f32 0.2, %v3223_v52  ;;  %4219 = vst [vmem:[#allocation53_spill] sm:$0xff] %v3399_v31  ;;  %v1204_v53 = vmul.f32 0.2, %v3227_v11  ;;  %v3411_v52 = vmax.f32 %v3127_v38, %v1179_v3  ;;  %v4223_v26 = vld [vmem:[#allocation33_spill] sm:$0xff] }
 0x26f   :  { %v1205_v29 = vmul.f32 0.2, %v3231_v5  ;;  %v1206_v60 = vmul.f32 0.2, %v3235_v34  ;;  %4220 = vst [vmem:[#allocation54_spill] sm:$0xff] %v3405_v48  ;;  %v3417_v34 = vmax.f32 %v3131_v59, %v1180_v45  ;;  %v4224_v48 = vld [vmem:[#allocation34_spill] sm:$0xff] }
 0x270   :  { %v1207_v13 = vmul.f32 0.2, %v3239_v17  ;;  %v1208_v41 = vmul.f32 0.2, %v3243_v1  ;;  %v1209_v6 = vmul.f32 0.2, %v3247_v14  ;;  %v3423_v14 = vmax.f32 %v3135_v50, %v1181_v61 }
 0x271   :  { %4221 = vst [vmem:[#allocation55_spill] sm:$0xff] %v3411_v52  ;;  %v1210_v23 = vmul.f32 0.2, %v3251_v51  ;;  %v1211_v58 = vmul.f32 0.2, %v3255_v25  ;;  %4222 = vst [vmem:[#allocation56_spill] sm:$0xff] %v3417_v34 }
 0x272   :  { %v1212_v31 = vmul.f32 0.2, %v3259_v27  ;;  %v1213_v32 = vmul.f32 0.2, %v4223_v26  ;;  %v1214_v17 = vmul.f32 0.2, %v4224_v48 }
 0x273   :  { %v4225_v5 = vld [vmem:[#allocation35_spill] sm:$0xff]  ;;  %4226 = vst [vmem:[#allocation57_spill] sm:$0xff] %v3423_v14  ;;  %v4227_v38 = vld [vmem:[#allocation36_spill] sm:$0xff]  ;;  %v4228_v52 = vld [vmem:[#allocation37_spill] sm:$0xff] }
 0x274   :  { %v1215_v1 = vmul.f32 0.2, %v4225_v5  ;;  %v1216_v3 = vmul.f32 0.2, %v4227_v38  ;;  %v1217_v51 = vmul.f32 0.2, %v4228_v52  ;;  %v3435_v5 = vmax.f32 %v3143_v9, %v1183_v18 }
 0x275   :  { %v4229_v11 = vld [vmem:[#allocation5_spill] sm:$0xff]  ;;  %v4230_v35 = vld [vmem:[#allocation2_spill] sm:$0xff]  ;;  %v4232_v59 = vld [vmem:[#allocation7_spill] sm:$0xff] }
 0x276   :  { %v1218_v25 = vmul.f32 0.2, %v4229_v11  ;;  %v3429_v27 = vmax.f32 %v4230_v35, %v1182_v43  ;;  %v1219_v45 = vmul.f32 0.2, %v4232_v59  ;;  %v4233_v34 = vld [vmem:[#allocation8_spill] sm:$0xff]  ;;  %v4234_v49 = vld [vmem:[#allocation11_spill] sm:$0xff]  ;;  %v3441_v11 = vmax.f32 %v3147_v42, %v1184_v4 }
 0x277   :  { %v1220_v26 = vmul.f32 0.2, %v4233_v34  ;;  %v1221_v48 = vmul.f32 0.2, %v4234_v49  ;;  %4235 = vst [vmem:[#allocation58_spill] sm:$0xff] %v3435_v5  ;;  %v4236_v50 = vld [vmem:[#allocation38_spill] sm:$0xff] }
 0x278   :  { %4231 = vst [vmem:[#allocation2_spill] sm:$0xff] %v3429_v27  ;;  %v1222_v61 = vmul.f32 0.2, %v4236_v50  ;;  %v4237_v14 = vld [vmem:[#allocation39_spill] sm:$0xff]  ;;  %4239 = vst [vmem:[#allocation59_spill] sm:$0xff] %v3441_v11  ;;  %v4240_v35 = vld [vmem:[#allocation20_spill] sm:$0xff]  ;;  %v3457_v11 = vmax.f32 %v3159_v44, %v1187_v57 }
 0x279   :  { %v1223_v38 = vmul.f32 0.2, %v4237_v14  ;;  %v4238_v62 = vld [vmem:[#allocation19_spill] sm:$0xff]  ;;  %v1225_v43 = vmul.f32 0.2, %v4240_v35  ;;  %v4241_v27 = vld [vmem:[#allocation21_spill] sm:$0xff] }
 0x27a   :  { %v1224_v52 = vmul.f32 0.2, %v4238_v62  ;;  %v1226_v59 = vmul.f32 0.2, %v4241_v27  ;;  %v4242_v22 = vld [vmem:[#allocation22_spill] sm:$0xff]  ;;  %v4243_v24 = vld [vmem:[#allocation3_spill] sm:$0xff]  ;;  %v3453_v62 = vmax.f32 %v3155_v40, %v1186_v16  ;;  %v3472_v40 = vmax.f32 %v3179_v8, %v1192_v19 }
 0x27b   :  { %v1227_v34 = vmul.f32 0.2, %v4242_v22  ;;  %v3447_v49 = vmax.f32 %v4243_v24, %v1185_v55  ;;  %v4245_v9 = vld [vmem:[#allocation40_spill] sm:$0xff]  ;;  %v4246_v5 = vld [vmem:[#allocation41_spill] sm:$0xff]  ;;  %v4247_v12 = vld [vmem:[#allocation42_spill] sm:$0xff]  ;;  %v3463_v24 = vmax.f32 %v3167_v63, %v1189_v20  ;;  %v3466_v55 = vmax.f32 %v3171_v54, %v1190_v0 }
 0x27c   :  { %v1228_v18 = vmul.f32 0.2, %v4245_v9  ;;  %v1229_v50 = vmul.f32 0.2, %v4246_v5  ;;  %v1230_v14 = vmul.f32 0.2, %v4247_v12  ;;  %v3475_v16 = vmax.f32 %v3183_v15, %v1193_v7 }
 0x27d   :  { %4244 = vst [vmem:[#allocation22_spill] sm:$0xff] %v3447_v49  ;;  %v4248_v42 = vld [vmem:[#allocation43_spill] sm:$0xff]  ;;  %v4249_v27 = vld [vmem:[#allocation4_spill] sm:$0xff]  ;;  %v4250_v49 = vld [vmem:[#allocation6_spill] sm:$0xff] }
 0x27e   :  { %v1231_v4 = vmul.f32 0.2, %v4248_v42  ;;  %v3460_v35 = vmax.f32 %v4249_v27, %v1188_v37  ;;  %v3469_v5 = vmax.f32 %v4250_v49, %v1191_v47  ;;  %v4251_v44 = vld [vmem:[#allocation10_spill] sm:$0xff]  ;;  %v4252_v27 = vld [vmem:[#allocation13_spill] sm:$0xff]  ;;  %v4256_v8 = vld [vmem:[#allocation12_spill] sm:$0xff] }
 0x27f   :  { %v3478_v57 = vmax.f32 %v4251_v44, %v1194_v36  ;;  %v3481_v37 = vmax.f32 %v4252_v27, %v1195_v28  ;;  %v4253_v63 = vld [vmem:[#allocation17_spill] sm:$0xff]  ;;  %v4254_v54 = vld [vmem:[#allocation14_spill] sm:$0xff]  ;;  %v3493_v19 = vmax.f32 %v4256_v8, %v1199_v30  ;;  %v4257_v15 = vld [vmem:[#allocation16_spill] sm:$0xff] }
 0x280   :  { %v3484_v20 = vmax.f32 %v4253_v63, %v1196_v10  ;;  %v3487_v0 = vmax.f32 %v4254_v54, %v1197_v21  ;;  %v4255_v49 = vld [vmem:[#allocation9_spill] sm:$0xff]  ;;  %v3496_v7 = vmax.f32 %v4257_v15, %v1200_v46  ;;  %v4258_v36 = vld [vmem:[#allocation23_spill] sm:$0xff]  ;;  %v4259_v28 = vld [vmem:[#allocation24_spill] sm:$0xff] }
 0x281   :  { %v3490_v47 = vmax.f32 %v4255_v49, %v1198_v33  ;;  %v3499_v44 = vmax.f32 %v4258_v36, %v1201_v2  ;;  %v3502_v27 = vmax.f32 %v4259_v28, %v1202_v39  ;;  %v4260_v10 = vld [vmem:[#allocation25_spill] sm:$0xff]  ;;  %v4261_v21 = vld [vmem:[#allocation15_spill] sm:$0xff]  ;;  %v4262_v33 = vld [vmem:[#allocation18_spill] sm:$0xff] }
 0x282   :  { %v3505_v63 = vmax.f32 %v4260_v10, %v1203_v56  ;;  %v3508_v54 = vmax.f32 %v4261_v21, %v1204_v53  ;;  %v3511_v49 = vmax.f32 %v4262_v33, %v1205_v29  ;;  %v4263_v30 = vld [vmem:[#allocation26_spill] sm:$0xff]  ;;  %v4264_v46 = vld [vmem:[#allocation27_spill] sm:$0xff]  ;;  %v4265_v2 = vld [vmem:[#allocation28_spill] sm:$0xff] }
 0x283   :  { %v3514_v8 = vmax.f32 %v4263_v30, %v1206_v60  ;;  %v3517_v15 = vmax.f32 %v4264_v46, %v1207_v13  ;;  %v3520_v36 = vmax.f32 %v4265_v2, %v1208_v41  ;;  %v4266_v39 = vld [vmem:[#allocation29_spill] sm:$0xff]  ;;  %v4267_v56 = vld [vmem:[#allocation30_spill] sm:$0xff]  ;;  %v4268_v53 = vld [vmem:[#allocation31_spill] sm:$0xff] }
 0x284   :  { %v3523_v28 = vmax.f32 %v4266_v39, %v1209_v6  ;;  %v3526_v10 = vmax.f32 %v4267_v56, %v1210_v23  ;;  %v3529_v21 = vmax.f32 %v4268_v53, %v1211_v58  ;;  %v4269_v29 = vld [vmem:[#allocation32_spill] sm:$0xff]  ;;  %v4270_v60 = vld [vmem:[#allocation33_spill] sm:$0xff]  ;;  %v4271_v13 = vld [vmem:[#allocation34_spill] sm:$0xff] }
 0x285   :  { %v3532_v33 = vmax.f32 %v4269_v29, %v1212_v31  ;;  %v3535_v30 = vmax.f32 %v4270_v60, %v1213_v32  ;;  %v3538_v46 = vmax.f32 %v4271_v13, %v1214_v17  ;;  %v4272_v41 = vld [vmem:[#allocation35_spill] sm:$0xff]  ;;  %v4273_v6 = vld [vmem:[#allocation36_spill] sm:$0xff]  ;;  %v4274_v23 = vld [vmem:[#allocation37_spill] sm:$0xff] }
 0x286   :  { %v3541_v2 = vmax.f32 %v4272_v41, %v1215_v1  ;;  %v3544_v39 = vmax.f32 %v4273_v6, %v1216_v3  ;;  %v3547_v56 = vmax.f32 %v4274_v23, %v1217_v51  ;;  %v4275_v58 = vld [vmem:[#allocation5_spill] sm:$0xff]  ;;  %v4276_v31 = vld [vmem:[#allocation7_spill] sm:$0xff]  ;;  %v4277_v32 = vld [vmem:[#allocation8_spill] sm:$0xff] }
 0x287   :  { %v3550_v53 = vmax.f32 %v4275_v58, %v1218_v25  ;;  %v3553_v29 = vmax.f32 %v4276_v31, %v1219_v45  ;;  %v3556_v60 = vmax.f32 %v4277_v32, %v1220_v26  ;;  %v4278_v17 = vld [vmem:[#allocation11_spill] sm:$0xff]  ;;  %v4279_v1 = vld [vmem:[#allocation38_spill] sm:$0xff]  ;;  %v4282_v25 = vld [vmem:[#allocation20_spill] sm:$0xff]  ;;  %v3577_v26 = vmax.f32 %v4242_v22, %v1227_v34 }
 0x288   :  { %v3559_v13 = vmax.f32 %v4278_v17, %v1221_v48  ;;  %v3562_v41 = vmax.f32 %v4279_v1, %v1222_v61  ;;  %v4280_v3 = vld [vmem:[#allocation39_spill] sm:$0xff]  ;;  %v3571_v58 = vmax.f32 %v4282_v25, %v1225_v43  ;;  %v4283_v45 = vld [vmem:[#allocation21_spill] sm:$0xff]  ;;  %v3580_v48 = vmax.f32 %v4245_v9, %v1228_v18  ;;  %v4285_v43 = vld [vmem:[#allocation44_spill] sm:$0xff] }
 0x289   :  { %v3565_v6 = vmax.f32 %v4280_v3, %v1223_v38  ;;  %v4281_v51 = vld [vmem:[#allocation19_spill] sm:$0xff]  ;;  %v3574_v31 = vmax.f32 %v4283_v45, %v1226_v59  ;;  %v4284_v61 = vld [vmem:[#allocation41_spill] sm:$0xff]  ;;  %v3586_v38 = vmax.f32 %v4247_v12, %v1230_v14  ;;  %v1726_v17 = vpack.c.bf16 %v4285_v43, %v4285_v43  ;;  %v4287_v22 = vld [vmem:[#allocation46_spill] sm:$0xff] }
 0x28a   :  { %v3568_v23 = vmax.f32 %v4281_v51, %v1224_v52  ;;  %v3583_v32 = vmax.f32 %v4284_v61, %v1229_v50  ;;  %v3589_v52 = vmax.f32 %v4248_v42, %v1231_v4  ;;  %v4286_v59 = vld [vmem:[#allocation45_spill] sm:$0xff]  ;;  %v1728_v34 = vpack.c.bf16 %v4287_v22, %v4287_v22  ;;  %v4288_v9 = vld [vmem:[#allocation47_spill] sm:$0xff]  ;;  %v4289_v50 = vld [vmem:[#allocation48_spill] sm:$0xff] }
 0x28b   :  { %v1727_v1 = vpack.c.bf16 %v4286_v59, %v4286_v59  ;;  %v1729_v18 = vpack.c.bf16 %v4288_v9, %v4288_v9  ;;  %v1730_v3 = vpack.c.bf16 %v4289_v50, %v4289_v50  ;;  %v4290_v12 = vld [vmem:[#allocation49_spill] sm:$0xff]  ;;  %v4291_v42 = vld [vmem:[#allocation50_spill] sm:$0xff]  ;;  %v4292_v51 = vld [vmem:[#allocation51_spill] sm:$0xff]  ;;  %1553 = vst.msk [vmem:[%s3979_s4] sm:$0xf] %vm1552_vm1, %v1726_v17 }
 0x28c   :  { %v1731_v14 = vpack.c.bf16 %v4290_v12, %v4290_v12  ;;  %v1732_v4 = vpack.c.bf16 %v4291_v42, %v4291_v42  ;;  %v1733_v25 = vpack.c.bf16 %v4292_v51, %v4292_v51  ;;  %v4293_v45 = vld [vmem:[#allocation52_spill] sm:$0xff]  ;;  %v4294_v43 = vld [vmem:[#allocation53_spill] sm:$0xff]  ;;  %v4295_v22 = vld [vmem:[#allocation54_spill] sm:$0xff]  ;;  %1555 = vst.msk [vmem:[%s3979_s4 + $0x8] sm:$0xf] %vm1552_vm1, %v1728_v34 }
 0x28d   :  { %v1734_v61 = vpack.c.bf16 %v4293_v45, %v4293_v45  ;;  %v1735_v59 = vpack.c.bf16 %v4294_v43, %v4294_v43  ;;  %1554 = vst.msk [vmem:[%s3979_s4 + $0x4] sm:$0xf] %vm1552_vm1, %v1727_v1  ;;  %v1736_v9 = vpack.c.bf16 %v4295_v22, %v4295_v22  ;;  %v4296_v50 = vld [vmem:[#allocation55_spill] sm:$0xff]  ;;  %v4297_v42 = vld [vmem:[#allocation56_spill] sm:$0xff]  ;;  %v4298_v45 = vld [vmem:[#allocation57_spill] sm:$0xff] }
 0x28e   :  { %v1737_v12 = vpack.c.bf16 %v4296_v50, %v4296_v50  ;;  %v1738_v51 = vpack.c.bf16 %v4297_v42, %v4297_v42  ;;  %v1739_v43 = vpack.c.bf16 %v4298_v45, %v4298_v45  ;;  %1556 = vst.msk [vmem:[%s3979_s4 + $0xc] sm:$0xf] %vm1552_vm1, %v1729_v18  ;;  %1557 = vst.msk [vmem:[%s3979_s4 + $0x10] sm:$0xf] %vm1552_vm1, %v1730_v3  ;;  %v4299_v17 = vld [vmem:[#allocation2_spill] sm:$0xff]  ;;  %v4301_v50 = vld [vmem:[#allocation59_spill] sm:$0xff] }
 0x28f   :  { %1558 = vst.msk [vmem:[%s3979_s4 + $0x14] sm:$0xf] %vm1552_vm1, %v1731_v14  ;;  %v1740_v1 = vpack.c.bf16 %v4299_v17, %v4299_v17  ;;  %v4300_v22 = vld [vmem:[#allocation58_spill] sm:$0xff]  ;;  %v1742_v42 = vpack.c.bf16 %v4301_v50, %v4301_v50  ;;  %1559 = vst.msk [vmem:[%s3979_s4 + $0x18] sm:$0xf] %vm1552_vm1, %v1732_v4  ;;  %v1744_v3 = vpack.c.bf16 %v3453_v62, %v3453_v62 }
 0x290   :  { %v1741_v34 = vpack.c.bf16 %v4300_v22, %v4300_v22  ;;  %v4302_v18 = vld [vmem:[#allocation22_spill] sm:$0xff]  ;;  %1560 = vst.msk [vmem:[%s3979_s4 + $0x1c] sm:$0xf] %vm1552_vm1, %v1733_v25  ;;  %1561 = vst.msk [vmem:[%s3979_s4 + $0x20] sm:$0xf] %vm1552_vm1, %v1734_v61  ;;  %v1745_v14 = vpack.c.bf16 %v3457_v11, %v3457_v11  ;;  %v1746_v4 = vpack.c.bf16 %v3460_v35, %v3460_v35 }
 0x291   :  { %v1743_v45 = vpack.c.bf16 %v4302_v18, %v4302_v18  ;;  %1562 = vst.msk [vmem:[%s3979_s4 + $0x24] sm:$0xf] %vm1552_vm1, %v1735_v59  ;;  %v1747_v25 = vpack.c.bf16 %v3463_v24, %v3463_v24  ;;  %1563 = vst.msk [vmem:[%s3979_s4 + $0x28] sm:$0xf] %vm1552_vm1, %v1736_v9  ;;  %v1748_v62 = vpack.c.bf16 %v3466_v55, %v3466_v55 }
 0x292   :  { %1564 = vst.msk [vmem:[%s3979_s4 + $0x2c] sm:$0xf] %vm1552_vm1, %v1737_v12  ;;  %1565 = vst.msk [vmem:[%s3979_s4 + $0x30] sm:$0xf] %vm1552_vm1, %v1738_v51  ;;  %v1749_v11 = vpack.c.bf16 %v3469_v5, %v3469_v5  ;;  %v1750_v35 = vpack.c.bf16 %v3472_v40, %v3472_v40  ;;  %v1751_v24 = vpack.c.bf16 %v3475_v16, %v3475_v16 }
 0x293   :  { %1566 = vst.msk [vmem:[%s3979_s4 + $0x34] sm:$0xf] %vm1552_vm1, %v1739_v43  ;;  %1567 = vst.msk [vmem:[%s3979_s4 + $0x38] sm:$0xf] %vm1552_vm1, %v1740_v1  ;;  %v1752_v5 = vpack.c.bf16 %v3478_v57, %v3478_v57  ;;  %v1753_v55 = vpack.c.bf16 %v3481_v37, %v3481_v37  ;;  %v1754_v40 = vpack.c.bf16 %v3484_v20, %v3484_v20 }
 0x294   :  { %1568 = vst.msk [vmem:[%s3979_s4 + $0x3c] sm:$0xf] %vm1552_vm1, %v1741_v34  ;;  %1569 = vst.msk [vmem:[%s3979_s4 + $0x40] sm:$0xf] %vm1552_vm1, %v1742_v42  ;;  %v1755_v16 = vpack.c.bf16 %v3487_v0, %v3487_v0  ;;  %v1756_v57 = vpack.c.bf16 %v3490_v47, %v3490_v47  ;;  %v1757_v37 = vpack.c.bf16 %v3493_v19, %v3493_v19 }
 0x295   :  { %1570 = vst.msk [vmem:[%s3979_s4 + $0x44] sm:$0xf] %vm1552_vm1, %v1743_v45  ;;  %1571 = vst.msk [vmem:[%s3979_s4 + $0x48] sm:$0xf] %vm1552_vm1, %v1744_v3  ;;  %v1758_v20 = vpack.c.bf16 %v3496_v7, %v3496_v7  ;;  %v1759_v0 = vpack.c.bf16 %v3499_v44, %v3499_v44  ;;  %v1760_v47 = vpack.c.bf16 %v3502_v27, %v3502_v27 }
 0x296   :  { %1572 = vst.msk [vmem:[%s3979_s4 + $0x4c] sm:$0xf] %vm1552_vm1, %v1745_v14  ;;  %1573 = vst.msk [vmem:[%s3979_s4 + $0x50] sm:$0xf] %vm1552_vm1, %v1746_v4  ;;  %v1761_v19 = vpack.c.bf16 %v3505_v63, %v3505_v63  ;;  %v1762_v7 = vpack.c.bf16 %v3508_v54, %v3508_v54  ;;  %v1763_v44 = vpack.c.bf16 %v3511_v49, %v3511_v49 }
 0x297   :  { %1574 = vst.msk [vmem:[%s3979_s4 + $0x54] sm:$0xf] %vm1552_vm1, %v1747_v25  ;;  %1575 = vst.msk [vmem:[%s3979_s4 + $0x58] sm:$0xf] %vm1552_vm1, %v1748_v62  ;;  %v1764_v27 = vpack.c.bf16 %v3514_v8, %v3514_v8  ;;  %v1765_v63 = vpack.c.bf16 %v3517_v15, %v3517_v15  ;;  %v1766_v54 = vpack.c.bf16 %v3520_v36, %v3520_v36 }
 0x298   :  { %1576 = vst.msk [vmem:[%s3979_s4 + $0x5c] sm:$0xf] %vm1552_vm1, %v1749_v11  ;;  %1577 = vst.msk [vmem:[%s3979_s4 + $0x60] sm:$0xf] %vm1552_vm1, %v1750_v35  ;;  %v1767_v49 = vpack.c.bf16 %v3523_v28, %v3523_v28  ;;  %v1768_v8 = vpack.c.bf16 %v3526_v10, %v3526_v10  ;;  %v1769_v15 = vpack.c.bf16 %v3529_v21, %v3529_v21 }
 0x299   :  { %1578 = vst.msk [vmem:[%s3979_s4 + $0x64] sm:$0xf] %vm1552_vm1, %v1751_v24  ;;  %1579 = vst.msk [vmem:[%s3979_s4 + $0x68] sm:$0xf] %vm1552_vm1, %v1752_v5  ;;  %v1770_v36 = vpack.c.bf16 %v3532_v33, %v3532_v33  ;;  %v1771_v28 = vpack.c.bf16 %v3535_v30, %v3535_v30  ;;  %v1772_v10 = vpack.c.bf16 %v3538_v46, %v3538_v46 }
 0x29a   :  { %1580 = vst.msk [vmem:[%s3979_s4 + $0x6c] sm:$0xf] %vm1552_vm1, %v1753_v55  ;;  %1581 = vst.msk [vmem:[%s3979_s4 + $0x70] sm:$0xf] %vm1552_vm1, %v1754_v40  ;;  %v1773_v21 = vpack.c.bf16 %v3541_v2, %v3541_v2  ;;  %v1774_v33 = vpack.c.bf16 %v3544_v39, %v3544_v39  ;;  %v1775_v30 = vpack.c.bf16 %v3547_v56, %v3547_v56 }
 0x29b   :  { %1582 = vst.msk [vmem:[%s3979_s4 + $0x74] sm:$0xf] %vm1552_vm1, %v1755_v16  ;;  %1583 = vst.msk [vmem:[%s3979_s4 + $0x78] sm:$0xf] %vm1552_vm1, %v1756_v57  ;;  %v1776_v46 = vpack.c.bf16 %v3550_v53, %v3550_v53  ;;  %v1777_v2 = vpack.c.bf16 %v3553_v29, %v3553_v29  ;;  %v1778_v39 = vpack.c.bf16 %v3556_v60, %v3556_v60 }
 0x29c   :  { %1584 = vst.msk [vmem:[%s3979_s4 + $0x7c] sm:$0xf] %vm1552_vm1, %v1757_v37  ;;  %1585 = vst.msk [vmem:[%s3979_s4 + $0x80] sm:$0xf] %vm1552_vm1, %v1758_v20  ;;  %v1779_v56 = vpack.c.bf16 %v3559_v13, %v3559_v13  ;;  %v1780_v53 = vpack.c.bf16 %v3562_v41, %v3562_v41  ;;  %v1781_v29 = vpack.c.bf16 %v3565_v6, %v3565_v6 }
 0x29d   :  { %1586 = vst.msk [vmem:[%s3979_s4 + $0x84] sm:$0xf] %vm1552_vm1, %v1759_v0  ;;  %1587 = vst.msk [vmem:[%s3979_s4 + $0x88] sm:$0xf] %vm1552_vm1, %v1760_v47  ;;  %v1782_v60 = vpack.c.bf16 %v3568_v23, %v3568_v23  ;;  %v1783_v13 = vpack.c.bf16 %v3571_v58, %v3571_v58  ;;  %v1784_v41 = vpack.c.bf16 %v3574_v31, %v3574_v31 }
 0x29e   :  { %1588 = vst.msk [vmem:[%s3979_s4 + $0x8c] sm:$0xf] %vm1552_vm1, %v1761_v19  ;;  %1589 = vst.msk [vmem:[%s3979_s4 + $0x90] sm:$0xf] %vm1552_vm1, %v1762_v7  ;;  %v1785_v6 = vpack.c.bf16 %v3577_v26, %v3577_v26  ;;  %v1786_v23 = vpack.c.bf16 %v3580_v48, %v3580_v48  ;;  %v1787_v58 = vpack.c.bf16 %v3583_v32, %v3583_v32 }
 0x29f   :  { %1590 = vst.msk [vmem:[%s3979_s4 + $0x94] sm:$0xf] %vm1552_vm1, %v1763_v44  ;;  %1591 = vst.msk [vmem:[%s3979_s4 + $0x98] sm:$0xf] %vm1552_vm1, %v1764_v27  ;;  %v1788_v31 = vpack.c.bf16 %v3586_v38, %v3586_v38  ;;  %v1789_v26 = vpack.c.bf16 %v3589_v52, %v3589_v52 }
 0x2a0   :  { %1592 = vst.msk [vmem:[%s3979_s4 + $0x9c] sm:$0xf] %vm1552_vm1, %v1765_v63  ;;  %1593 = vst.msk [vmem:[%s3979_s4 + $0xa0] sm:$0xf] %vm1552_vm1, %v1766_v54 }
 0x2a1   :  { %1594 = vst.msk [vmem:[%s3979_s4 + $0xa4] sm:$0xf] %vm1552_vm1, %v1767_v49  ;;  %1595 = vst.msk [vmem:[%s3979_s4 + $0xa8] sm:$0xf] %vm1552_vm1, %v1768_v8 }
 0x2a2   :  { %1596 = vst.msk [vmem:[%s3979_s4 + $0xac] sm:$0xf] %vm1552_vm1, %v1769_v15  ;;  %1597 = vst.msk [vmem:[%s3979_s4 + $0xb0] sm:$0xf] %vm1552_vm1, %v1770_v36 }
 0x2a3   :  { %1598 = vst.msk [vmem:[%s3979_s4 + $0xb4] sm:$0xf] %vm1552_vm1, %v1771_v28  ;;  %1599 = vst.msk [vmem:[%s3979_s4 + $0xb8] sm:$0xf] %vm1552_vm1, %v1772_v10 }
 0x2a4   :  { %1600 = vst.msk [vmem:[%s3979_s4 + $0xbc] sm:$0xf] %vm1552_vm1, %v1773_v21  ;;  %1601 = vst.msk [vmem:[%s3979_s4 + $0xc0] sm:$0xf] %vm1552_vm1, %v1774_v33 }
 0x2a5   :  { %1602 = vst.msk [vmem:[%s3979_s4 + $0xc4] sm:$0xf] %vm1552_vm1, %v1775_v30  ;;  %1603 = vst.msk [vmem:[%s3979_s4 + $0xc8] sm:$0xf] %vm1552_vm1, %v1776_v46 }
 0x2a6   :  { %1604 = vst.msk [vmem:[%s3979_s4 + $0xcc] sm:$0xf] %vm1552_vm1, %v1777_v2  ;;  %1605 = vst.msk [vmem:[%s3979_s4 + $0xd0] sm:$0xf] %vm1552_vm1, %v1778_v39 }
 0x2a7   :  { %1606 = vst.msk [vmem:[%s3979_s4 + $0xd4] sm:$0xf] %vm1552_vm1, %v1779_v56  ;;  %1607 = vst.msk [vmem:[%s3979_s4 + $0xd8] sm:$0xf] %vm1552_vm1, %v1780_v53 }
 0x2a8   :  { %1608 = vst.msk [vmem:[%s3979_s4 + $0xdc] sm:$0xf] %vm1552_vm1, %v1781_v29  ;;  %1609 = vst.msk [vmem:[%s3979_s4 + $0xe0] sm:$0xf] %vm1552_vm1, %v1782_v60 }
 0x2a9   :  { %1610 = vst.msk [vmem:[%s3979_s4 + $0xe4] sm:$0xf] %vm1552_vm1, %v1783_v13  ;;  %1611 = vst.msk [vmem:[%s3979_s4 + $0xe8] sm:$0xf] %vm1552_vm1, %v1784_v41 }
 0x2aa   :  { %1612 = vst.msk [vmem:[%s3979_s4 + $0xec] sm:$0xf] %vm1552_vm1, %v1785_v6  ;;  %1613 = vst.msk [vmem:[%s3979_s4 + $0xf0] sm:$0xf] %vm1552_vm1, %v1786_v23 }
 0x2ab   :  { %1614 = vst.msk [vmem:[%s3979_s4 + $0xf4] sm:$0xf] %vm1552_vm1, %v1787_v58  ;;  %1615 = vst.msk [vmem:[%s3979_s4 + $0xf8] sm:$0xf] %vm1552_vm1, %v1788_v31 }
 0x2ac   :  { %1616 = vst.msk [vmem:[%s3979_s4 + $0xfc] sm:$0xf] %vm1552_vm1, %v1789_v26 }

// kernel: netlocalD_forward.6
= control target key start
LH: loop header
LB: loop body
LE: loop exit
PB: predicated region body
PF: predicated region fallthrough
CT: control target
= control target key end

     0   :  { %vm339_vm0 = vcmask 261120   ;;  %vm592_vm1 = vcmask 257024   ;;  %s1135_s1 = inlined_call_operand.vmem [shape: bf16[256,32], index: 1, kind: input, shape index: {}]   ;;  %s1136_s0 = inlined_call_operand.vmem [shape: bf16[128,256], index: 0, kind: input, shape index: {}]   ;;  %s1137_s2 = inlined_call_operand.vmem [shape: f32[1,32], index: 2, kind: input, shape index: {}]   ;;  %s1138_s3 = inlined_call_operand.vmem [shape: f32[1,32], index: 3, kind: input, shape index: {}]   ;;  %s1139_s4 = inlined_call_operand.vmem [shape: bf16[128,32], index: 4, kind: output, shape index: {}]  }
   0x1   :  { %v758_v0 = vld [vmem:[%s1135_s1 + $0x40] sm:$0xff]   ;;  %v760_v2 = vld [vmem:[%s1135_s1 + $0x48] sm:$0xff]   ;;  %v762_v4 = vld [vmem:[%s1135_s1 + $0x50] sm:$0xff]  }
   0x2   :  { %v759_v1 = vld [vmem:[%s1135_s1] sm:$0xff]   ;;  %678 = vmatprep.subr.bf16.mxu0 %v758_v0  ;;  %742 = vmatprep.subr.bf16.mxu1 %v758_v0  ;;  %v761_v3 = vld [vmem:[%s1135_s1 + $0x8] sm:$0xff]   ;;  %v763_v5 = vld [vmem:[%s1135_s1 + $0x10] sm:$0xff]  }
   0x3   :  { %679 = vmatpush3.bf16.msra.mxu0 %v759_v1  ;;  %750 = vmatpush3.bf16.msra.mxu1 %v759_v1  ;;  %v764_v6 = vld [vmem:[%s1135_s1 + $0x58] sm:$0xff]   ;;  %v766_v8 = vld [vmem:[%s1135_s1 + $0x60] sm:$0xff]   ;;  %v768_v10 = vld [vmem:[%s1135_s1 + $0x68] sm:$0xff]  }
   0x4   :  { %680 = vmatprep.subr.bf16.mxu0 %v760_v2  ;;  %743 = vmatprep.subr.bf16.mxu1 %v760_v2  ;;  %v765_v7 = vld [vmem:[%s1135_s1 + $0x18] sm:$0xff]   ;;  %v767_v9 = vld [vmem:[%s1135_s1 + $0x20] sm:$0xff]   ;;  %v769_v12 = vld [vmem:[%s1135_s1 + $0x28] sm:$0xff]  }
   0x5   :  { %v776_v11 = vld [vmem:[%s1136_s0 + $0x4] ss:$8 sps:$4 sm:$0xff]   ;;  %v770_v14 = vld [vmem:[%s1135_s1 + $0x70] sm:$0xff]   ;;  %v772_v16 = vld [vmem:[%s1135_s1 + $0x78] sm:$0xff]  }
   0x6   :  { %v782_v13 = vld [vmem:[%s1136_s0 + $0x44] ss:$8 sps:$4 sm:$0xff]   ;;  %274 = vmatprep.mubr.bf16.mxu0 %v776_v11  ;;  %v771_v15 = vld [vmem:[%s1135_s1 + $0x30] sm:$0xff]   ;;  %v773_v17 = vld [vmem:[%s1135_s1 + $0x38] sm:$0xff]  }
   0x7   :  { %681 = vmatpush3.bf16.msra.mxu0 %v761_v3  ;;  %751 = vmatpush3.bf16.msra.mxu1 %v761_v3  ;;  %v774_v18 = vld [vmem:[%s1136_s0] ss:$8 sps:$4 sm:$0xff]   ;;  %v777_v20 = vld [vmem:[%s1136_s0 + $0x14] ss:$8 sps:$4 sm:$0xff]   ;;  %v779_v22 = vld [vmem:[%s1136_s0 + $0x10] ss:$8 sps:$4 sm:$0xff]  }
   0x8   :  { %682 = vmatprep.subr.bf16.mxu0 %v762_v4  ;;  %744 = vmatprep.subr.bf16.mxu1 %v762_v4  ;;  %v780_v19 = vld [vmem:[%s1136_s0 + $0x40] ss:$8 sps:$4 sm:$0xff]   ;;  %v786_v21 = vld [vmem:[%s1136_s0 + $0x54] ss:$8 sps:$4 sm:$0xff]   ;;  %v788_v23 = vld [vmem:[%s1136_s0 + $0x50] ss:$8 sps:$4 sm:$0xff]  }
   0x9   :  { %306 = vmatprep.mubr.bf16.mxu1 %v782_v13  ;;  %v783_v24 = vld [vmem:[%s1136_s0 + $0x24] ss:$8 sps:$4 sm:$0xff]   ;;  %v785_v26 = vld [vmem:[%s1136_s0 + $0x20] ss:$8 sps:$4 sm:$0xff]   ;;  %v789_v28 = vld [vmem:[%s1136_s0 + $0x34] ss:$8 sps:$4 sm:$0xff]  }
   0xa   :  { %v792_v25 = vld [vmem:[%s1136_s0 + $0x64] ss:$8 sps:$4 sm:$0xff]   ;;  %v794_v27 = vld [vmem:[%s1136_s0 + $0x60] ss:$8 sps:$4 sm:$0xff]   ;;  %v795_v29 = vld [vmem:[%s1136_s0 + $0x74] ss:$8 sps:$4 sm:$0xff]  }
   0xb   :  { %683 = vmatpush3.bf16.msra.mxu0 %v763_v5  ;;  %752 = vmatpush3.bf16.msra.mxu1 %v763_v5  ;;  %v791_v30 = vld [vmem:[%s1136_s0 + $0x30] ss:$8 sps:$4 sm:$0xff]  }
   0xc   :  { %684 = vmatprep.subr.bf16.mxu0 %v764_v6  ;;  %745 = vmatprep.subr.bf16.mxu1 %v764_v6  ;;  %v797_v31 = vld [vmem:[%s1136_s0 + $0x70] ss:$8 sps:$4 sm:$0xff]  }
   0xf   :  { %685 = vmatpush3.bf16.msra.mxu0 %v765_v7  ;;  %753 = vmatpush3.bf16.msra.mxu1 %v765_v7 }
  0x10   :  { %686 = vmatprep.subr.bf16.mxu0 %v766_v8  ;;  %746 = vmatprep.subr.bf16.mxu1 %v766_v8 }
  0x13   :  { %687 = vmatpush3.bf16.msra.mxu0 %v767_v9  ;;  %754 = vmatpush3.bf16.msra.mxu1 %v767_v9 }
  0x14   :  { %688 = vmatprep.subr.bf16.mxu0 %v768_v10  ;;  %747 = vmatprep.subr.bf16.mxu1 %v768_v10 }
  0x17   :  { %689 = vmatpush3.bf16.msra.mxu0 %v769_v12  ;;  %755 = vmatpush3.bf16.msra.mxu1 %v769_v12 }
  0x18   :  { %690 = vmatprep.subr.bf16.mxu0 %v770_v14  ;;  %748 = vmatprep.subr.bf16.mxu1 %v770_v14 }
  0x1b   :  { %691 = vmatpush3.bf16.msra.mxu0 %v771_v15  ;;  %756 = vmatpush3.bf16.msra.mxu1 %v771_v15 }
  0x1c   :  { %692 = vmatprep.subr.bf16.mxu0 %v772_v16  ;;  %749 = vmatprep.subr.bf16.mxu1 %v772_v16 }
  0x1f   :  { %693 = vmatpush3.bf16.msra.mxu0 %v773_v17  ;;  %757 = vmatpush3.bf16.msra.mxu1 %v773_v17 }
  0x22   :  { %275 = vmatmul.mubr.bf16.vlgmr.msra.gmra.mrb[0].mxu0 %v774_v18  ;;  %307 = vmatmul.mubr.bf16.vlgmr.msra.gmra.mrb[0].mxu1 %v780_v19 }
  0x23   :  { %282 = vmatprep.mubr.bf16.mxu0 %v777_v20  ;;  %314 = vmatprep.mubr.bf16.mxu1 %v786_v21 }
  0x2a   :  { %283 = vmatmul.mubr.bf16.gmra.mrb[4].mxu0 %v779_v22  ;;  %315 = vmatmul.mubr.bf16.gmra.mrb[4].mxu1 %v788_v23 }
  0x2b   :  { %290 = vmatprep.mubr.bf16.mxu0 %v783_v24  ;;  %322 = vmatprep.mubr.bf16.mxu1 %v792_v25 }
  0x32   :  { %291 = vmatmul.mubr.bf16.gmra.mrb[8].mxu0 %v785_v26  ;;  %323 = vmatmul.mubr.bf16.gmra.mrb[8].mxu1 %v794_v27 }
  0x33   :  { %298 = vmatprep.mubr.bf16.mxu0 %v789_v28  ;;  %330 = vmatprep.mubr.bf16.mxu1 %v795_v29 }
  0x3a   :  { %299 = vmatmul.mubr.bf16.gmra.mrb[12].mxu0 %v791_v30  ;;  %331 = vmatmul.mubr.bf16.gmra.mrb[12].mxu1 %v797_v31 }
  0xf5   :  { %v694_v32 = vpop.f32.mrb[0].mxu0  ;;  %v718_v33 = vpop.f32.mrb[0].mxu1 }
  0xf6   :  { %v695_v34 = vpop.f32.mrb[1].mxu0  ;;  %v719_v35 = vpop.f32.mrb[1].mxu1 }
  0xf7   :  { %v921_v36 = vadd.f32 %v695_v34, %v694_v32  ;;  %v697_v37 = vpop.f32.mrb[2].mxu0  ;;  %v923_v38 = vadd.f32 %v719_v35, %v718_v33  ;;  %v721_v39 = vpop.f32.mrb[2].mxu1 }
  0xf8   :  { %v698_v40 = vpop.f32.mrb[3].mxu0  ;;  %v722_v41 = vpop.f32.mrb[3].mxu1 }
  0xf9   :  { %v925_v42 = vadd.f32 %v698_v40, %v697_v37  ;;  %v927_v43 = vadd.f32 %v722_v41, %v721_v39  ;;  %v340_v44 = vsel %vm339_vm0, %v921_v36, 0.0  ;;  %v355_v31 = vsel %vm339_vm0, %v923_v38, 0.0 }
  0xfb   :  { %v341_v45 = vsel %vm339_vm0, %v925_v42, 0.0  ;;  %v357_v33 = vsel %vm339_vm0, %v927_v43, 0.0 }
  0xfc   :  { %v342_v46 = vadd.f32 %v341_v45, %v340_v44 }
  0xfd   :  { %v700_v47 = vpop.f32.mrb[4].mxu0  ;;  %v724_v48 = vpop.f32.mrb[4].mxu1 }
  0xfe   :  { %v701_v49 = vpop.f32.mrb[5].mxu0  ;;  %v725_v50 = vpop.f32.mrb[5].mxu1 }
  0xff   :  { %v933_v51 = vadd.f32 %v701_v49, %v700_v47  ;;  %v703_v52 = vpop.f32.mrb[6].mxu0  ;;  %v935_v53 = vadd.f32 %v725_v50, %v724_v48  ;;  %v727_v54 = vpop.f32.mrb[6].mxu1 }
 0x100   :  { %v704_v55 = vpop.f32.mrb[7].mxu0  ;;  %v728_v56 = vpop.f32.mrb[7].mxu1 }
 0x101   :  { %v343_v57 = vsel %vm339_vm0, %v933_v51, 0.0  ;;  %v939_v58 = vadd.f32 %v704_v55, %v703_v52  ;;  %v941_v59 = vadd.f32 %v728_v56, %v727_v54  ;;  %v359_v35 = vsel %vm339_vm0, %v935_v53, 0.0 }
 0x102   :  { %v344_v60 = vadd.f32 %v343_v57, %v342_v46 }
 0x103   :  { %v345_v61 = vsel %vm339_vm0, %v939_v58, 0.0  ;;  %v361_v39 = vsel %vm339_vm0, %v941_v59, 0.0 }
 0x104   :  { %v346_v62 = vadd.f32 %v345_v61, %v344_v60 }
 0x105   :  { %v706_v63 = vpop.f32.mrb[8].mxu0  ;;  %v730_v0 = vpop.f32.mrb[8].mxu1 }
 0x106   :  { %v707_v1 = vpop.f32.mrb[9].mxu0  ;;  %v731_v2 = vpop.f32.mrb[9].mxu1 }
 0x107   :  { %v708_v3 = vadd.f32 %v707_v1, %v706_v63  ;;  %v709_v4 = vpop.f32.mrb[10].mxu0  ;;  %v732_v5 = vadd.f32 %v731_v2, %v730_v0  ;;  %v733_v6 = vpop.f32.mrb[10].mxu1 }
 0x108   :  { %v710_v7 = vpop.f32.mrb[11].mxu0  ;;  %v734_v8 = vpop.f32.mrb[11].mxu1 }
 0x109   :  { %v347_v9 = vsel %vm339_vm0, %v708_v3, 0.0  ;;  %v711_v10 = vadd.f32 %v710_v7, %v709_v4  ;;  %v735_v11 = vadd.f32 %v734_v8, %v733_v6  ;;  %v363_v41 = vsel %vm339_vm0, %v732_v5, 0.0 }
 0x10a   :  { %v348_v12 = vadd.f32 %v347_v9, %v346_v62 }
 0x10b   :  { %v349_v13 = vsel %vm339_vm0, %v711_v10, 0.0  ;;  %v365_v45 = vsel %vm339_vm0, %v735_v11, 0.0 }
 0x10c   :  { %v350_v14 = vadd.f32 %v349_v13, %v348_v12 }
 0x10d   :  { %v712_v15 = vpop.f32.mrb[12].mxu0  ;;  %v736_v16 = vpop.f32.mrb[12].mxu1 }
 0x10e   :  { %v713_v17 = vpop.f32.mrb[13].mxu0  ;;  %v737_v18 = vpop.f32.mrb[13].mxu1 }
 0x10f   :  { %v714_v19 = vadd.f32 %v713_v17, %v712_v15  ;;  %v715_v20 = vpop.f32.mrb[14].mxu0  ;;  %v738_v21 = vadd.f32 %v737_v18, %v736_v16  ;;  %v739_v22 = vpop.f32.mrb[14].mxu1 }
 0x110   :  { %v716_v23 = vpop.f32.mrb[15].mxu0  ;;  %v740_v24 = vpop.f32.mrb[15].mxu1 }
 0x111   :  { %v351_v25 = vsel %vm339_vm0, %v714_v19, 0.0  ;;  %v717_v26 = vadd.f32 %v716_v23, %v715_v20  ;;  %v741_v27 = vadd.f32 %v740_v24, %v739_v22  ;;  %v367_v46 = vsel %vm339_vm0, %v738_v21, 0.0 }
 0x112   :  { %v352_v28 = vadd.f32 %v351_v25, %v350_v14 }
 0x113   :  { %v353_v29 = vsel %vm339_vm0, %v717_v26, 0.0  ;;  %v369_v49 = vsel %vm339_vm0, %v741_v27, 0.0 }
 0x114   :  { %v354_v30 = vadd.f32 %v353_v29, %v352_v28 }
 0x116   :  { %v356_v32 = vadd.f32 %v355_v31, %v354_v30 }
 0x118   :  { %v358_v34 = vadd.f32 %v357_v33, %v356_v32 }
 0x11a   :  { %v360_v37 = vadd.f32 %v359_v35, %v358_v34 }
 0x11c   :  { %v362_v40 = vadd.f32 %v361_v39, %v360_v37 }
 0x11e   :  { %v364_v44 = vadd.f32 %v363_v41, %v362_v40 }
 0x120   :  { %v366_v47 = vadd.f32 %v365_v45, %v364_v44 }
 0x122   :  { %v368_v48 = vadd.f32 %v367_v46, %v366_v47 }
 0x124   :  { %v370_v50 = vadd.f32 %v369_v49, %v368_v48 }
 0x126   :  { %v371_v52 = vrot.slane %v370_v50, 4 }
 0x128   :  { %v372_v54 = vadd.f32 %v371_v52, %v370_v50 }
 0x12a   :  { %v373_v55 = vrot.slane %v372_v54, 2 }
 0x12c   :  { %v374_v56 = vadd.f32 %v373_v55, %v372_v54 }
 0x12e   :  { %v375_v57 = vrot.slane %v374_v56, 1 }
 0x130   :  { %v376_v60 = vadd.f32 %v375_v57, %v374_v56 }
 0x132   :  { %v378_v61 = vmul.f32 0.0078125, %v376_v60 }
 0x134   :  { %v962_v62 = vsub.f32 %v921_v36, %v378_v61  ;;  %v965_v63 = vsub.f32 %v925_v42, %v378_v61  ;;  %v968_v0 = vsub.f32 %v933_v51, %v378_v61  ;;  %v971_v1 = vsub.f32 %v939_v58, %v378_v61 }
 0x135   :  { %v973_v2 = vsub.f32 %v708_v3, %v378_v61  ;;  %v975_v4 = vsub.f32 %v711_v10, %v378_v61  ;;  %v977_v6 = vsub.f32 %v714_v19, %v378_v61  ;;  %v979_v7 = vsub.f32 %v717_v26, %v378_v61 }
 0x136   :  { %v982_v36 = vsub.f32 %v923_v38, %v378_v61  ;;  %v985_v42 = vsub.f32 %v927_v43, %v378_v61  ;;  %v988_v51 = vsub.f32 %v935_v53, %v378_v61  ;;  %v991_v58 = vsub.f32 %v941_v59, %v378_v61 }
 0x137   :  { %v993_v3 = vsub.f32 %v732_v5, %v378_v61  ;;  %v995_v8 = vsub.f32 %v735_v11, %v378_v61  ;;  %v997_v9 = vsub.f32 %v738_v21, %v378_v61  ;;  %v999_v10 = vsub.f32 %v741_v27, %v378_v61 }
 0x138   :  { %v395_v38 = vmul.f32 %v962_v62, %v962_v62  ;;  %v396_v43 = vmul.f32 %v965_v63, %v965_v63  ;;  %v397_v53 = vmul.f32 %v968_v0, %v968_v0  ;;  %v398_v59 = vmul.f32 %v971_v1, %v971_v1 }
 0x139   :  { %v399_v13 = vmul.f32 %v973_v2, %v973_v2  ;;  %v400_v16 = vmul.f32 %v975_v4, %v975_v4  ;;  %v401_v19 = vmul.f32 %v977_v6, %v977_v6  ;;  %v402_v22 = vmul.f32 %v979_v7, %v979_v7 }
 0x13a   :  { %v411_v5 = vsel %vm339_vm0, %v395_v38, 0.0  ;;  %v412_v11 = vsel %vm339_vm0, %v396_v43, 0.0  ;;  %v414_v14 = vsel %vm339_vm0, %v397_v53, 0.0  ;;  %v416_v17 = vsel %vm339_vm0, %v398_v59, 0.0 }
 0x13b   :  { %v413_v12 = vadd.f32 %v412_v11, %v411_v5  ;;  %v418_v20 = vsel %vm339_vm0, %v399_v13, 0.0  ;;  %v420_v23 = vsel %vm339_vm0, %v400_v16, 0.0  ;;  %v403_v25 = vmul.f32 %v982_v36, %v982_v36 }
 0x13c   :  { %v422_v26 = vsel %vm339_vm0, %v401_v19, 0.0  ;;  %v404_v28 = vmul.f32 %v985_v42, %v985_v42  ;;  %v424_v29 = vsel %vm339_vm0, %v402_v22, 0.0  ;;  %v405_v31 = vmul.f32 %v988_v51, %v988_v51 }
 0x13d   :  { %v415_v15 = vadd.f32 %v414_v14, %v413_v12  ;;  %v426_v32 = vsel %vm339_vm0, %v403_v25, 0.0  ;;  %v406_v34 = vmul.f32 %v991_v58, %v991_v58  ;;  %v407_v39 = vmul.f32 %v993_v3, %v993_v3 }
 0x13e   :  { %v428_v35 = vsel %vm339_vm0, %v404_v28, 0.0  ;;  %v430_v40 = vsel %vm339_vm0, %v405_v31, 0.0  ;;  %v408_v44 = vmul.f32 %v995_v8, %v995_v8  ;;  %v409_v47 = vmul.f32 %v997_v9, %v997_v9  ;;  %v645_v28 = vld [vmem:[%s1138_s3] ss:$0 sm:$0xff] }
 0x13f   :  { %v417_v18 = vadd.f32 %v416_v17, %v415_v15  ;;  %v432_v45 = vsel %vm339_vm0, %v406_v34, 0.0  ;;  %v434_v48 = vsel %vm339_vm0, %v407_v39, 0.0  ;;  %v410_v50 = vmul.f32 %v999_v10, %v999_v10  ;;  %v451_v15 = vld [vmem:[%s1137_s2] sm:$0x1] }
 0x140   :  { %v436_v52 = vsel %vm339_vm0, %v408_v44, 0.0  ;;  %v438_v55 = vsel %vm339_vm0, %v409_v47, 0.0  ;;  %v453_v13 = vlaneseq }
 0x141   :  { %v419_v21 = vadd.f32 %v418_v20, %v417_v18  ;;  %v440_v57 = vsel %vm339_vm0, %v410_v50, 0.0 }
 0x142   :  { %v454_v14 = vshrl.u32 %v453_v13, 7 }
 0x143   :  { %v421_v24 = vadd.f32 %v420_v23, %v419_v21 }
 0x144   :  { %v455_v16 = vsub.s32 0, %v454_v14 }
 0x145   :  { %v423_v27 = vadd.f32 %v422_v26, %v421_v24 }
 0x147   :  { %v425_v30 = vadd.f32 %v424_v29, %v423_v27 }
 0x149   :  { %v427_v33 = vadd.f32 %v426_v32, %v425_v30 }
 0x14b   :  { %v429_v37 = vadd.f32 %v428_v35, %v427_v33 }
 0x14d   :  { %v431_v41 = vadd.f32 %v430_v40, %v429_v37 }
 0x14f   :  { %v433_v46 = vadd.f32 %v432_v45, %v431_v41 }
 0x151   :  { %v435_v49 = vadd.f32 %v434_v48, %v433_v46 }
 0x153   :  { %v437_v54 = vadd.f32 %v436_v52, %v435_v49 }
 0x155   :  { %v439_v56 = vadd.f32 %v438_v55, %v437_v54 }
 0x157   :  { %v441_v60 = vadd.f32 %v440_v57, %v439_v56 }
 0x159   :  { %v442_v61 = vrot.slane %v441_v60, 4 }
 0x15b   :  { %v443_v38 = vadd.f32 %v442_v61, %v441_v60 }
 0x15d   :  { %v444_v43 = vrot.slane %v443_v38, 2 }
 0x15f   :  { %v445_v53 = vadd.f32 %v444_v43, %v443_v38 }
 0x161   :  { %v446_v59 = vrot.slane %v445_v53, 1 }
 0x163   :  { %v447_v5 = vadd.f32 %v446_v59, %v445_v53 }
 0x165   :  { %v448_v11 = vmul.f32 0.0078125, %v447_v5 }
 0x167   :  { %v449_v12 = vadd.f32 1e-05, %v448_v11 }
 0x169   :  { %798 = vrsqrt.f32 %v449_v12 }
 0x173   :  { %v799_v17 = vpop.eup %798 }
 0x174   :  { %v452_v18 = vmul.f32 %v799_v17, %v451_v15 }
 0x176   :  { %v456_v19 = vrot.slane %v452_v18, %v455_v16 }
 0x178   :  { %v457_v20 = vmul.f32 %v456_v19, %v962_v62  ;;  %v458_v21 = vmul.f32 %v456_v19, %v965_v63  ;;  %v459_v22 = vmul.f32 %v456_v19, %v968_v0  ;;  %v460_v23 = vmul.f32 %v456_v19, %v971_v1 }
 0x179   :  { %v461_v24 = vmul.f32 %v456_v19, %v973_v2  ;;  %v462_v25 = vmul.f32 %v456_v19, %v975_v4  ;;  %v463_v26 = vmul.f32 %v456_v19, %v977_v6  ;;  %v464_v27 = vmul.f32 %v456_v19, %v979_v7 }
 0x17a   :  { %v465_v62 = vmul.f32 %v456_v19, %v982_v36  ;;  %v466_v63 = vmul.f32 %v456_v19, %v985_v42  ;;  %v467_v0 = vmul.f32 %v456_v19, %v988_v51  ;;  %v468_v1 = vmul.f32 %v456_v19, %v991_v58 }
 0x17b   :  { %v469_v2 = vmul.f32 %v456_v19, %v993_v3  ;;  %v470_v4 = vmul.f32 %v456_v19, %v995_v8  ;;  %v471_v6 = vmul.f32 %v456_v19, %v997_v9  ;;  %v472_v7 = vmul.f32 %v456_v19, %v999_v10 }
 0x17c   :  { %v480_v29 = vadd.f32 %v645_v28, %v457_v20  ;;  %v481_v30 = vadd.f32 %v645_v28, %v458_v21  ;;  %v482_v31 = vadd.f32 %v645_v28, %v459_v22  ;;  %v483_v32 = vadd.f32 %v645_v28, %v460_v23 }
 0x17d   :  { %v484_v33 = vadd.f32 %v645_v28, %v461_v24  ;;  %v485_v36 = vadd.f32 %v645_v28, %v462_v25  ;;  %v486_v34 = vadd.f32 %v645_v28, %v463_v26  ;;  %v487_v42 = vadd.f32 %v645_v28, %v464_v27 }
 0x17e   :  { %v488_v35 = vadd.f32 %v645_v28, %v465_v62  ;;  %v489_v51 = vadd.f32 %v645_v28, %v466_v63  ;;  %v490_v37 = vadd.f32 %v645_v28, %v467_v0  ;;  %v491_v58 = vadd.f32 %v645_v28, %v468_v1 }
 0x17f   :  { %v492_v39 = vadd.f32 %v645_v28, %v469_v2  ;;  %v493_v3 = vadd.f32 %v645_v28, %v470_v4  ;;  %v494_v8 = vadd.f32 %v645_v28, %v471_v6  ;;  %v496_v40 = vmul.f32 0.2, %v480_v29 }
 0x180   :  { %v497_v9 = vmul.f32 0.2, %v481_v30  ;;  %v498_v41 = vmul.f32 0.2, %v482_v31  ;;  %v495_v10 = vadd.f32 %v645_v28, %v472_v7  ;;  %v499_v44 = vmul.f32 0.2, %v483_v32 }
 0x181   :  { %v500_v45 = vmul.f32 0.2, %v484_v33  ;;  %v501_v46 = vmul.f32 0.2, %v485_v36  ;;  %v502_v47 = vmul.f32 0.2, %v486_v34  ;;  %v512_v50 = vmax.f32 %v480_v29, %v496_v40 }
 0x182   :  { %v503_v48 = vmul.f32 0.2, %v487_v42  ;;  %v504_v49 = vmul.f32 0.2, %v488_v35  ;;  %v505_v52 = vmul.f32 0.2, %v489_v51  ;;  %v513_v56 = vmax.f32 %v481_v30, %v497_v9 }
 0x183   :  { %v506_v54 = vmul.f32 0.2, %v490_v37  ;;  %v507_v55 = vmul.f32 0.2, %v491_v58  ;;  %v508_v57 = vmul.f32 0.2, %v492_v39  ;;  %v514_v38 = vmax.f32 %v482_v31, %v498_v41 }
 0x184   :  { %v509_v60 = vmul.f32 0.2, %v493_v3  ;;  %v510_v61 = vmul.f32 0.2, %v494_v8  ;;  %v511_v43 = vmul.f32 0.2, %v495_v10  ;;  %v515_v53 = vmax.f32 %v483_v32, %v499_v44 }
 0x185   :  { %v516_v59 = vmax.f32 %v484_v33, %v500_v45  ;;  %v517_v5 = vmax.f32 %v485_v36, %v501_v46  ;;  %v518_v11 = vmax.f32 %v486_v34, %v502_v47  ;;  %v519_v12 = vmax.f32 %v487_v42, %v503_v48 }
 0x186   :  { %v520_v13 = vmax.f32 %v488_v35, %v504_v49  ;;  %v521_v14 = vmax.f32 %v489_v51, %v505_v52  ;;  %v522_v15 = vmax.f32 %v490_v37, %v506_v54  ;;  %v523_v16 = vmax.f32 %v491_v58, %v507_v55 }
 0x187   :  { %v524_v17 = vmax.f32 %v492_v39, %v508_v57  ;;  %v525_v18 = vmax.f32 %v493_v3, %v509_v60  ;;  %v526_v19 = vmax.f32 %v494_v8, %v510_v61  ;;  %v527_v20 = vmax.f32 %v495_v10, %v511_v43 }
 0x188   :  { %v662_v21 = vpack.c.bf16 %v512_v50, %v512_v50  ;;  %v663_v22 = vpack.c.bf16 %v513_v56, %v513_v56  ;;  %v664_v23 = vpack.c.bf16 %v514_v38, %v514_v38  ;;  %v665_v24 = vpack.c.bf16 %v515_v53, %v515_v53 }
 0x189   :  { %v666_v25 = vpack.c.bf16 %v516_v59, %v516_v59  ;;  %v667_v26 = vpack.c.bf16 %v517_v5, %v517_v5  ;;  %v668_v27 = vpack.c.bf16 %v518_v11, %v518_v11  ;;  %v669_v28 = vpack.c.bf16 %v519_v12, %v519_v12 }
 0x18a   :  { %v670_v62 = vpack.c.bf16 %v520_v13, %v520_v13  ;;  %v671_v63 = vpack.c.bf16 %v521_v14, %v521_v14  ;;  %593 = vst.msk [vmem:[%s1139_s4] sm:$0xf] %vm592_vm1, %v662_v21  ;;  %594 = vst.msk [vmem:[%s1139_s4 + $0x4] sm:$0xf] %vm592_vm1, %v663_v22  ;;  %v672_v0 = vpack.c.bf16 %v522_v15, %v522_v15 }
 0x18b   :  { %v673_v1 = vpack.c.bf16 %v523_v16, %v523_v16  ;;  %v674_v2 = vpack.c.bf16 %v524_v17, %v524_v17  ;;  %v675_v4 = vpack.c.bf16 %v525_v18, %v525_v18  ;;  %595 = vst.msk [vmem:[%s1139_s4 + $0x8] sm:$0xf] %vm592_vm1, %v664_v23  ;;  %596 = vst.msk [vmem:[%s1139_s4 + $0xc] sm:$0xf] %vm592_vm1, %v665_v24 }
 0x18c   :  { %597 = vst.msk [vmem:[%s1139_s4 + $0x10] sm:$0xf] %vm592_vm1, %v666_v25  ;;  %598 = vst.msk [vmem:[%s1139_s4 + $0x14] sm:$0xf] %vm592_vm1, %v667_v26  ;;  %v676_v6 = vpack.c.bf16 %v526_v19, %v526_v19  ;;  %v677_v7 = vpack.c.bf16 %v527_v20, %v527_v20 }
 0x18d   :  { %599 = vst.msk [vmem:[%s1139_s4 + $0x18] sm:$0xf] %vm592_vm1, %v668_v27  ;;  %600 = vst.msk [vmem:[%s1139_s4 + $0x1c] sm:$0xf] %vm592_vm1, %v669_v28 }
 0x18e   :  { %601 = vst.msk [vmem:[%s1139_s4 + $0x20] sm:$0xf] %vm592_vm1, %v670_v62  ;;  %602 = vst.msk [vmem:[%s1139_s4 + $0x24] sm:$0xf] %vm592_vm1, %v671_v63 }
 0x18f   :  { %603 = vst.msk [vmem:[%s1139_s4 + $0x28] sm:$0xf] %vm592_vm1, %v672_v0  ;;  %604 = vst.msk [vmem:[%s1139_s4 + $0x2c] sm:$0xf] %vm592_vm1, %v673_v1 }
 0x190   :  { %605 = vst.msk [vmem:[%s1139_s4 + $0x30] sm:$0xf] %vm592_vm1, %v674_v2  ;;  %606 = vst.msk [vmem:[%s1139_s4 + $0x34] sm:$0xf] %vm592_vm1, %v675_v4 }
 0x191   :  { %607 = vst.msk [vmem:[%s1139_s4 + $0x38] sm:$0xf] %vm592_vm1, %v676_v6  ;;  %608 = vst.msk [vmem:[%s1139_s4 + $0x3c] sm:$0xf] %vm592_vm1, %v677_v7 }

// kernel: netlocalD_forward.7
= control target key start
LH: loop header
LB: loop body
LE: loop exit
PB: predicated region body
PF: predicated region fallthrough
CT: control target
= control target key end

     0   :  { %vm423_vm0 = vcmask 523264   ;;  %vm525_vm1 = vcmask 130112   ;;  %vm536_vm2 = vcmask 1041409   ;;  %vm539_vm3 = vcmask 123904   ;;  %s880_s1 = inlined_call_operand.vmem [shape: bf16[512,64], index: 1, kind: input, shape index: {}]   ;;  %s881_s0 = inlined_call_operand.vmem [shape: bf16[32,512], index: 0, kind: input, shape index: {}]   ;;  %s882_s2 = inlined_call_operand.vmem [shape: f32[1,64], index: 2, kind: input, shape index: {}]   ;;  %s883_s3 = inlined_call_operand.vmem [shape: f32[1,64], index: 3, kind: input, shape index: {}]   ;;  %s884_s4 = inlined_call_operand.vmem [shape: f32[16,64], index: 4, kind: input, shape index: {}]   ;;  %s885_s5 = inlined_call_operand.vmem [shape: f32[2,1], index: 5, kind: output, shape index: {}]  }
   0x1   :  { %v653_v0 = vld [vmem:[%s880_s1 + $0x40] sm:$0xff]   ;;  %v657_v4 = vld [vmem:[%s880_s1 + $0x48] sm:$0xff]   ;;  %v661_v8 = vld [vmem:[%s880_s1 + $0x50] sm:$0xff]   ;;  %vm549_vm4 = vcmask 1024  }
   0x2   :  { %v654_v1 = vld [vmem:[%s880_s1 + $0xc0] sm:$0xff]   ;;  %597 = vmatprep.subr.bf16.mxu0 %v653_v0  ;;  %v658_v5 = vld [vmem:[%s880_s1 + $0xc8] sm:$0xff]   ;;  %v662_v9 = vld [vmem:[%s880_s1 + $0xd0] sm:$0xff]  }
   0x3   :  { %v655_v2 = vld [vmem:[%s880_s1] sm:$0xff]   ;;  %625 = vmatprep.subr.bf16.mxu1 %v654_v1  ;;  %v659_v6 = vld [vmem:[%s880_s1 + $0x8] sm:$0xff]   ;;  %v663_v10 = vld [vmem:[%s880_s1 + $0x10] sm:$0xff]  }
   0x4   :  { %v656_v3 = vld [vmem:[%s880_s1 + $0x80] sm:$0xff]   ;;  %598 = vmatpush3.bf16.msra.mxu0 %v655_v2  ;;  %v660_v7 = vld [vmem:[%s880_s1 + $0x88] sm:$0xff]   ;;  %v664_v11 = vld [vmem:[%s880_s1 + $0x90] sm:$0xff]  }
   0x5   :  { %626 = vmatpush3.bf16.msra.mxu1 %v656_v3  ;;  %599 = vmatprep.subr.bf16.mxu0 %v657_v4  ;;  %v665_v12 = vld [vmem:[%s880_s1 + $0x58] sm:$0xff]   ;;  %v669_v16 = vld [vmem:[%s880_s1 + $0x60] sm:$0xff]   ;;  %v673_v20 = vld [vmem:[%s880_s1 + $0x68] sm:$0xff]  }
   0x6   :  { %627 = vmatprep.subr.bf16.mxu1 %v658_v5  ;;  %v666_v13 = vld [vmem:[%s880_s1 + $0xd8] sm:$0xff]   ;;  %v670_v17 = vld [vmem:[%s880_s1 + $0xe0] sm:$0xff]   ;;  %v674_v21 = vld [vmem:[%s880_s1 + $0xe8] sm:$0xff]  }
   0x7   :  { %v667_v14 = vld [vmem:[%s880_s1 + $0x18] sm:$0xff]   ;;  %v671_v18 = vld [vmem:[%s880_s1 + $0x20] sm:$0xff]   ;;  %v675_v22 = vld [vmem:[%s880_s1 + $0x28] sm:$0xff]  }
   0x8   :  { %600 = vmatpush3.bf16.msra.mxu0 %v659_v6  ;;  %v668_v15 = vld [vmem:[%s880_s1 + $0x98] sm:$0xff]   ;;  %v672_v19 = vld [vmem:[%s880_s1 + $0xa0] sm:$0xff]   ;;  %v676_v23 = vld [vmem:[%s880_s1 + $0xa8] sm:$0xff]  }
   0x9   :  { %628 = vmatpush3.bf16.msra.mxu1 %v660_v7  ;;  %601 = vmatprep.subr.bf16.mxu0 %v661_v8  ;;  %v677_v24 = vld [vmem:[%s880_s1 + $0x70] sm:$0xff]   ;;  %v681_v28 = vld [vmem:[%s880_s1 + $0x78] sm:$0xff]  }
   0xa   :  { %629 = vmatprep.subr.bf16.mxu1 %v662_v9  ;;  %v678_v25 = vld [vmem:[%s880_s1 + $0xf0] sm:$0xff]   ;;  %v682_v29 = vld [vmem:[%s880_s1 + $0xf8] sm:$0xff]  }
   0xb   :  { %v679_v26 = vld [vmem:[%s880_s1 + $0x30] sm:$0xff]   ;;  %v683_v30 = vld [vmem:[%s880_s1 + $0x38] sm:$0xff]  }
   0xc   :  { %602 = vmatpush3.bf16.msra.mxu0 %v663_v10  ;;  %v680_v27 = vld [vmem:[%s880_s1 + $0xb0] sm:$0xff]   ;;  %v684_v31 = vld [vmem:[%s880_s1 + $0xb8] sm:$0xff]  }
   0xd   :  { %630 = vmatpush3.bf16.msra.mxu1 %v664_v11  ;;  %603 = vmatprep.subr.bf16.mxu0 %v665_v12  ;;  %v685_v32 = vld [vmem:[%s881_s0] ss:$16 sps:$4 sm:$0xff]   ;;  %v687_v33 = vld [vmem:[%s881_s0 + $0x4] ss:$16 sps:$4 sm:$0xff]   ;;  %v688_v34 = vld [vmem:[%s881_s0 + $0x8] ss:$16 sps:$4 sm:$0xff]  }
   0xe   :  { %631 = vmatprep.subr.bf16.mxu1 %v666_v13  ;;  %v690_v35 = vld [vmem:[%s881_s0 + $0xc] ss:$16 sps:$4 sm:$0xff]   ;;  %357 = vmatprep.mubr.bf16.mxu0 %v687_v33  ;;  %v691_v36 = vld [vmem:[%s881_s0 + $0x24] ss:$16 sps:$4 sm:$0xff]   ;;  %v695_v38 = vld [vmem:[%s881_s0 + $0x20] ss:$16 sps:$4 sm:$0xff]  }
   0xf   :  { %406 = vmatprep.mubr.bf16.mxu1 %v690_v35  ;;  %v693_v37 = vld [vmem:[%s881_s0 + $0x2c] ss:$16 sps:$4 sm:$0xff]   ;;  %v696_v39 = vld [vmem:[%s881_s0 + $0x28] ss:$16 sps:$4 sm:$0xff]  }
  0x10   :  { %604 = vmatpush3.bf16.msra.mxu0 %v667_v14 }
  0x11   :  { %632 = vmatpush3.bf16.msra.mxu1 %v668_v15  ;;  %605 = vmatprep.subr.bf16.mxu0 %v669_v16 }
  0x12   :  { %633 = vmatprep.subr.bf16.mxu1 %v670_v17 }
  0x14   :  { %606 = vmatpush3.bf16.msra.mxu0 %v671_v18 }
  0x15   :  { %634 = vmatpush3.bf16.msra.mxu1 %v672_v19  ;;  %607 = vmatprep.subr.bf16.mxu0 %v673_v20 }
  0x16   :  { %635 = vmatprep.subr.bf16.mxu1 %v674_v21 }
  0x18   :  { %608 = vmatpush3.bf16.msra.mxu0 %v675_v22 }
  0x19   :  { %636 = vmatpush3.bf16.msra.mxu1 %v676_v23  ;;  %609 = vmatprep.subr.bf16.mxu0 %v677_v24 }
  0x1a   :  { %637 = vmatprep.subr.bf16.mxu1 %v678_v25 }
  0x1c   :  { %610 = vmatpush3.bf16.msra.mxu0 %v679_v26 }
  0x1d   :  { %638 = vmatpush3.bf16.msra.mxu1 %v680_v27  ;;  %611 = vmatprep.subr.bf16.mxu0 %v681_v28 }
  0x1e   :  { %639 = vmatprep.subr.bf16.mxu1 %v682_v29 }
  0x20   :  { %612 = vmatpush3.bf16.msra.mxu0 %v683_v30 }
  0x21   :  { %640 = vmatpush3.bf16.msra.mxu1 %v684_v31 }
  0x23   :  { %358 = vmatmul.mubr.bf16.vlgmr.msra.gmra.mrb[0].mxu0 %v685_v32 }
  0x24   :  { %407 = vmatmul.mubr.bf16.vlgmr.msra.gmra.mrb[0].mxu1 %v688_v34  ;;  %365 = vmatprep.mubr.bf16.mxu0 %v691_v36 }
  0x25   :  { %414 = vmatprep.mubr.bf16.mxu1 %v693_v37 }
  0x2b   :  { %366 = vmatmul.mubr.bf16.gmra.mrb[4].mxu0 %v695_v38 }
  0x2c   :  { %415 = vmatmul.mubr.bf16.gmra.mrb[4].mxu1 %v696_v39 }
  0xf6   :  { %v613_v40 = vpop.f32.mrb[0].mxu0 }
  0xf7   :  { %v641_v41 = vpop.f32.mrb[0].mxu1  ;;  %v614_v42 = vpop.f32.mrb[1].mxu0 }
  0xf8   :  { %v615_v43 = vadd.f32 %v614_v42, %v613_v40  ;;  %v642_v44 = vpop.f32.mrb[1].mxu1  ;;  %v616_v45 = vpop.f32.mrb[2].mxu0 }
  0xf9   :  { %v643_v46 = vadd.f32 %v642_v44, %v641_v41  ;;  %v644_v47 = vpop.f32.mrb[2].mxu1  ;;  %v617_v48 = vpop.f32.mrb[3].mxu0  ;;  %v465_v41 = vlaneseq }
  0xfa   :  { %v618_v49 = vadd.f32 %v617_v48, %v616_v45  ;;  %v645_v50 = vpop.f32.mrb[3].mxu1  ;;  %v595_v48 = vld [vmem:[%s883_s3] ss:$0 sm:$0xff] }
  0xfb   :  { %v409_v51 = vadd.f32 %v643_v46, %v615_v43  ;;  %v646_v52 = vadd.f32 %v645_v50, %v644_v47  ;;  %v466_v42 = vshrl.u32 %v465_v41, 7  ;;  %v463_v43 = vld [vmem:[%s882_s2] sm:$0x1] }
  0xfd   :  { %v412_v53 = vadd.f32 %v646_v52, %v618_v49  ;;  %v424_v55 = vsel %vm423_vm0, %v409_v51, 0.0  ;;  %v467_v44 = vsub.s32 0, %v466_v42 }
  0xfe   :  { %v619_v54 = vpop.f32.mrb[4].mxu0 }
  0xff   :  { %v425_v56 = vsel %vm423_vm0, %v412_v53, 0.0  ;;  %v647_v57 = vpop.f32.mrb[4].mxu1  ;;  %v620_v58 = vpop.f32.mrb[5].mxu0 }
 0x100   :  { %v426_v59 = vadd.f32 %v425_v56, %v424_v55  ;;  %v621_v60 = vadd.f32 %v620_v58, %v619_v54  ;;  %v648_v61 = vpop.f32.mrb[5].mxu1  ;;  %v622_v62 = vpop.f32.mrb[6].mxu0 }
 0x101   :  { %v649_v63 = vadd.f32 %v648_v61, %v647_v57  ;;  %v650_v0 = vpop.f32.mrb[6].mxu1  ;;  %v623_v1 = vpop.f32.mrb[7].mxu0 }
 0x102   :  { %v624_v2 = vadd.f32 %v623_v1, %v622_v62  ;;  %v651_v3 = vpop.f32.mrb[7].mxu1  ;;  %v493_v1 = vld [vmem:[%s884_s4 + $0x8] sm:$0xff] }
 0x103   :  { %v417_v4 = vadd.f32 %v649_v63, %v621_v60  ;;  %v652_v5 = vadd.f32 %v651_v3, %v650_v0  ;;  %v492_v60 = vld [vmem:[%s884_s4] sm:$0xff] }
 0x105   :  { %v427_v6 = vsel %vm423_vm0, %v417_v4, 0.0  ;;  %v420_v7 = vadd.f32 %v652_v5, %v624_v2 }
 0x106   :  { %v428_v8 = vadd.f32 %v427_v6, %v426_v59 }
 0x107   :  { %v429_v9 = vsel %vm423_vm0, %v420_v7, 0.0 }
 0x108   :  { %v430_v10 = vadd.f32 %v429_v9, %v428_v8 }
 0x10a   :  { %v431_v11 = vrot.slane %v430_v10, 4 }
 0x10c   :  { %v432_v12 = vadd.f32 %v431_v11, %v430_v10  ;;  %v515_v11 = vand.u32 127, %v465_v41 }
 0x10e   :  { %v433_v13 = vrot.slane %v432_v12, 2 }
 0x110   :  { %v434_v14 = vadd.f32 %v433_v13, %v432_v12  ;;  %v520_v12 = vadd.s32 4294967288, %v515_v11 }
 0x112   :  { %v435_v15 = vrot.slane %v434_v14, 1 }
 0x114   :  { %v436_v16 = vadd.f32 %v435_v15, %v434_v14  ;;  %v518_v15 = vsub.s32 %v515_v11, %v466_v42 }
 0x116   :  { %v438_v17 = vmul.f32 0.03125, %v436_v16  ;;  %v523_v16 = vsub.s32 %v520_v12, %v466_v42 }
 0x118   :  { %v439_v18 = vsub.f32 %v409_v51, %v438_v17  ;;  %v440_v19 = vsub.f32 %v412_v53, %v438_v17  ;;  %v441_v20 = vsub.f32 %v417_v4, %v438_v17  ;;  %v442_v21 = vsub.f32 %v420_v7, %v438_v17 }
 0x11a   :  { %v443_v22 = vmul.f32 %v439_v18, %v439_v18  ;;  %v444_v23 = vmul.f32 %v440_v19, %v440_v19  ;;  %v445_v24 = vmul.f32 %v441_v20, %v441_v20  ;;  %v446_v25 = vmul.f32 %v442_v21, %v442_v21 }
 0x11c   :  { %v447_v26 = vsel %vm423_vm0, %v443_v22, 0.0  ;;  %v448_v27 = vsel %vm423_vm0, %v444_v23, 0.0  ;;  %v450_v29 = vsel %vm423_vm0, %v445_v24, 0.0  ;;  %v452_v31 = vsel %vm423_vm0, %v446_v25, 0.0 }
 0x11d   :  { %v449_v28 = vadd.f32 %v448_v27, %v447_v26 }
 0x11f   :  { %v451_v30 = vadd.f32 %v450_v29, %v449_v28 }
 0x121   :  { %v453_v32 = vadd.f32 %v452_v31, %v451_v30 }
 0x123   :  { %v454_v33 = vrot.slane %v453_v32, 4 }
 0x125   :  { %v455_v34 = vadd.f32 %v454_v33, %v453_v32 }
 0x127   :  { %v456_v35 = vrot.slane %v455_v34, 2 }
 0x129   :  { %v457_v36 = vadd.f32 %v456_v35, %v455_v34 }
 0x12b   :  { %v458_v37 = vrot.slane %v457_v36, 1 }
 0x12d   :  { %v459_v38 = vadd.f32 %v458_v37, %v457_v36 }
 0x12f   :  { %v460_v39 = vmul.f32 0.03125, %v459_v38 }
 0x131   :  { %v461_v40 = vadd.f32 1e-05, %v460_v39 }
 0x133   :  { %697 = vrsqrt.f32 %v461_v40 }
 0x13d   :  { %v698_v45 = vpop.eup %697 }
 0x13e   :  { %v464_v46 = vmul.f32 %v698_v45, %v463_v43 }
 0x140   :  { %v468_v47 = vrot.slane %v464_v46, %v467_v44 }
 0x142   :  { %v472_v49 = vmul.f32 %v468_v47, %v442_v21  ;;  %v471_v50 = vmul.f32 %v468_v47, %v441_v20  ;;  %v469_v51 = vmul.f32 %v468_v47, %v439_v18  ;;  %v470_v52 = vmul.f32 %v468_v47, %v440_v19 }
 0x144   :  { %v482_v53 = vadd.f32 %v595_v48, %v471_v50  ;;  %v480_v54 = vadd.f32 %v595_v48, %v469_v51  ;;  %v483_v55 = vadd.f32 %v595_v48, %v472_v49  ;;  %v481_v56 = vadd.f32 %v595_v48, %v470_v52 }
 0x146   :  { %v486_v57 = vmul.f32 0.2, %v482_v53  ;;  %v484_v58 = vmul.f32 0.2, %v480_v54  ;;  %v487_v59 = vmul.f32 0.2, %v483_v55 }
 0x147   :  { %v485_v61 = vmul.f32 0.2, %v481_v56 }
 0x148   :  { %v490_v62 = vmax.f32 %v482_v53, %v486_v57  ;;  %v488_v63 = vmax.f32 %v480_v54, %v484_v58  ;;  %v491_v0 = vmax.f32 %v483_v55, %v487_v59 }
 0x149   :  { %v489_v2 = vmax.f32 %v481_v56, %v485_v61 }
 0x14a   :  { %v496_v3 = vmul.f32 %v492_v60, %v490_v62  ;;  %v494_v4 = vmul.f32 %v492_v60, %v488_v63  ;;  %v497_v7 = vmul.f32 %v493_v1, %v491_v0 }
 0x14b   :  { %v495_v8 = vmul.f32 %v493_v1, %v489_v2 }
 0x14c   :  { %v504_v5 = vsel %vm423_vm0, %v496_v3, 0.0  ;;  %v498_v6 = vsel %vm423_vm0, %v494_v4, 0.0  ;;  %v507_v9 = vsel %vm423_vm0, %v497_v7, 0.0 }
 0x14d   :  { %505 = vadd.xlane.f32.xlu1 %v504_v5  ;;  %499 = vadd.xlane.f32.xlu0 %v498_v6  ;;  %v501_v10 = vsel %vm423_vm0, %v495_v8, 0.0 }
 0x151   :  { %508 = vadd.xlane.f32.xlu1 %v507_v9  ;;  %502 = vadd.xlane.f32.xlu0 %v501_v10 }
 0x1da   :  { %v506_v13 = vpop.xlane.xlu1 %505  ;;  %v500_v14 = vpop.xlane.xlu0 %499 }
 0x1db   :  { %v530_v19 = vrot.slane %v506_v13, %v518_v15  ;;  %v519_v20 = vrot.slane %v500_v14, %v518_v15 }
 0x1de   :  { %v509_v17 = vpop.xlane.xlu1 %508  ;;  %v503_v18 = vpop.xlane.xlu0 %502 }
 0x1df   :  { %v534_v21 = vrot.slane %v509_v17, %v523_v16  ;;  %v524_v22 = vrot.slane %v503_v18, %v523_v16 }
 0x1e1   :  { %v526_v23 = vsel %vm525_vm1, %v524_v22, %v519_v20  ;;  %v535_v24 = vsel %vm525_vm1, %v534_v21, %v530_v19 }
 0x1e2   :  { %v537_v25 = vsel %vm536_vm2, %v535_v24, %v526_v23 }
 0x1e3   :  { %v540_v26 = vsel %vm539_vm3, %v537_v25, 0.0 }
 0x1e4   :  { %541 = vadd.xlane.f32.xlu0 %v540_v26 }
 0x271   :  { %v542_v27 = vpop.xlane.xlu0 %541 }
 0x272   :  { %v596_v28 = vmul.f32 -1.442695, %v542_v27 }
 0x274   :  { %699 = vpow2.f32 %v596_v28 }
 0x27e   :  { %v700_v29 = vpop.eup %699 }
 0x27f   :  { %v546_v30 = vadd.f32 1.0, %v700_v29 }
 0x281   :  { %701 = vrcp.f32 %v546_v30 }
 0x28b   :  { %v702_v31 = vpop.eup %701 }
 0x28c   :  { %550 = vst.msk [vmem:[%s885_s5] sm:$0x3] %vm549_vm4, %v702_v31 }

</bundles_post_ra>
